<compile_context>
chip_gen: v6e
topology: v6e:2x2x1
jax: 0.10.0
libtpu: 0.0.40
codegen_flags: <defaults>
</compile_context>

<pallas_src>
import functools

import jax
import jax.numpy as jnp
from jax.experimental import pallas as pl
from jax.experimental.pallas import tpu as pltpu


def _layer_norm(z, gamma, beta, eps=1e-5):
    mu = jnp.mean(z, axis=-1, keepdims=True)
    var = jnp.mean((z - mu) ** 2, axis=-1, keepdims=True)
    return (z - mu) * jax.lax.rsqrt(var + eps) * gamma + beta


def encoder_layer_kernel(
    xq_ref, xkv_ref,
    wq_ref, bq_ref, wk_ref, bk_ref, wv_ref, bv_ref, wo_ref, bo_ref,
    g1_ref, be1_ref, w1_ref, b1_ref, w2_ref, b2_ref, g2_ref, be2_ref,
    out_ref, a_ref,
    attn_scratch,
    *, num_heads,
):
    xq = xq_ref[0]            # (tq, D) f32 — residual / LN path stays f32
    xkv = xkv_ref[0]          # (L,  D) f32 — full sequence for K/V
    tq, D = xq.shape
    dk = D // num_heads
    scale = jnp.float32(1.0 / (dk ** 0.5))

    xq_b = xq.astype(jnp.bfloat16)
    xkv_b = xkv.astype(jnp.bfloat16)

    # ---- Q/K/V projections: bf16 MXU inputs, f32 accumulation, f32 bias add ----
    q = jnp.dot(xq_b, wq_ref[...], preferred_element_type=jnp.float32) + bq_ref[...]
    q = q * scale  # fold 1/sqrt(dk) into Q once (saves H*tq*L VALU muls)
    k = jnp.dot(xkv_b, wk_ref[...], preferred_element_type=jnp.float32) + bk_ref[...]
    v = jnp.dot(xkv_b, wv_ref[...], preferred_element_type=jnp.float32) + bv_ref[...]

    qb = q.astype(jnp.bfloat16)
    kb = k.astype(jnp.bfloat16)
    vb = v.astype(jnp.bfloat16)

    # ---- multi-head attention; head outputs go straight into a VMEM slab ----
    for h in range(num_heads):
        sl = slice(h * dk, (h + 1) * dk)
        s = jnp.dot(qb[:, sl], kb[:, sl].T,
                    preferred_element_type=jnp.float32)           # (tq, L) f32
        m = jnp.max(s, axis=-1, keepdims=True)
        e = jnp.exp(s - m)                                        # f32 softmax
        p = e * pl.reciprocal(jnp.sum(e, axis=-1, keepdims=True), approx=True)
        a_ref[0, h, :, :] = p
        attn_scratch[:, sl] = jnp.dot(p.astype(jnp.bfloat16), vb[:, sl],
                                      preferred_element_type=jnp.float32)

    new_x = jnp.dot(attn_scratch[...].astype(jnp.bfloat16), wo_ref[...],
                    preferred_element_type=jnp.float32) + bo_ref[...]

    # ---- residual + norm1 (dropout1 == identity in eval mode) ----
    xn = _layer_norm(xq + new_x, g1_ref[...], be1_ref[...])

    # ---- FFN: conv1(k=1) -> relu -> conv2(k=1) (dropout2 == identity) ----
    y = jnp.dot(xn.astype(jnp.bfloat16), w1_ref[...],
                preferred_element_type=jnp.float32) + b1_ref[...]
    y = jnp.maximum(y, 0.0)
    y = jnp.dot(y.astype(jnp.bfloat16), w2_ref[...],
                preferred_element_type=jnp.float32) + b2_ref[...]

    # ---- residual + norm2 ----
    out_ref[0] = _layer_norm(xn + y, g2_ref[...], be2_ref[...])


def encoder_layer(x, params, num_heads, *, tq=None):
    B, L, D = x.shape
    d_ff = params["w1"].shape[1]
    H = num_heads
    if tq is None:
        tq = L if L <= 128 else 128
    assert L % tq == 0, "seq_len must be divisible by the query tile"
    nq = L // tq

    def wspec(r, c):
        return pl.BlockSpec((r, c), lambda b, qi: (0, 0))

    in_specs = [
        pl.BlockSpec((1, tq, D), lambda b, qi: (b, qi, 0)),   # x (query tile)
        pl.BlockSpec((1, L, D), lambda b, qi: (b, 0, 0)),     # x (full seq, for K/V)
        wspec(D, D), wspec(1, D),       # wq, bq
        wspec(D, D), wspec(1, D),       # wk, bk
        wspec(D, D), wspec(1, D),       # wv, bv
        wspec(D, D), wspec(1, D),       # wo, bo
        wspec(1, D), wspec(1, D),       # norm1 gamma, beta
        wspec(D, d_ff), wspec(1, d_ff),  # conv1 weight, bias
        wspec(d_ff, D), wspec(1, D),     # conv2 weight, bias
        wspec(1, D), wspec(1, D),       # norm2 gamma, beta
    ]
    out_specs = [
        pl.BlockSpec((1, tq, D), lambda b, qi: (b, qi, 0)),
        pl.BlockSpec((1, H, tq, L), lambda b, qi: (b, 0, qi, 0)),
    ]
    out_shapes = [
        jax.ShapeDtypeStruct((B, L, D), jnp.float32),
        jax.ShapeDtypeStruct((B, H, L, L), jnp.float32),
    ]

    kernel = functools.partial(encoder_layer_kernel, num_heads=num_heads)
    fn = pl.pallas_call(
        kernel,
        out_shape=out_shapes,
        grid=(B, nq),
        in_specs=in_specs,
        out_specs=out_specs,
        scratch_shapes=[pltpu.VMEM((tq, D), jnp.float32)],  # head-output slab
        compiler_params=pltpu.CompilerParams(
            dimension_semantics=("parallel", "parallel"),
            vmem_limit_bytes=32 * 1024 * 1024,
        ),
    )
    args = (
        x, x,
        params["wq"], params["bq"], params["wk"], params["bk"],
        params["wv"], params["bv"], params["wo"], params["bo"],
        params["g1"], params["be1"], params["w1"], params["b1"],
        params["w2"], params["b2"], params["g2"], params["be2"],
    )
    return fn(*args)


def _reference(x, p, num_heads):
    """Pure-JAX f32 reference mirroring the PyTorch forward (eval mode)."""
    B, L, D = x.shape
    H, dk = num_heads, D // num_heads
    f = lambda w: w.astype(jnp.float32)
    q = x @ f(p["wq"]) + p["bq"]
    k = x @ f(p["wk"]) + p["bk"]
    v = x @ f(p["wv"]) + p["bv"]
    qh = q.reshape(B, L, H, dk).transpose(0, 2, 1, 3)
    kh = k.reshape(B, L, H, dk).transpose(0, 2, 1, 3)
    vh = v.reshape(B, L, H, dk).transpose(0, 2, 1, 3)
    s = jnp.einsum("bhqd,bhkd->bhqk", qh, kh) / jnp.sqrt(jnp.float32(dk))
    A = jax.nn.softmax(s, axis=-1)
    o = jnp.einsum("bhqk,bhkd->bhqd", A, vh).transpose(0, 2, 1, 3).reshape(B, L, D)
    new_x = o @ f(p["wo"]) + p["bo"]

    def ln(z, g, b):
        mu = jnp.mean(z, -1, keepdims=True)
        var = jnp.mean((z - mu) ** 2, -1, keepdims=True)
        return (z - mu) / jnp.sqrt(var + 1e-5) * g + b

    xn = ln(x + new_x, p["g1"], p["be1"])
    y = jnp.maximum(xn @ f(p["w1"]) + p["b1"], 0.0)
    y = y @ f(p["w2"]) + p["b2"]
    return ln(xn + y, p["g2"], p["be2"]), A


def make_params(key, d_model, d_ff):
    keys = jax.random.split(key, 12)
    s = 0.02
    f32, bf16 = jnp.float32, jnp.bfloat16

    def w(k, shape):  # weight matrices stored in bf16 (MXU-native, half the VMEM)
        return (s * jax.random.normal(k, shape, f32)).astype(bf16)

    return {
        "wq": w(keys[0], (d_model, d_model)), "bq": jnp.zeros((1, d_model), f32),
        "wk": w(keys[1], (d_model, d_model)), "bk": jnp.zeros((1, d_model), f32),
        "wv": w(keys[2], (d_model, d_model)), "bv": jnp.zeros((1, d_model), f32),
        "wo": w(keys[3], (d_model, d_model)),
        "bo": s * jax.random.normal(keys[4], (1, d_model), f32),
        "g1": jnp.ones((1, d_model), f32), "be1": jnp.zeros((1, d_model), f32),
        "w1": w(keys[5], (d_model, d_ff)),                    # conv1 (k=1)
        "b1": s * jax.random.normal(keys[6], (1, d_ff), f32),
        "w2": w(keys[7], (d_ff, d_model)),                    # conv2 (k=1)
        "b2": s * jax.random.normal(keys[8], (1, d_model), f32),
        "g2": jnp.ones((1, d_model), f32), "be2": jnp.zeros((1, d_model), f32),
    }


if __name__ == "__main__":
    # Lane-dense small shapes: L, D, d_ff multiples of (8, 128) => unmasked stores.
    B, L, D, H, d_ff = 2, 128, 128, 4, 256
    key = jax.random.PRNGKey(0)
    kx, kp = jax.random.split(key)
    x = jax.random.normal(kx, (B, L, D), jnp.float32)
    params = make_params(kp, D, d_ff)

    out, A = encoder_layer(x, params, num_heads=H)
    out = jax.block_until_ready(out)
    A = jax.block_until_ready(A)

    ref_out, ref_A = _reference(x, params, H)
    assert out.shape == (B, L, D) and A.shape == (B, H, L, L)
    # bf16 matmul inputs => compare at bf16-class tolerance.
    assert jnp.allclose(out, ref_out, atol=2e-2, rtol=2e-2)
    assert jnp.allclose(A, ref_A, atol=2e-2, rtol=2e-2)
    print("KERNEL_OK")
</pallas_src>

<mosaic_0001>
module attributes {stable_mosaic.version = 11 : i64} {
  func.func @encoder_layer_kernel(%arg0: i32, %arg1: i32, %arg2: memref<1x128x128xf32, #tpu.memory_space<vmem>>, %arg3: memref<1x128x128xf32, #tpu.memory_space<vmem>>, %arg4: memref<128x128xbf16, #tpu.memory_space<vmem>>, %arg5: memref<1x128xf32, #tpu.memory_space<vmem>>, %arg6: memref<128x128xbf16, #tpu.memory_space<vmem>>, %arg7: memref<1x128xf32, #tpu.memory_space<vmem>>, %arg8: memref<128x128xbf16, #tpu.memory_space<vmem>>, %arg9: memref<1x128xf32, #tpu.memory_space<vmem>>, %arg10: memref<128x128xbf16, #tpu.memory_space<vmem>>, %arg11: memref<1x128xf32, #tpu.memory_space<vmem>>, %arg12: memref<1x128xf32, #tpu.memory_space<vmem>>, %arg13: memref<1x128xf32, #tpu.memory_space<vmem>>, %arg14: memref<128x256xbf16, #tpu.memory_space<vmem>>, %arg15: memref<1x256xf32, #tpu.memory_space<vmem>>, %arg16: memref<256x128xbf16, #tpu.memory_space<vmem>>, %arg17: memref<1x128xf32, #tpu.memory_space<vmem>>, %arg18: memref<1x128xf32, #tpu.memory_space<vmem>>, %arg19: memref<1x128xf32, #tpu.memory_space<vmem>>, %arg20: memref<1x128x128xf32, #tpu.memory_space<vmem>>, %arg21: memref<1x4x128x128xf32, #tpu.memory_space<vmem>>, %arg22: memref<128x128xf32, #tpu.memory_space<vmem>>) attributes {dimension_semantics = [#tpu.dimension_semantics<parallel>, #tpu.dimension_semantics<parallel>], iteration_bounds = array<i64: 2, 1>, scalar_prefetch = 0 : i64, scratch_operands = 1 : i64, tpu.core_type = #tpu.core_type<tc>, window_params = [{transform_indices = @transform_0, window_bounds = array<i64: 1, 128, 128>}, {transform_indices = @transform_1, window_bounds = array<i64: 1, 128, 128>}, {pipeline_mode = #tpu.pipeline_mode<synchronous>, transform_indices = @transform_2, window_bounds = array<i64: 128, 128>}, {pipeline_mode = #tpu.pipeline_mode<synchronous>, transform_indices = @transform_3, window_bounds = array<i64: 1, 128>}, {pipeline_mode = #tpu.pipeline_mode<synchronous>, transform_indices = @transform_4, window_bounds = array<i64: 128, 128>}, {pipeline_mode = #tpu.pipeline_mode<synchronous>, transform_indices = @transform_5, window_bounds = array<i64: 1, 128>}, {pipeline_mode = #tpu.pipeline_mode<synchronous>, transform_indices = @transform_6, window_bounds = array<i64: 128, 128>}, {pipeline_mode = #tpu.pipeline_mode<synchronous>, transform_indices = @transform_7, window_bounds = array<i64: 1, 128>}, {pipeline_mode = #tpu.pipeline_mode<synchronous>, transform_indices = @transform_8, window_bounds = array<i64: 128, 128>}, {pipeline_mode = #tpu.pipeline_mode<synchronous>, transform_indices = @transform_9, window_bounds = array<i64: 1, 128>}, {pipeline_mode = #tpu.pipeline_mode<synchronous>, transform_indices = @transform_10, window_bounds = array<i64: 1, 128>}, {pipeline_mode = #tpu.pipeline_mode<synchronous>, transform_indices = @transform_11, window_bounds = array<i64: 1, 128>}, {pipeline_mode = #tpu.pipeline_mode<synchronous>, transform_indices = @transform_12, window_bounds = array<i64: 128, 256>}, {pipeline_mode = #tpu.pipeline_mode<synchronous>, transform_indices = @transform_13, window_bounds = array<i64: 1, 256>}, {pipeline_mode = #tpu.pipeline_mode<synchronous>, transform_indices = @transform_14, window_bounds = array<i64: 256, 128>}, {pipeline_mode = #tpu.pipeline_mode<synchronous>, transform_indices = @transform_15, window_bounds = array<i64: 1, 128>}, {pipeline_mode = #tpu.pipeline_mode<synchronous>, transform_indices = @transform_16, window_bounds = array<i64: 1, 128>}, {pipeline_mode = #tpu.pipeline_mode<synchronous>, transform_indices = @transform_17, window_bounds = array<i64: 1, 128>}, {transform_indices = @transform_18, window_bounds = array<i64: 1, 128, 128>}, {transform_indices = @transform_19, window_bounds = array<i64: 1, 4, 128, 128>}]} {
    %c0 = arith.constant 0 : index
    %c0_0 = arith.constant 0 : index
    %c0_1 = arith.constant 0 : index
    %0 = vector.load %arg2[%c0, %c0_0, %c0_1] : memref<1x128x128xf32, #tpu.memory_space<vmem>>, vector<1x128x128xf32>
    %1 = vector.shape_cast %0 : vector<1x128x128xf32> to vector<128x128xf32>
    %c0_2 = arith.constant 0 : index
    %c0_3 = arith.constant 0 : index
    %c0_4 = arith.constant 0 : index
    %2 = vector.load %arg3[%c0_2, %c0_3, %c0_4] : memref<1x128x128xf32, #tpu.memory_space<vmem>>, vector<1x128x128xf32>
    %3 = vector.shape_cast %2 : vector<1x128x128xf32> to vector<128x128xf32>
    %4 = arith.truncf %1 : vector<128x128xf32> to vector<128x128xbf16>
    %5 = arith.truncf %3 : vector<128x128xf32> to vector<128x128xbf16>
    %c0_5 = arith.constant 0 : index
    %c0_6 = arith.constant 0 : index
    %6 = vector.load %arg4[%c0_5, %c0_6] : memref<128x128xbf16, #tpu.memory_space<vmem>>, vector<128x128xbf16>
    %cst = arith.constant dense<0.000000e+00> : vector<128x128xf32>
    %7 = tpu.matmul %4, %6, %cst {dimension_numbers = #tpu.dot_dimension_numbers<[1], [0], [0], [1], [0, 0, 1, 1], [], []>} : vector<128x128xbf16>, vector<128x128xbf16>, vector<128x128xf32> -> vector<128x128xf32>
    %c0_7 = arith.constant 0 : index
    %c0_8 = arith.constant 0 : index
    %8 = vector.load %arg5[%c0_7, %c0_8] : memref<1x128xf32, #tpu.memory_space<vmem>>, vector<1x128xf32>
    %9 = vector.broadcast %8 : vector<1x128xf32> to vector<128x128xf32>
    %10 = arith.addf %7, %9 : vector<128x128xf32>
    %cst_9 = arith.constant 0.176776692 : f32
    %11 = vector.broadcast %cst_9 : f32 to vector<128x128xf32>
    %12 = arith.mulf %10, %11 : vector<128x128xf32>
    %c0_10 = arith.constant 0 : index
    %c0_11 = arith.constant 0 : index
    %13 = vector.load %arg6[%c0_10, %c0_11] : memref<128x128xbf16, #tpu.memory_space<vmem>>, vector<128x128xbf16>
    %cst_12 = arith.constant dense<0.000000e+00> : vector<128x128xf32>
    %14 = tpu.matmul %5, %13, %cst_12 {dimension_numbers = #tpu.dot_dimension_numbers<[1], [0], [0], [1], [0, 0, 1, 1], [], []>} : vector<128x128xbf16>, vector<128x128xbf16>, vector<128x128xf32> -> vector<128x128xf32>
    %c0_13 = arith.constant 0 : index
    %c0_14 = arith.constant 0 : index
    %15 = vector.load %arg7[%c0_13, %c0_14] : memref<1x128xf32, #tpu.memory_space<vmem>>, vector<1x128xf32>
    %16 = vector.broadcast %15 : vector<1x128xf32> to vector<128x128xf32>
    %17 = arith.addf %14, %16 : vector<128x128xf32>
    %c0_15 = arith.constant 0 : index
    %c0_16 = arith.constant 0 : index
    %18 = vector.load %arg8[%c0_15, %c0_16] : memref<128x128xbf16, #tpu.memory_space<vmem>>, vector<128x128xbf16>
    %cst_17 = arith.constant dense<0.000000e+00> : vector<128x128xf32>
    %19 = tpu.matmul %5, %18, %cst_17 {dimension_numbers = #tpu.dot_dimension_numbers<[1], [0], [0], [1], [0, 0, 1, 1], [], []>} : vector<128x128xbf16>, vector<128x128xbf16>, vector<128x128xf32> -> vector<128x128xf32>
    %c0_18 = arith.constant 0 : index
    %c0_19 = arith.constant 0 : index
    %20 = vector.load %arg9[%c0_18, %c0_19] : memref<1x128xf32, #tpu.memory_space<vmem>>, vector<1x128xf32>
    %21 = vector.broadcast %20 : vector<1x128xf32> to vector<128x128xf32>
    %22 = arith.addf %19, %21 : vector<128x128xf32>
    %23 = arith.truncf %12 : vector<128x128xf32> to vector<128x128xbf16>
    %24 = arith.truncf %17 : vector<128x128xf32> to vector<128x128xbf16>
    %25 = arith.truncf %22 : vector<128x128xf32> to vector<128x128xbf16>
    %26 = vector.extract_strided_slice %23 {offsets = [0, 0], sizes = [128, 32], strides = [1, 1]} : vector<128x128xbf16> to vector<128x32xbf16>
    %27 = vector.extract_strided_slice %24 {offsets = [0, 0], sizes = [128, 32], strides = [1, 1]} : vector<128x128xbf16> to vector<128x32xbf16>
    %28 = tpu.transpose %27, [1, 0] : vector<128x32xbf16> -> vector<32x128xbf16>
    %cst_20 = arith.constant dense<0.000000e+00> : vector<128x128xf32>
    %29 = tpu.matmul %26, %28, %cst_20 {dimension_numbers = #tpu.dot_dimension_numbers<[1], [0], [0], [1], [0, 0, 1, 1], [], []>} : vector<128x32xbf16>, vector<32x128xbf16>, vector<128x128xf32> -> vector<128x128xf32>
    %cst_21 = arith.constant dense<0xFF800000> : vector<128xf32>
    %30 = vector.multi_reduction <maximumf>, %29, %cst_21 [1] : vector<128x128xf32> to vector<128xf32>
    %31 = vector.shape_cast %30 : vector<128xf32> to vector<128x1xf32>
    %32 = vector.broadcast %31 : vector<128x1xf32> to vector<128x128xf32>
    %33 = arith.subf %29, %32 : vector<128x128xf32>
    %34 = math.exp %33 : vector<128x128xf32>
    %cst_22 = arith.constant dense<0.000000e+00> : vector<128xf32>
    %35 = vector.multi_reduction <add>, %34, %cst_22 [1] : vector<128x128xf32> to vector<128xf32>
    %36 = vector.shape_cast %35 : vector<128xf32> to vector<128x1xf32>
    %37 = tpu.reciprocal %36 {approx = true} : vector<128x1xf32> -> vector<128x1xf32>
    %38 = vector.broadcast %37 : vector<128x1xf32> to vector<128x128xf32>
    %39 = arith.mulf %34, %38 : vector<128x128xf32>
    %c0_23 = arith.constant 0 : index
    %c0_24 = arith.constant 0 : index
    %c0_25 = arith.constant 0 : index
    %c0_26 = arith.constant 0 : index
    %40 = vector.load %arg21[%c0_23, %c0_24, %c0_25, %c0_26] : memref<1x4x128x128xf32, #tpu.memory_space<vmem>>, vector<1x1x128x128xf32>
    %41 = vector.shape_cast %40 : vector<1x1x128x128xf32> to vector<128x128xf32>
    %42 = vector.shape_cast %39 : vector<128x128xf32> to vector<1x1x128x128xf32>
    tpu.vector_store %arg21[%c0_23, %c0_24, %c0_25, %c0_26], %42 {strides = array<i32>} : memref<1x4x128x128xf32, #tpu.memory_space<vmem>>, vector<1x1x128x128xf32>,
    %43 = arith.truncf %39 : vector<128x128xf32> to vector<128x128xbf16>
    %44 = vector.extract_strided_slice %25 {offsets = [0, 0], sizes = [128, 32], strides = [1, 1]} : vector<128x128xbf16> to vector<128x32xbf16>
    %cst_27 = arith.constant dense<0.000000e+00> : vector<128x32xf32>
    %45 = tpu.matmul %43, %44, %cst_27 {dimension_numbers = #tpu.dot_dimension_numbers<[1], [0], [0], [1], [0, 0, 1, 1], [], []>} : vector<128x128xbf16>, vector<128x32xbf16>, vector<128x32xf32> -> vector<128x32xf32>
    %c0_28 = arith.constant 0 : index
    %c0_29 = arith.constant 0 : index
    %46 = vector.load %arg22[%c0_28, %c0_29] : memref<128x128xf32, #tpu.memory_space<vmem>>, vector<128x32xf32>
    tpu.vector_store %arg22[%c0_28, %c0_29], %45 {strides = array<i32>} : memref<128x128xf32, #tpu.memory_space<vmem>>, vector<128x32xf32>,
    %47 = vector.extract_strided_slice %23 {offsets = [0, 32], sizes = [128, 32], strides = [1, 1]} : vector<128x128xbf16> to vector<128x32xbf16>
    %48 = vector.extract_strided_slice %24 {offsets = [0, 32], sizes = [128, 32], strides = [1, 1]} : vector<128x128xbf16> to vector<128x32xbf16>
    %49 = tpu.transpose %48, [1, 0] : vector<128x32xbf16> -> vector<32x128xbf16>
    %cst_30 = arith.constant dense<0.000000e+00> : vector<128x128xf32>
    %50 = tpu.matmul %47, %49, %cst_30 {dimension_numbers = #tpu.dot_dimension_numbers<[1], [0], [0], [1], [0, 0, 1, 1], [], []>} : vector<128x32xbf16>, vector<32x128xbf16>, vector<128x128xf32> -> vector<128x128xf32>
    %cst_31 = arith.constant dense<0xFF800000> : vector<128xf32>
    %51 = vector.multi_reduction <maximumf>, %50, %cst_31 [1] : vector<128x128xf32> to vector<128xf32>
    %52 = vector.shape_cast %51 : vector<128xf32> to vector<128x1xf32>
    %53 = vector.broadcast %52 : vector<128x1xf32> to vector<128x128xf32>
    %54 = arith.subf %50, %53 : vector<128x128xf32>
    %55 = math.exp %54 : vector<128x128xf32>
    %cst_32 = arith.constant dense<0.000000e+00> : vector<128xf32>
    %56 = vector.multi_reduction <add>, %55, %cst_32 [1] : vector<128x128xf32> to vector<128xf32>
    %57 = vector.shape_cast %56 : vector<128xf32> to vector<128x1xf32>
    %58 = tpu.reciprocal %57 {approx = true} : vector<128x1xf32> -> vector<128x1xf32>
    %59 = vector.broadcast %58 : vector<128x1xf32> to vector<128x128xf32>
    %60 = arith.mulf %55, %59 : vector<128x128xf32>
    %c0_33 = arith.constant 0 : index
    %c1 = arith.constant 1 : index
    %c0_34 = arith.constant 0 : index
    %c0_35 = arith.constant 0 : index
    %61 = vector.load %arg21[%c0_33, %c1, %c0_34, %c0_35] : memref<1x4x128x128xf32, #tpu.memory_space<vmem>>, vector<1x1x128x128xf32>
    %62 = vector.shape_cast %61 : vector<1x1x128x128xf32> to vector<128x128xf32>
    %63 = vector.shape_cast %60 : vector<128x128xf32> to vector<1x1x128x128xf32>
    tpu.vector_store %arg21[%c0_33, %c1, %c0_34, %c0_35], %63 {strides = array<i32>} : memref<1x4x128x128xf32, #tpu.memory_space<vmem>>, vector<1x1x128x128xf32>,
    %64 = arith.truncf %60 : vector<128x128xf32> to vector<128x128xbf16>
    %65 = vector.extract_strided_slice %25 {offsets = [0, 32], sizes = [128, 32], strides = [1, 1]} : vector<128x128xbf16> to vector<128x32xbf16>
    %cst_36 = arith.constant dense<0.000000e+00> : vector<128x32xf32>
    %66 = tpu.matmul %64, %65, %cst_36 {dimension_numbers = #tpu.dot_dimension_numbers<[1], [0], [0], [1], [0, 0, 1, 1], [], []>} : vector<128x128xbf16>, vector<128x32xbf16>, vector<128x32xf32> -> vector<128x32xf32>
    %c0_37 = arith.constant 0 : index
    %c32 = arith.constant 32 : index
    %67 = vector.load %arg22[%c0_37, %c32] : memref<128x128xf32, #tpu.memory_space<vmem>>, vector<128x32xf32>
    tpu.vector_store %arg22[%c0_37, %c32], %66 {strides = array<i32>} : memref<128x128xf32, #tpu.memory_space<vmem>>, vector<128x32xf32>,
    %68 = vector.extract_strided_slice %23 {offsets = [0, 64], sizes = [128, 32], strides = [1, 1]} : vector<128x128xbf16> to vector<128x32xbf16>
    %69 = vector.extract_strided_slice %24 {offsets = [0, 64], sizes = [128, 32], strides = [1, 1]} : vector<128x128xbf16> to vector<128x32xbf16>
    %70 = tpu.transpose %69, [1, 0] : vector<128x32xbf16> -> vector<32x128xbf16>
    %cst_38 = arith.constant dense<0.000000e+00> : vector<128x128xf32>
    %71 = tpu.matmul %68, %70, %cst_38 {dimension_numbers = #tpu.dot_dimension_numbers<[1], [0], [0], [1], [0, 0, 1, 1], [], []>} : vector<128x32xbf16>, vector<32x128xbf16>, vector<128x128xf32> -> vector<128x128xf32>
    %cst_39 = arith.constant dense<0xFF800000> : vector<128xf32>
    %72 = vector.multi_reduction <maximumf>, %71, %cst_39 [1] : vector<128x128xf32> to vector<128xf32>
    %73 = vector.shape_cast %72 : vector<128xf32> to vector<128x1xf32>
    %74 = vector.broadcast %73 : vector<128x1xf32> to vector<128x128xf32>
    %75 = arith.subf %71, %74 : vector<128x128xf32>
    %76 = math.exp %75 : vector<128x128xf32>
    %cst_40 = arith.constant dense<0.000000e+00> : vector<128xf32>
    %77 = vector.multi_reduction <add>, %76, %cst_40 [1] : vector<128x128xf32> to vector<128xf32>
    %78 = vector.shape_cast %77 : vector<128xf32> to vector<128x1xf32>
    %79 = tpu.reciprocal %78 {approx = true} : vector<128x1xf32> -> vector<128x1xf32>
    %80 = vector.broadcast %79 : vector<128x1xf32> to vector<128x128xf32>
    %81 = arith.mulf %76, %80 : vector<128x128xf32>
    %c0_41 = arith.constant 0 : index
    %c2 = arith.constant 2 : index
    %c0_42 = arith.constant 0 : index
    %c0_43 = arith.constant 0 : index
    %82 = vector.load %arg21[%c0_41, %c2, %c0_42, %c0_43] : memref<1x4x128x128xf32, #tpu.memory_space<vmem>>, vector<1x1x128x128xf32>
    %83 = vector.shape_cast %82 : vector<1x1x128x128xf32> to vector<128x128xf32>
    %84 = vector.shape_cast %81 : vector<128x128xf32> to vector<1x1x128x128xf32>
    tpu.vector_store %arg21[%c0_41, %c2, %c0_42, %c0_43], %84 {strides = array<i32>} : memref<1x4x128x128xf32, #tpu.memory_space<vmem>>, vector<1x1x128x128xf32>,
    %85 = arith.truncf %81 : vector<128x128xf32> to vector<128x128xbf16>
    %86 = vector.extract_strided_slice %25 {offsets = [0, 64], sizes = [128, 32], strides = [1, 1]} : vector<128x128xbf16> to vector<128x32xbf16>
    %cst_44 = arith.constant dense<0.000000e+00> : vector<128x32xf32>
    %87 = tpu.matmul %85, %86, %cst_44 {dimension_numbers = #tpu.dot_dimension_numbers<[1], [0], [0], [1], [0, 0, 1, 1], [], []>} : vector<128x128xbf16>, vector<128x32xbf16>, vector<128x32xf32> -> vector<128x32xf32>
    %c0_45 = arith.constant 0 : index
    %c64 = arith.constant 64 : index
    %88 = vector.load %arg22[%c0_45, %c64] : memref<128x128xf32, #tpu.memory_space<vmem>>, vector<128x32xf32>
    tpu.vector_store %arg22[%c0_45, %c64], %87 {strides = array<i32>} : memref<128x128xf32, #tpu.memory_space<vmem>>, vector<128x32xf32>,
    %89 = vector.extract_strided_slice %23 {offsets = [0, 96], sizes = [128, 32], strides = [1, 1]} : vector<128x128xbf16> to vector<128x32xbf16>
    %90 = vector.extract_strided_slice %24 {offsets = [0, 96], sizes = [128, 32], strides = [1, 1]} : vector<128x128xbf16> to vector<128x32xbf16>
    %91 = tpu.transpose %90, [1, 0] : vector<128x32xbf16> -> vector<32x128xbf16>
    %cst_46 = arith.constant dense<0.000000e+00> : vector<128x128xf32>
    %92 = tpu.matmul %89, %91, %cst_46 {dimension_numbers = #tpu.dot_dimension_numbers<[1], [0], [0], [1], [0, 0, 1, 1], [], []>} : vector<128x32xbf16>, vector<32x128xbf16>, vector<128x128xf32> -> vector<128x128xf32>
    %cst_47 = arith.constant dense<0xFF800000> : vector<128xf32>
    %93 = vector.multi_reduction <maximumf>, %92, %cst_47 [1] : vector<128x128xf32> to vector<128xf32>
    %94 = vector.shape_cast %93 : vector<128xf32> to vector<128x1xf32>
    %95 = vector.broadcast %94 : vector<128x1xf32> to vector<128x128xf32>
    %96 = arith.subf %92, %95 : vector<128x128xf32>
    %97 = math.exp %96 : vector<128x128xf32>
    %cst_48 = arith.constant dense<0.000000e+00> : vector<128xf32>
    %98 = vector.multi_reduction <add>, %97, %cst_48 [1] : vector<128x128xf32> to vector<128xf32>
    %99 = vector.shape_cast %98 : vector<128xf32> to vector<128x1xf32>
    %100 = tpu.reciprocal %99 {approx = true} : vector<128x1xf32> -> vector<128x1xf32>
    %101 = vector.broadcast %100 : vector<128x1xf32> to vector<128x128xf32>
    %102 = arith.mulf %97, %101 : vector<128x128xf32>
    %c0_49 = arith.constant 0 : index
    %c3 = arith.constant 3 : index
    %c0_50 = arith.constant 0 : index
    %c0_51 = arith.constant 0 : index
    %103 = vector.load %arg21[%c0_49, %c3, %c0_50, %c0_51] : memref<1x4x128x128xf32, #tpu.memory_space<vmem>>, vector<1x1x128x128xf32>
    %104 = vector.shape_cast %103 : vector<1x1x128x128xf32> to vector<128x128xf32>
    %105 = vector.shape_cast %102 : vector<128x128xf32> to vector<1x1x128x128xf32>
    tpu.vector_store %arg21[%c0_49, %c3, %c0_50, %c0_51], %105 {strides = array<i32>} : memref<1x4x128x128xf32, #tpu.memory_space<vmem>>, vector<1x1x128x128xf32>,
    %106 = arith.truncf %102 : vector<128x128xf32> to vector<128x128xbf16>
    %107 = vector.extract_strided_slice %25 {offsets = [0, 96], sizes = [128, 32], strides = [1, 1]} : vector<128x128xbf16> to vector<128x32xbf16>
    %cst_52 = arith.constant dense<0.000000e+00> : vector<128x32xf32>
    %108 = tpu.matmul %106, %107, %cst_52 {dimension_numbers = #tpu.dot_dimension_numbers<[1], [0], [0], [1], [0, 0, 1, 1], [], []>} : vector<128x128xbf16>, vector<128x32xbf16>, vector<128x32xf32> -> vector<128x32xf32>
    %c0_53 = arith.constant 0 : index
    %c96 = arith.constant 96 : index
    %109 = vector.load %arg22[%c0_53, %c96] : memref<128x128xf32, #tpu.memory_space<vmem>>, vector<128x32xf32>
    tpu.vector_store %arg22[%c0_53, %c96], %108 {strides = array<i32>} : memref<128x128xf32, #tpu.memory_space<vmem>>, vector<128x32xf32>,
    %c0_54 = arith.constant 0 : index
    %c0_55 = arith.constant 0 : index
    %110 = vector.load %arg22[%c0_54, %c0_55] : memref<128x128xf32, #tpu.memory_space<vmem>>, vector<128x128xf32>
    %111 = arith.truncf %110 : vector<128x128xf32> to vector<128x128xbf16>
    %c0_56 = arith.constant 0 : index
    %c0_57 = arith.constant 0 : index
    %112 = vector.load %arg10[%c0_56, %c0_57] : memref<128x128xbf16, #tpu.memory_space<vmem>>, vector<128x128xbf16>
    %cst_58 = arith.constant dense<0.000000e+00> : vector<128x128xf32>
    %113 = tpu.matmul %111, %112, %cst_58 {dimension_numbers = #tpu.dot_dimension_numbers<[1], [0], [0], [1], [0, 0, 1, 1], [], []>} : vector<128x128xbf16>, vector<128x128xbf16>, vector<128x128xf32> -> vector<128x128xf32>
    %c0_59 = arith.constant 0 : index
    %c0_60 = arith.constant 0 : index
    %114 = vector.load %arg11[%c0_59, %c0_60] : memref<1x128xf32, #tpu.memory_space<vmem>>, vector<1x128xf32>
    %115 = vector.broadcast %114 : vector<1x128xf32> to vector<128x128xf32>
    %116 = arith.addf %113, %115 : vector<128x128xf32>
    %117 = arith.addf %1, %116 : vector<128x128xf32>
    %c0_61 = arith.constant 0 : index
    %c0_62 = arith.constant 0 : index
    %118 = vector.load %arg12[%c0_61, %c0_62] : memref<1x128xf32, #tpu.memory_space<vmem>>, vector<1x128xf32>
    %c0_63 = arith.constant 0 : index
    %c0_64 = arith.constant 0 : index
    %119 = vector.load %arg13[%c0_63, %c0_64] : memref<1x128xf32, #tpu.memory_space<vmem>>, vector<1x128xf32>
    %cst_65 = arith.constant dense<0.000000e+00> : vector<128xf32>
    %120 = vector.multi_reduction <add>, %117, %cst_65 [1] : vector<128x128xf32> to vector<128xf32>
    %121 = vector.shape_cast %120 : vector<128xf32> to vector<128x1xf32>
    %cst_66 = arith.constant 1.280000e+02 : f32
    %122 = vector.broadcast %cst_66 : f32 to vector<128x1xf32>
    %123 = arith.divf %121, %122 : vector<128x1xf32>
    %124 = vector.broadcast %123 : vector<128x1xf32> to vector<128x128xf32>
    %125 = arith.subf %117, %124 : vector<128x128xf32>
    %126 = arith.mulf %125, %125 : vector<128x128xf32>
    %cst_67 = arith.constant dense<0.000000e+00> : vector<128xf32>
    %127 = vector.multi_reduction <add>, %126, %cst_67 [1] : vector<128x128xf32> to vector<128xf32>
    %128 = vector.shape_cast %127 : vector<128xf32> to vector<128x1xf32>
    %cst_68 = arith.constant 1.280000e+02 : f32
    %129 = vector.broadcast %cst_68 : f32 to vector<128x1xf32>
    %130 = arith.divf %128, %129 : vector<128x1xf32>
    %131 = vector.broadcast %123 : vector<128x1xf32> to vector<128x128xf32>
    %132 = arith.subf %117, %131 : vector<128x128xf32>
    %cst_69 = arith.constant 9.99999974E-6 : f32
    %133 = vector.broadcast %cst_69 : f32 to vector<128x1xf32>
    %134 = arith.addf %130, %133 : vector<128x1xf32>
    %135 = math.rsqrt %134 : vector<128x1xf32>
    %136 = vector.broadcast %135 : vector<128x1xf32> to vector<128x128xf32>
    %137 = arith.mulf %132, %136 : vector<128x128xf32>
    %138 = vector.broadcast %118 : vector<1x128xf32> to vector<128x128xf32>
    %139 = arith.mulf %137, %138 : vector<128x128xf32>
    %140 = vector.broadcast %119 : vector<1x128xf32> to vector<128x128xf32>
    %141 = arith.addf %139, %140 : vector<128x128xf32>
    %142 = arith.truncf %141 : vector<128x128xf32> to vector<128x128xbf16>
    %c0_70 = arith.constant 0 : index
    %c0_71 = arith.constant 0 : index
    %143 = vector.load %arg14[%c0_70, %c0_71] : memref<128x256xbf16, #tpu.memory_space<vmem>>, vector<128x256xbf16>
    %cst_72 = arith.constant dense<0.000000e+00> : vector<128x256xf32>
    %144 = tpu.matmul %142, %143, %cst_72 {dimension_numbers = #tpu.dot_dimension_numbers<[1], [0], [0], [1], [0, 0, 1, 1], [], []>} : vector<128x128xbf16>, vector<128x256xbf16>, vector<128x256xf32> -> vector<128x256xf32>
    %c0_73 = arith.constant 0 : index
    %c0_74 = arith.constant 0 : index
    %145 = vector.load %arg15[%c0_73, %c0_74] : memref<1x256xf32, #tpu.memory_space<vmem>>, vector<1x256xf32>
    %146 = vector.broadcast %145 : vector<1x256xf32> to vector<128x256xf32>
    %147 = arith.addf %144, %146 : vector<128x256xf32>
    %cst_75 = arith.constant 0.000000e+00 : f32
    %148 = vector.broadcast %cst_75 : f32 to vector<128x256xf32>
    %149 = arith.maximumf %147, %148 : vector<128x256xf32>
    %150 = arith.truncf %149 : vector<128x256xf32> to vector<128x256xbf16>
    %c0_76 = arith.constant 0 : index
    %c0_77 = arith.constant 0 : index
    %151 = vector.load %arg16[%c0_76, %c0_77] : memref<256x128xbf16, #tpu.memory_space<vmem>>, vector<256x128xbf16>
    %cst_78 = arith.constant dense<0.000000e+00> : vector<128x128xf32>
    %152 = tpu.matmul %150, %151, %cst_78 {dimension_numbers = #tpu.dot_dimension_numbers<[1], [0], [0], [1], [0, 0, 1, 1], [], []>} : vector<128x256xbf16>, vector<256x128xbf16>, vector<128x128xf32> -> vector<128x128xf32>
    %c0_79 = arith.constant 0 : index
    %c0_80 = arith.constant 0 : index
    %153 = vector.load %arg17[%c0_79, %c0_80] : memref<1x128xf32, #tpu.memory_space<vmem>>, vector<1x128xf32>
    %154 = vector.broadcast %153 : vector<1x128xf32> to vector<128x128xf32>
    %155 = arith.addf %152, %154 : vector<128x128xf32>
    %156 = arith.addf %141, %155 : vector<128x128xf32>
    %c0_81 = arith.constant 0 : index
    %c0_82 = arith.constant 0 : index
    %157 = vector.load %arg18[%c0_81, %c0_82] : memref<1x128xf32, #tpu.memory_space<vmem>>, vector<1x128xf32>
    %c0_83 = arith.constant 0 : index
    %c0_84 = arith.constant 0 : index
    %158 = vector.load %arg19[%c0_83, %c0_84] : memref<1x128xf32, #tpu.memory_space<vmem>>, vector<1x128xf32>
    %cst_85 = arith.constant dense<0.000000e+00> : vector<128xf32>
    %159 = vector.multi_reduction <add>, %156, %cst_85 [1] : vector<128x128xf32> to vector<128xf32>
    %160 = vector.shape_cast %159 : vector<128xf32> to vector<128x1xf32>
    %cst_86 = arith.constant 1.280000e+02 : f32
    %161 = vector.broadcast %cst_86 : f32 to vector<128x1xf32>
    %162 = arith.divf %160, %161 : vector<128x1xf32>
    %163 = vector.broadcast %162 : vector<128x1xf32> to vector<128x128xf32>
    %164 = arith.subf %156, %163 : vector<128x128xf32>
    %165 = arith.mulf %164, %164 : vector<128x128xf32>
    %cst_87 = arith.constant dense<0.000000e+00> : vector<128xf32>
    %166 = vector.multi_reduction <add>, %165, %cst_87 [1] : vector<128x128xf32> to vector<128xf32>
    %167 = vector.shape_cast %166 : vector<128xf32> to vector<128x1xf32>
    %cst_88 = arith.constant 1.280000e+02 : f32
    %168 = vector.broadcast %cst_88 : f32 to vector<128x1xf32>
    %169 = arith.divf %167, %168 : vector<128x1xf32>
    %170 = vector.broadcast %162 : vector<128x1xf32> to vector<128x128xf32>
    %171 = arith.subf %156, %170 : vector<128x128xf32>
    %cst_89 = arith.constant 9.99999974E-6 : f32
    %172 = vector.broadcast %cst_89 : f32 to vector<128x1xf32>
    %173 = arith.addf %169, %172 : vector<128x1xf32>
    %174 = math.rsqrt %173 : vector<128x1xf32>
    %175 = vector.broadcast %174 : vector<128x1xf32> to vector<128x128xf32>
    %176 = arith.mulf %171, %175 : vector<128x128xf32>
    %177 = vector.broadcast %157 : vector<1x128xf32> to vector<128x128xf32>
    %178 = arith.mulf %176, %177 : vector<128x128xf32>
    %179 = vector.broadcast %158 : vector<1x128xf32> to vector<128x128xf32>
    %180 = arith.addf %178, %179 : vector<128x128xf32>
    %c0_90 = arith.constant 0 : index
    %c0_91 = arith.constant 0 : index
    %c0_92 = arith.constant 0 : index
    %181 = vector.load %arg20[%c0_90, %c0_91, %c0_92] : memref<1x128x128xf32, #tpu.memory_space<vmem>>, vector<1x128x128xf32>
    %182 = vector.shape_cast %181 : vector<1x128x128xf32> to vector<128x128xf32>
    %183 = vector.shape_cast %180 : vector<128x128xf32> to vector<1x128x128xf32>
    tpu.vector_store %arg20[%c0_90, %c0_91, %c0_92], %183 {strides = array<i32>} : memref<1x128x128xf32, #tpu.memory_space<vmem>>, vector<1x128x128xf32>,
    return
  }
  func.func @transform_0(%arg0: i32, %arg1: i32) -> (i32, i32, i32) {
    %c0_i32 = arith.constant 0 : i32
    %c0_i32_0 = arith.constant 0 : i32
    return %arg0, %arg1, %c0_i32 : i32, i32, i32
  }
  func.func @transform_1(%arg0: i32, %arg1: i32) -> (i32, i32, i32) {
    %c0_i32 = arith.constant 0 : i32
    %c0_i32_0 = arith.constant 0 : i32
    %c0_i32_1 = arith.constant 0 : i32
    return %arg0, %c0_i32, %c0_i32_0 : i32, i32, i32
  }
  func.func @transform_2(%arg0: i32, %arg1: i32) -> (i32, i32) {
    %c0_i32 = arith.constant 0 : i32
    %c0_i32_0 = arith.constant 0 : i32
    %c0_i32_1 = arith.constant 0 : i32
    return %c0_i32, %c0_i32_0 : i32, i32
  }
  func.func @transform_3(%arg0: i32, %arg1: i32) -> (i32, i32) {
    %c0_i32 = arith.constant 0 : i32
    %c0_i32_0 = arith.constant 0 : i32
    %c0_i32_1 = arith.constant 0 : i32
    return %c0_i32, %c0_i32_0 : i32, i32
  }
  func.func @transform_4(%arg0: i32, %arg1: i32) -> (i32, i32) {
    %c0_i32 = arith.constant 0 : i32
    %c0_i32_0 = arith.constant 0 : i32
    %c0_i32_1 = arith.constant 0 : i32
    return %c0_i32, %c0_i32_0 : i32, i32
  }
  func.func @transform_5(%arg0: i32, %arg1: i32) -> (i32, i32) {
    %c0_i32 = arith.constant 0 : i32
    %c0_i32_0 = arith.constant 0 : i32
    %c0_i32_1 = arith.constant 0 : i32
    return %c0_i32, %c0_i32_0 : i32, i32
  }
  func.func @transform_6(%arg0: i32, %arg1: i32) -> (i32, i32) {
    %c0_i32 = arith.constant 0 : i32
    %c0_i32_0 = arith.constant 0 : i32
    %c0_i32_1 = arith.constant 0 : i32
    return %c0_i32, %c0_i32_0 : i32, i32
  }
  func.func @transform_7(%arg0: i32, %arg1: i32) -> (i32, i32) {
    %c0_i32 = arith.constant 0 : i32
    %c0_i32_0 = arith.constant 0 : i32
    %c0_i32_1 = arith.constant 0 : i32
    return %c0_i32, %c0_i32_0 : i32, i32
  }
  func.func @transform_8(%arg0: i32, %arg1: i32) -> (i32, i32) {
    %c0_i32 = arith.constant 0 : i32
    %c0_i32_0 = arith.constant 0 : i32
    %c0_i32_1 = arith.constant 0 : i32
    return %c0_i32, %c0_i32_0 : i32, i32
  }
  func.func @transform_9(%arg0: i32, %arg1: i32) -> (i32, i32) {
    %c0_i32 = arith.constant 0 : i32
    %c0_i32_0 = arith.constant 0 : i32
    %c0_i32_1 = arith.constant 0 : i32
    return %c0_i32, %c0_i32_0 : i32, i32
  }
  func.func @transform_10(%arg0: i32, %arg1: i32) -> (i32, i32) {
    %c0_i32 = arith.constant 0 : i32
    %c0_i32_0 = arith.constant 0 : i32
    %c0_i32_1 = arith.constant 0 : i32
    return %c0_i32, %c0_i32_0 : i32, i32
  }
  func.func @transform_11(%arg0: i32, %arg1: i32) -> (i32, i32) {
    %c0_i32 = arith.constant 0 : i32
    %c0_i32_0 = arith.constant 0 : i32
    %c0_i32_1 = arith.constant 0 : i32
    return %c0_i32, %c0_i32_0 : i32, i32
  }
  func.func @transform_12(%arg0: i32, %arg1: i32) -> (i32, i32) {
    %c0_i32 = arith.constant 0 : i32
    %c0_i32_0 = arith.constant 0 : i32
    %c0_i32_1 = arith.constant 0 : i32
    return %c0_i32, %c0_i32_0 : i32, i32
  }
  func.func @transform_13(%arg0: i32, %arg1: i32) -> (i32, i32) {
    %c0_i32 = arith.constant 0 : i32
    %c0_i32_0 = arith.constant 0 : i32
    %c0_i32_1 = arith.constant 0 : i32
    return %c0_i32, %c0_i32_0 : i32, i32
  }
  func.func @transform_14(%arg0: i32, %arg1: i32) -> (i32, i32) {
    %c0_i32 = arith.constant 0 : i32
    %c0_i32_0 = arith.constant 0 : i32
    %c0_i32_1 = arith.constant 0 : i32
    return %c0_i32, %c0_i32_0 : i32, i32
  }
  func.func @transform_15(%arg0: i32, %arg1: i32) -> (i32, i32) {
    %c0_i32 = arith.constant 0 : i32
    %c0_i32_0 = arith.constant 0 : i32
    %c0_i32_1 = arith.constant 0 : i32
    return %c0_i32, %c0_i32_0 : i32, i32
  }
  func.func @transform_16(%arg0: i32, %arg1: i32) -> (i32, i32) {
    %c0_i32 = arith.constant 0 : i32
    %c0_i32_0 = arith.constant 0 : i32
    %c0_i32_1 = arith.constant 0 : i32
    return %c0_i32, %c0_i32_0 : i32, i32
  }
  func.func @transform_17(%arg0: i32, %arg1: i32) -> (i32, i32) {
    %c0_i32 = arith.constant 0 : i32
    %c0_i32_0 = arith.constant 0 : i32
    %c0_i32_1 = arith.constant 0 : i32
    return %c0_i32, %c0_i32_0 : i32, i32
  }
  func.func @transform_18(%arg0: i32, %arg1: i32) -> (i32, i32, i32) {
    %c0_i32 = arith.constant 0 : i32
    %c0_i32_0 = arith.constant 0 : i32
    return %arg0, %arg1, %c0_i32 : i32, i32, i32
  }
  func.func @transform_19(%arg0: i32, %arg1: i32) -> (i32, i32, i32, i32) {
    %c0_i32 = arith.constant 0 : i32
    %c0_i32_0 = arith.constant 0 : i32
    %c0_i32_1 = arith.constant 0 : i32
    return %arg0, %c0_i32, %arg1, %c0_i32_0 : i32, i32, i32, i32
  }
}

</mosaic_0001>

<bundles_post_ra>
// kernel: tpu_custom_call.1
= control target key start
LH: loop header
LB: loop body
LE: loop exit
PB: predicated region body
PF: predicated region fallthrough
CT: control target
= control target key end

     0   :  { %s8860_s0 = inlined_call_operand.hbm [shape: f32[2,128,128], index: 0, kind: input, shape index: {}]   ;;  %s8861_s1 = inlined_call_operand.hbm [shape: f32[2,128,128], index: 1, kind: input, shape index: {}]   ;;  %s8862_s2 = inlined_call_operand.hbm [shape: bf16[128,128], index: 2, kind: input, shape index: {}]   ;;  %s8863_s3 = inlined_call_operand.vmem [shape: f32[1,128], index: 3, kind: input, shape index: {}]   ;;  %s8864_s4 = inlined_call_operand.hbm [shape: bf16[128,128], index: 4, kind: input, shape index: {}]   ;;  %s8865_s5 = inlined_call_operand.vmem [shape: f32[1,128], index: 5, kind: input, shape index: {}]   ;;  %s8866_s6 = inlined_call_operand.hbm [shape: bf16[128,128], index: 6, kind: input, shape index: {}]   ;;  %s8867_s7 = inlined_call_operand.vmem [shape: f32[1,128], index: 7, kind: input, shape index: {}]   ;;  %s8868_s8 = inlined_call_operand.hbm [shape: bf16[128,128], index: 8, kind: input, shape index: {}]   ;;  %s8869_s9 = inlined_call_operand.vmem [shape: f32[1,128], index: 9, kind: input, shape index: {}]   ;;  %s8870_s10 = inlined_call_operand.vmem [shape: f32[1,128], index: 10, kind: input, shape index: {}]   ;;  %s8871_s11 = inlined_call_operand.vmem [shape: f32[1,128], index: 11, kind: input, shape index: {}]   ;;  %s8872_s12 = inlined_call_operand.hbm [shape: bf16[128,256], index: 12, kind: input, shape index: {}]   ;;  %s8873_s13 = inlined_call_operand.vmem [shape: f32[1,256], index: 13, kind: input, shape index: {}]   ;;  %s8874_s14 = inlined_call_operand.hbm [shape: bf16[256,128], index: 14, kind: input, shape index: {}]   ;;  %s8875_s15 = inlined_call_operand.vmem [shape: f32[1,128], index: 15, kind: input, shape index: {}]   ;;  %s8876_s16 = inlined_call_operand.vmem [shape: f32[1,128], index: 16, kind: input, shape index: {}]   ;;  %s8877_s17 = inlined_call_operand.vmem [shape: f32[1,128], index: 17, kind: input, shape index: {}]   ;;  %s8878_s18 = inlined_call_operand.hbm [shape: f32[2,128,128], index: 18, kind: output, shape index: {0}]   ;;  %s8879_s19 = inlined_call_operand.hbm [shape: f32[2,4,128,128], index: 19, kind: output, shape index: {1}]  }
   0x1   :  { %8889 = sst [smem:[#allocation35_spill]] %s8860_s0 }
   0x2   :  { %8890 = sst [smem:[#allocation36_spill]] %s8861_s1 }
   0x3   :  { %8891 = sst [smem:[#allocation37_spill]] %s8862_s2 }
   0x4   :  { %8892 = sst [smem:[#allocation38_spill]] %s8863_s3 }
   0x5   :  { %8893 = sst [smem:[#allocation39_spill]] %s8864_s4 }
   0x6   :  { %8894 = sst [smem:[#allocation40_spill]] %s8866_s6 }
   0x7   :  { %8895 = sst [smem:[#allocation41_spill]] %s8868_s8 }
   0x8   :  { %8896 = sst [smem:[#allocation42_spill]] %s8872_s12 }
   0x9   :  { %8897 = sst [smem:[#allocation43_spill]] %s8874_s14 }
   0xa   :  { %8898 = sst [smem:[#allocation44_spill]] %s8875_s15 }
   0xb   :  { %8899 = sst [smem:[#allocation45_spill]] %s8876_s16 }
   0xc   :  { %8900 = sst [smem:[#allocation46_spill]] %s8877_s17 }
   0xd   :  { %8901 = sst [smem:[#allocation47_spill]] %s8878_s18 }
   0xe   :  { %8902 = sst [smem:[#allocation48_spill]] %s8879_s19 }
   0xf   :  { %25 = vsyncpa [#allocation4], 0 }
  0x10   :  { %27 = vsyncpa [#allocation4 + $0x1], 0 }
  0x11   :  { %28 = vsyncpa [#allocation7], 0 }
  0x12   :  { %30 = vsyncpa [#allocation7 + $0x1], 0 }
  0x13   :  { %31 = vsyncpa [#allocation10], 0 }
  0x14   :  { %32 = vsyncpa [#allocation13], 0 }
  0x15   :  { %33 = vsyncpa [#allocation16], 0 }
  0x16   :  { %34 = vsyncpa [#allocation5], 0 }
  0x17   :  { %36 = vsyncpa [#allocation5 + $0x1], 0 }
  0x18   :  { %37 = vsyncpa [#allocation19], 0 }
  0x19   :  { %39 = vsyncpa [#allocation19 + $0x1], 0  ;;  %s6784_s0 = smov 0   ;;  %s6786_s30 = smov 0  }
  0x1a   :  { %s6788_s20 = smov 0   ;;  %s6790_s21 = smov 0  }
  0x1b   :  { %s6792_s1 = smov 0   ;;  %s6794_s22 = smov 0  }
  0x1c LB: > { %8903 = sst [smem:[#allocation28_spill]] %s6654_s21  ;;  %s6815_s2 = sadd.s32 4294967295, %s6662_s22   ;;  %s6662_s22 = sphi %s6794_s22, %s45_s22   ;;  %s6658_s1 = sphi %s6792_s1, %s8942_s1   ;;  %s6654_s21 = sphi %s6790_s21, %s8941_s21   ;;  %s6650_s20 = sphi %s6788_s20, %s8945_s20   ;;  %s6646_s30 = sphi %s6786_s30, %s8944_s30   ;;  %s6642_s0 = sphi %s6784_s0, %s8943_s0  }
  0x1d   : > { %8904 = sst [smem:[#allocation29_spill]] %s6658_s1  ;;  %p4907_p0 = scmp.ge.s32.totalorder %s6662_s22, 1 }
  0x1e   : > { %p80_p1 = scmp.eq.s32.totalorder %s6815_s2, 0  ;;  %p508_p2 = scmp.lt.s32.totalorder %s6662_s22, 3 }
  0x1f   : > { %s6664_s24 = smov [#allocation8]   ;;  %s6665_s26 = smov [#allocation9]  }
  0x20   : > { %p6820_p3 = pnand %p4907_p0, %p508_p2  ;;  %s520_s25 = sshll.u32 %s6664_s24, 4  ;;  %s521_s25 = int_to_ptr.vmem [resolvable:$true] %s520_s25 }
  0x21   : > { %s536_s27 = sshll.u32 %s6665_s26, 4  ;;  %s6666_s28 = smov [#allocation12]   ;;  %s537_s27 = int_to_ptr.vmem [resolvable:$true] %s536_s27 }
  0x22   : > { %p5801_p4 = pneg %p6820_p3  ;;  %s568_s29 = sshll.u32 %s6666_s28, 4  ;;  %s569_s29 = int_to_ptr.vmem [resolvable:$true] %s568_s29 }
  0x23   : > { %s6331_s24 = scalar_lea.vmem %s521_s25, 1024  ;;  %p6339_p11 = scmp.lt.s32.totalorder %s521_s25, %s521_s25 }
  0x24   : > { %p6829_p6 = pnand %p5801_p4, %p80_p1  ;;  %p6332_p8 = scmp.ne.s32.totalorder %s521_s25, %s6331_s24 }
  0x25   : > { %p6340_p12 = scmp.lt.s32.totalorder %s6331_s24, %s6331_s24 }
  0x26   : > { %p6835_p7 = pneg %p6829_p6 }
  0x27   : > { %p6341_p13 = por %p6340_p12, %p6339_p11 }
  0x28   : > { %p6334_p9 = pnand %p6332_p8, %p6835_p7 }
  0x2a   : > { %p6335_p10 = pneg %p6334_p9 }
  0x2c   : > { %p6342_p0 = pnand %p6341_p13, %p6335_p10 }
  0x2e   : > { %6345 = shalt.err (!%p6342_p0)
}
  0x2f   : > { %s6667_s26 = smov 64   ;;  %s6668_s28 = smov 4  }
  0x30   : > { %s8908_s19 = sld [smem:[#allocation37_spill]]  ;;  %s6357_s21 = scalar_lea.vmem %s537_s27, 1024 }
  0x31   : > { %p6358_p2 = scmp.ne.s32.totalorder %s537_s27, %s6357_s21  ;;  %p6365_p9 = scmp.lt.s32.totalorder %s537_s27, %s537_s27 }
  0x32   : > { %p6366_p10 = scmp.lt.s32.totalorder %s6357_s21, %s6357_s21 }
  0x33   : > { %p6360_p4 = pnand %p6358_p2, %p6835_p7 }
  0x34   : > { %p6367_p11 = por %p6366_p10, %p6365_p9 }
  0x35   : > { %p6361_p8 = pneg %p6360_p4 }
  0x36   : > { %5804 = dma.hbm_to_vmem [thread:$0]  (!%p6829_p6), %s8908_s19, 1024, %s521_s25, [#allocation7], %s6667_s26, %s6667_s26, %s6668_s28  }
  0x37   : > { %p6368_p12 = pnand %p6367_p11, %p6361_p8 }
  0x39   : > { %6371 = shalt.err (!%p6368_p12)
}
  0x3a   : > { %s8909_s4 = sld [smem:[#allocation39_spill]]  ;;  %s6383_s16 = scalar_lea.vmem %s569_s29, 1024 }
  0x3b   : > { %p6384_p13 = scmp.ne.s32.totalorder %s569_s29, %s6383_s16  ;;  %p6391_p4 = scmp.lt.s32.totalorder %s569_s29, %s569_s29 }
  0x3c   : > { %p6392_p9 = scmp.lt.s32.totalorder %s6383_s16, %s6383_s16 }
  0x3d   : > { %p6386_p0 = pnand %p6384_p13, %p6835_p7 }
  0x3e   : > { %p6393_p8 = por %p6392_p9, %p6391_p4 }
  0x3f   : > { %p6387_p2 = pneg %p6386_p0 }
  0x40   : > { %5807 = dma.hbm_to_vmem [thread:$0]  (!%p6829_p6), %s8909_s4, 1024, %s537_s27, [#allocation10], %s6667_s26, %s6667_s26, %s6668_s28  }
  0x41   : > { %p6394_p10 = pnand %p6393_p8, %p6387_p2 }
  0x43   : > { %6397 = shalt.err (!%p6394_p10)
}
  0x44   : > { %s8910_s8 = sld [smem:[#allocation41_spill]]  ;;  %s6669_s19 = smov [#allocation11]  }
  0x45   : > { %s552_s21 = sshll.u32 %s6669_s19, 4  ;;  %s6670_s25 = smov [#allocation14]   ;;  %s553_s21 = int_to_ptr.vmem [resolvable:$true] %s552_s21 }
  0x46   : > { %s590_s27 = sshll.u32 %s6670_s25, 4  ;;  %s6409_s24 = scalar_lea.vmem %s553_s21, 1024  ;;  %s591_s27 = int_to_ptr.vmem [resolvable:$true] %s590_s27 }
  0x47   : > { %p6410_p11 = scmp.ne.s32.totalorder %s553_s21, %s6409_s24  ;;  %p6417_p0 = scmp.lt.s32.totalorder %s553_s21, %s553_s21 }
  0x48   : > { %p6418_p2 = scmp.lt.s32.totalorder %s6409_s24, %s6409_s24 }
  0x49   : > { %p6412_p12 = pnand %p6410_p11, %p6835_p7 }
  0x4a   : > { %5813 = dma.hbm_to_vmem [thread:$0]  (!%p6829_p6), %s8910_s8, 1024, %s569_s29, [#allocation13], %s6667_s26, %s6667_s26, %s6668_s28  }
  0x4b   : > { %p6413_p13 = pneg %p6412_p12  ;;  %p6419_p4 = por %p6418_p2, %p6417_p0 }
  0x4d   : > { %p6420_p9 = pnand %p6419_p4, %p6413_p13 }
  0x4f   : > { %6423 = shalt.err (!%p6420_p9)
}
  0x50   : > { %s8911_s6 = sld [smem:[#allocation40_spill]]  ;;  %s6435_s17 = scalar_lea.vmem %s591_s27, 2048 }
  0x51   : > { %p6436_p8 = scmp.ne.s32.totalorder %s591_s27, %s6435_s17  ;;  %p6443_p12 = scmp.lt.s32.totalorder %s591_s27, %s591_s27 }
  0x52   : > { %p6444_p0 = scmp.lt.s32.totalorder %s6435_s17, %s6435_s17 }
  0x53   : > { %p6438_p10 = pnand %p6436_p8, %p6835_p7 }
  0x54   : > { %p6445_p13 = por %p6444_p0, %p6443_p12 }
  0x55   : > { %p6439_p11 = pneg %p6438_p10 }
  0x56   : > { %5810 = dma.hbm_to_vmem [thread:$0]  (!%p6829_p6), %s8911_s6, 1024, %s553_s21, [#allocation10], %s6667_s26, %s6667_s26, %s6668_s28  }
  0x57   : > { %p6446_p2 = pnand %p6445_p13, %p6439_p11 }
  0x59   : > { %6449 = shalt.err (!%p6446_p2)
}
  0x5a   : > { %s8883_s15 = smov 128   ;;  %s8885_s19 = smov 8  }
  0x5b   : > { %s8912_s12 = sld [smem:[#allocation42_spill]]  ;;  %s6673_s24 = smov [#allocation15]  }
  0x5c   : > { %s606_s29 = sshll.u32 %s6673_s24, 4  ;;  %s607_s29 = int_to_ptr.vmem [resolvable:$true] %s606_s29 }
  0x5d   : > { %s6461_s16 = scalar_lea.vmem %s607_s29, 2048  ;;  %p6469_p10 = scmp.lt.s32.totalorder %s607_s29, %s607_s29 }
  0x5e   : > { %p6462_p4 = scmp.ne.s32.totalorder %s607_s29, %s6461_s16  ;;  %p6470_p11 = scmp.lt.s32.totalorder %s6461_s16, %s6461_s16 }
  0x60   : > { %p6464_p9 = pnand %p6462_p4, %p6835_p7  ;;  %p6471_p12 = por %p6470_p11, %p6469_p10 }
  0x61   : > { %5816 = dma.hbm_to_vmem [thread:$0]  (!%p6829_p6), %s8912_s12, 2048, %s591_s27, [#allocation13], %s8883_s15, %s8883_s15, %s8885_s19  }
  0x62   : > { %p6465_p8 = pneg %p6464_p9 }
  0x64   : > { %p6472_p0 = pnand %p6471_p12, %p6465_p8 }
  0x66   : > { %6475 = shalt.err (!%p6472_p0)
}
  0x67   : > { %s8913_s14 = sld [smem:[#allocation43_spill]]  ;;  %s4906_s18 = sadd.s32 4294967294, %s6662_s22  }
  0x68   : > { %s57_s3 = sadd.s32 1, %s6658_s1  ;;  %s66_s21 = sadd.s32 1, %s6650_s20 }
  0x69   : > { %p59_p7 = scmp.ge.s32.totalorder %s57_s3, 2  ;;  %p73_p13 = scmp.ne.s32.totalorder %s6650_s20, %s6646_s30 }
  0x6a   : > { %p74_p2 = scmp.eq.s32.totalorder %s6662_s22, 0  ;;  %p79_p9 = scmp.ne.s32.totalorder %s6646_s30, %s6642_s0 }
  0x6b   : > { %s8947_s3 = smov (%p59_p7, %s57_s3), 0  ;;  %p473_p12 = scmp.eq.s32.totalorder %s4906_s18, 1 }
  0x6c   : > { %8914 = sst [smem:[#allocation30_spill]] %s8947_s3  ;;  %p6907_p4 = por %p74_p2, %p73_p13 }
  0x6d   : > { %5819 = dma.hbm_to_vmem [thread:$0]  (!%p6829_p6), %s8913_s14, 2048, %s607_s29, [#allocation16], %s6667_s26, %s6667_s26, %s6668_s28  }
  0x6e   : > { %s61_s26 = ssub.s32 %s6658_s1, %s8947_s3  ;;  %p467_p6 = scmp.eq.s32.totalorder %s6815_s2, 1 }
  0x6f   : > { %p64_p8 = scmp.eq.s32.totalorder %s61_s26, 0  ;;  %p6918_p10 = por %p80_p1, %p79_p9 }
  0x70   : > { %p6922_p11 = por %p467_p6, %p73_p13  ;;  %p6929_p0 = por %p473_p12, %p79_p9 }
  0x71   : > { %s6927_s29 = scalar_select %p64_p8, %s6650_s20, %s66_s21  }
  0x72   : > { %p5840_p7 = scmp.lt.s32.totalorder %s6662_s22, 2  ;;  %s629_s17 = sand.u32 1, %s6650_s20  }
  0x73   : > { %8918 = sst [smem:[#allocation31_spill]] %s6927_s29  ;;  %s5093_s27 = sshll.u32 %s6658_s1, 11 }
  0x74   : > { %s4915_s26 = sshll.u32 %s629_s17, 7  ;;  %s8920_s4 = sld [smem:[#allocation35_spill]] }
  0x75   : > { %s633_s8 = scalar_lea.vmem [#allocation3], %s4915_s26  ;;  %p6941_p13 = pnand %p5840_p7, %p6907_p4 }
  0x76   : > { %s642_s12 = sshll.u32 %s633_s8, 4  ;;  %s8922_s3 = sld [smem:[#allocation36_spill]]  ;;  %s643_s12 = int_to_ptr.vmem [resolvable:$true] %s642_s12 }
  0x77   : > { %s630_s1 = scalar_lea.sflag [#allocation4], %s629_s17  ;;  %p6478_p2 = pneg %p6941_p13 }
  0x78   : > { %s6489_s15 = scalar_lea.vmem %s643_s12, 2048 }
  0x79   : > { %p6490_p9 = scmp.ne.s32.totalorder %s643_s12, %s6489_s15 }
  0x7a   : > { %s641_s6 = scalar_lea.hbm %s8920_s4, %s5093_s27  ;;  %s6674_s4 = smov [#allocation3]  }
  0x7b   : > { %p6492_p6 = pnand %p6490_p9, %p6478_p2  ;;  %s6494_s8 = sshll.u32 %s6674_s4, 4  ;;  %s6495_s8 = int_to_ptr.vmem [resolvable:$false] %s6494_s8 }
  0x7c   : > { %s6948_s29 = scalar_lea.hbm %s8922_s3, %s5093_s27  ;;  %s6496_s19 = scalar_lea.vmem %s6495_s8, 4096 }
  0x7d   : > { %p6493_p4 = pneg %p6492_p6  ;;  %p6497_p8 = scmp.lt.s32.totalorder %s643_s12, %s6495_s8 }
  0x7e   : > { %p6498_p12 = scmp.lt.s32.totalorder %s6496_s19, %s6489_s15 }
  0x80   : > { %p6499_p7 = por %p6498_p12, %p6497_p8 }
  0x82   : > { %p6500_p5 = pnand %p6499_p7, %p6493_p4 }
  0x84   : > { %6503 = shalt.err (!%p6500_p5)
}
  0x85   : > { %s8923_s3 = smov 8   ;;  %s8924_s25 = smov 128  }
  0x86   : > { %5823 = dma.hbm_to_vmem [thread:$0]  (!%p6941_p13), %s641_s6, 2048, %s643_s12, %s630_s1, %s8924_s25, %s8924_s25, %s8923_s3  }
  0x87   : > { %s656_s17 = scalar_lea.vmem [#allocation6], %s4915_s26  ;;  %s652_s18 = sand.u32 1, %s6662_s22  }
  0x88   : > { %s663_s27 = sshll.u32 %s656_s17, 4  ;;  %s653_s21 = scalar_lea.sflag [#allocation7], %s652_s18  ;;  %s664_s27 = int_to_ptr.vmem [resolvable:$true] %s663_s27 }
  0x89   : > { %s6517_s4 = scalar_lea.vmem %s664_s27, 2048  ;;  %s6675_s15 = smov [#allocation6]  }
  0x8a   : > { %p6518_p9 = scmp.ne.s32.totalorder %s664_s27, %s6517_s4  ;;  %s6522_s8 = sshll.u32 %s6675_s15, 4  ;;  %s6523_s8 = int_to_ptr.vmem [resolvable:$false] %s6522_s8 }
  0x8b   : > { %s6524_s19 = scalar_lea.vmem %s6523_s8, 4096  ;;  %p6525_p5 = scmp.lt.s32.totalorder %s664_s27, %s6523_s8 }
  0x8c   : > { %p6520_p6 = pnand %p6518_p9, %p6478_p2  ;;  %p6526_p8 = scmp.lt.s32.totalorder %s6524_s19, %s6517_s4 }
  0x8e   : > { %p6521_p4 = pneg %p6520_p6  ;;  %p6527_p12 = por %p6526_p8, %p6525_p5 }
  0x90   : > { %p6528_p7 = pnand %p6527_p12, %p6521_p4 }
  0x92   : > { %6531 = shalt.err (!%p6528_p7)
}
  0x93   : > { %5826 = dma.hbm_to_vmem [thread:$0]  (!%p6941_p13), %s6948_s29, 2048, %s664_s27, %s653_s21, %s8924_s25, %s8924_s25, %s8923_s3  }
  0x94   : > { %675 = sbr.rel (%p6820_p3) target bundleno = 4479 (0x117f), region = 92 }
  0x99   : > { %s6973_s6 = sand.u32 1, %s6646_s30  }
  0x9a   : > { %s6976_s12 = sshll.u32 %s6973_s6, 7  ;;  %s678_s1 = scalar_lea.sflag [#allocation4], %s6973_s6 }
  0x9b   : > { %s6980_s26 = scalar_lea.vmem [#allocation3], %s6976_s12 }
  0x9c   : > { %6609 = dma.done.wait (%p6918_p10), %s678_s1, 2048  }
  0x9d   : > { %6611 = vsyncadd (%p6918_p10), %s678_s1, 4294965248  ;;  %s686_s14 = sand.u32 1, %s6815_s2   ;;  %s6988_s29 = scalar_lea.vmem [#allocation6], %s6976_s12 }
  0x9e   : > { %s687_s23 = scalar_lea.sflag [#allocation7], %s686_s14 }
  0x9f   : > { %6613 = dma.done.wait (%p6918_p10), %s687_s23, 2048  }
  0xa0   : > { %6615 = vsyncadd (%p6918_p10), %s687_s23, 4294965248 }
  0xa1   : > { %6617 = dma.done.wait (%p80_p1), [#allocation7], 1024  }
  0xa2   : > { %6619 = vsyncadd (%p80_p1), [#allocation7], 4294966272 }
  0xa3   : > { %6621 = dma.done.wait (%p80_p1), [#allocation10], 2048  }
  0xa4   : > { %6623 = vsyncadd (%p80_p1), [#allocation10], 4294965248 }
  0xa5   : > { %6625 = dma.done.wait (%p80_p1), [#allocation13], 3072  }
  0xa6   : > { %6627 = vsyncadd (%p80_p1), [#allocation13], 4294964224 }
  0xa7   : > { %6629 = dma.done.wait (%p80_p1), [#allocation16], 2048  }
  0xa8   : > { %6631 = vsyncadd (%p80_p1), [#allocation16], 4294965248  ;;  %v5912_v0 = vld [vmem:[#allocation9 + $0x38] sm:$0xff]   ;;  %v5913_v1 = vld [vmem:[#allocation9 + $0x30] sm:$0xff]   ;;  %s8925_s17 = sld [smem:[#allocation38_spill]]  ;;  %vm1375_vm0 = vcmask 261120  }
  0xa9   : > { %5385 = vmatprep.subr.bf16.mxu1 %v5912_v0  ;;  %v5914_v2 = vld [vmem:[#allocation9 + $0x28] sm:$0xff]   ;;  %v5915_v3 = vld [vmem:[#allocation9 + $0x20] sm:$0xff]   ;;  %v5916_v7 = vld [vmem:[#allocation9 + $0x18] sm:$0xff]   ;;  %s6676_s27 = smov 96   ;;  %s4931_s4 = sshll.u32 %s6973_s6, 9  ;;  %vm2357_vm1 = vcmask 523520  }
  0xaa   : > { %5386 = vmatpush3.bf16.msra.mxu1 %v5912_v0  ;;  %v799_v4 = vld [vmem:[%s6988_s29] sm:$0xff]  ;;  %v800_v5 = vld [vmem:[%s6988_s29 + $0x8] sm:$0xff]  ;;  %v5920_v8 = vld [vmem:[#allocation8 + $0x38] sm:$0xff]   ;;  %s7402_s15 = scalar_lea.vmem [#allocation18], %s4931_s4  ;;  %s6677_s8 = smov 64   ;;  %vm2905_vm2 = vcmask 785920  }
  0xab   : > { %5387 = vmatprep.subr.bf16.mxu1 %v5913_v1  ;;  %v7012_v6 = vpack.c.bf16 %v800_v5, %v799_v4  ;;  %v5917_v9 = vld [vmem:[#allocation9 + $0x10] sm:$0xff]   ;;  %5353 = vmatprep.subr.bf16.mxu0 %v5920_v8  ;;  %v5922_v11 = vld [vmem:[#allocation8 + $0x28] sm:$0xff]   ;;  %v5923_v13 = vld [vmem:[#allocation8 + $0x20] sm:$0xff]   ;;  %s6678_s19 = smov 32   ;;  %vm3453_vm3 = vcmask 1048320   ;;  %s8933_s18 = sld [smem:[#allocation28_spill]] }
  0xac   : > { %5354 = vmatpush3.bf16.msra.mxu0 %v5920_v8  ;;  %v5921_v10 = vld [vmem:[#allocation8 + $0x30] sm:$0xff]   ;;  %v5918_v12 = vld [vmem:[#allocation9 + $0x8] sm:$0xff]   ;;  %v783_v14 = vld [vmem:[%s6980_s26] sm:$0xff]  ;;  %s4703_s4 = sshll.u32 %s7402_s15, 4  ;;  %s8934_s1 = sld [smem:[#allocation48_spill]]  ;;  %s8699_s4 = int_to_ptr.vmem [resolvable:$true] %s4703_s4 }
  0xad   : > { %5401 = vmatprep.mubr.bf16.mxu1 %v7012_v6  ;;  %5355 = vmatprep.subr.bf16.mxu0 %v5921_v10  ;;  %v784_v15 = vld [vmem:[%s6980_s26 + $0x8] sm:$0xff]  ;;  %v5919_v17 = vld [vmem:[#allocation9] sm:$0xff]   ;;  %v5924_v18 = vld [vmem:[#allocation8 + $0x18] sm:$0xff]   ;;  %s4670_s23 = scalar_lea.sflag [#allocation19], %s6973_s6  ;;  %s6680_s2 = smov [#allocation18]  }
  0xae   : > { %5388 = vmatpush3.bf16.msra.mxu1 %v5913_v1  ;;  %v815_v16 = vpack.c.bf16 %v784_v15, %v783_v14  ;;  %v801_v19 = vld [vmem:[%s6988_s29 + $0x10] sm:$0xff]  ;;  %v802_v20 = vld [vmem:[%s6988_s29 + $0x18] sm:$0xff]  ;;  %v803_v21 = vld [vmem:[%s6988_s29 + $0x20] sm:$0xff]  ;;  %s6536_s28 = sshll.u32 %s6680_s2, 4  ;;  %s6537_s28 = int_to_ptr.vmem [resolvable:$false] %s6536_s28 }
  0xaf   : > { %5389 = vmatprep.subr.bf16.mxu1 %v5914_v2  ;;  %v804_v22 = vld [vmem:[%s6988_s29 + $0x28] sm:$0xff]  ;;  %v5925_v23 = vld [vmem:[#allocation8 + $0x10] sm:$0xff]   ;;  %v7021_v24 = vpack.c.bf16 %v802_v20, %v801_v19  ;;  %v806_v28 = vld [vmem:[%s6988_s29 + $0x38] sm:$0xff]  ;;  %p6539_p13 = scmp.lt.s32.totalorder %s8699_s4, %s6537_s28 }
  0xb0   : > { %5356 = vmatpush3.bf16.msra.mxu0 %v5921_v10  ;;  %5369 = vmatprep.mubr.bf16.mxu0 %v815_v16  ;;  %v7023_v25 = vpack.c.bf16 %v804_v22, %v803_v21  ;;  %v5926_v26 = vld [vmem:[#allocation8 + $0x8] sm:$0xff]   ;;  %v805_v27 = vld [vmem:[%s6988_s29 + $0x30] sm:$0xff]  ;;  %v807_v29 = vld [vmem:[%s6988_s29 + $0x40] sm:$0xff] }
  0xb1   : > { %5357 = vmatprep.subr.bf16.mxu0 %v5922_v11  ;;  %v808_v30 = vld [vmem:[%s6988_s29 + $0x48] sm:$0xff]  ;;  %v5927_v31 = vld [vmem:[#allocation8] sm:$0xff]   ;;  %v785_v32 = vld [vmem:[%s6980_s26 + $0x10] sm:$0xff]  ;;  %v7033_v34 = vpack.c.bf16 %v806_v28, %v805_v27  ;;  %s5096_s21 = sshll.u32 %s8933_s18, 13 }
  0xb2   : > { %5390 = vmatpush3.bf16.msra.mxu1 %v5914_v2  ;;  %v786_v33 = vld [vmem:[%s6980_s26 + $0x18] sm:$0xff]  ;;  %v787_v36 = vld [vmem:[%s6980_s26 + $0x20] sm:$0xff]  ;;  %v788_v37 = vld [vmem:[%s6980_s26 + $0x28] sm:$0xff]  ;;  %v7037_v38 = vpack.c.bf16 %v808_v30, %v807_v29  ;;  %s8935_s14 = smov %s8934_s1 }
  0xb3   : > { %5391 = vmatprep.subr.bf16.mxu1 %v5915_v3  ;;  %v5928_v35 = vld [vmem:[#allocation11 + $0x38] sm:$0xff]   ;;  %v809_v39 = vld [vmem:[%s6988_s29 + $0x50] sm:$0xff]  ;;  %v811_v41 = vld [vmem:[%s6988_s29 + $0x60] sm:$0xff]  ;;  %v816_v43 = vpack.c.bf16 %v786_v33, %v785_v32  ;;  %v817_v45 = vpack.c.bf16 %v788_v37, %v787_v36 }
  0xb4   : > { %5358 = vmatpush3.bf16.msra.mxu0 %v5922_v11  ;;  %v810_v40 = vld [vmem:[%s6988_s29 + $0x58] sm:$0xff]  ;;  %v812_v42 = vld [vmem:[%s6988_s29 + $0x68] sm:$0xff]  ;;  %v5929_v44 = vld [vmem:[#allocation11 + $0x30] sm:$0xff]  }
  0xb5   : > { %5359 = vmatprep.subr.bf16.mxu0 %v5923_v13  ;;  %v789_v46 = vld [vmem:[%s6980_s26 + $0x30] sm:$0xff]  ;;  %v790_v47 = vld [vmem:[%s6980_s26 + $0x38] sm:$0xff]  ;;  %v828_v48 = vpack.c.bf16 %v810_v40, %v809_v39  ;;  %v5930_v49 = vld [vmem:[#allocation11 + $0x28] sm:$0xff]   ;;  %v829_v52 = vpack.c.bf16 %v812_v42, %v811_v41 }
  0xb6   : > { %5392 = vmatpush3.bf16.msra.mxu1 %v5915_v3  ;;  %v791_v50 = vld [vmem:[%s6980_s26 + $0x40] sm:$0xff]  ;;  %v792_v51 = vld [vmem:[%s6980_s26 + $0x48] sm:$0xff]  ;;  %v813_v53 = vld [vmem:[%s6988_s29 + $0x70] sm:$0xff]  ;;  %v818_v55 = vpack.c.bf16 %v790_v47, %v789_v46 }
  0xb7   : > { %5393 = vmatprep.subr.bf16.mxu1 %v5916_v7  ;;  %v814_v54 = vld [vmem:[%s6988_s29 + $0x78] sm:$0xff]  ;;  %v5931_v56 = vld [vmem:[#allocation11 + $0x20] sm:$0xff]   ;;  %v819_v57 = vpack.c.bf16 %v792_v51, %v791_v50  ;;  %v793_v58 = vld [vmem:[%s6980_s26 + $0x50] sm:$0xff]  ;;  %s6532_s29 = scalar_lea.vmem %s8699_s4, 8192 }
  0xb8   : > { %5360 = vmatpush3.bf16.msra.mxu0 %v5923_v13  ;;  %v794_v59 = vld [vmem:[%s6980_s26 + $0x58] sm:$0xff]  ;;  %v830_v60 = vpack.c.bf16 %v814_v54, %v813_v53  ;;  %v795_v62 = vld [vmem:[%s6980_s26 + $0x60] sm:$0xff]  ;;  %v796_v63 = vld [vmem:[%s6980_s26 + $0x68] sm:$0xff]  ;;  %p6533_p1 = scmp.ne.s32.totalorder %s8699_s4, %s6532_s29 }
  0xb9   : > { %5361 = vmatprep.subr.bf16.mxu0 %v5924_v18  ;;  %v5932_v61 = vld [vmem:[#allocation11 + $0x18] sm:$0xff]   ;;  %v820_v0 = vpack.c.bf16 %v794_v59, %v793_v58  ;;  %v821_v1 = vpack.c.bf16 %v796_v63, %v795_v62  ;;  %v5933_v2 = vld [vmem:[#allocation11 + $0x10] sm:$0xff]   ;;  %v5934_v5 = vld [vmem:[#allocation11 + $0x8] sm:$0xff]  }
  0xba   : > { %5394 = vmatpush3.bf16.msra.mxu1 %v5916_v7  ;;  %v797_v3 = vld [vmem:[%s6980_s26 + $0x70] sm:$0xff]  ;;  %v798_v4 = vld [vmem:[%s6980_s26 + $0x78] sm:$0xff]  ;;  %v5935_v8 = vld [vmem:[#allocation11] sm:$0xff]   ;;  %p6534_p3 = pnand %p6533_p1, %p6922_p11 }
  0xbb   : > { %5395 = vmatprep.subr.bf16.mxu1 %v5917_v9  ;;  %v822_v7 = vpack.c.bf16 %v798_v4, %v797_v3  ;;  %v7065_v10 = vld [vmem:[%s8865_s5] ss:$0 sm:$0xff] }
  0xbc   : > { %5362 = vmatpush3.bf16.msra.mxu0 %v5924_v18  ;;  %v7082_v18 = vld [vmem:[%s8925_s17] ss:$0 sm:$0xff]  ;;  %p6535_p10 = pneg %p6534_p3 }
  0xbd   : > { %5363 = vmatprep.subr.bf16.mxu0 %v5925_v23 }
  0xbe   : > { %5396 = vmatpush3.bf16.msra.mxu1 %v5917_v9 }
  0xbf   : > { %5397 = vmatprep.subr.bf16.mxu1 %v5918_v12 }
  0xc0   : > { %5364 = vmatpush3.bf16.msra.mxu0 %v5925_v23 }
  0xc1   : > { %5365 = vmatprep.subr.bf16.mxu0 %v5926_v26 }
  0xc2   : > { %5398 = vmatpush3.bf16.msra.mxu1 %v5918_v12 }
  0xc3   : > { %5399 = vmatprep.subr.bf16.mxu1 %v5919_v17 }
  0xc4   : > { %5366 = vmatpush3.bf16.msra.mxu0 %v5926_v26 }
  0xc5   : > { %5367 = vmatprep.subr.bf16.mxu0 %v5927_v31 }
  0xc6   : > { %5400 = vmatpush3.bf16.msra.mxu1 %v5919_v17 }
  0xc8   : > { %5368 = vmatpush3.bf16.msra.mxu0 %v5927_v31 }
  0xc9   : > { %5402 = vmatmul.mubr.bf16.vlgmr.msra.gmra.mxu1 %v7021_v24  ;;  %5417 = vmatprep.subr.bf16.mxu0 %v5928_v35 }
  0xca   : > { %5405 = vmatprep.mubr.bf16.mxu1 %v7023_v25 }
  0xcb   : > { %5370 = vmatmul.mubr.bf16.vlgmr.msra.gmra.mxu0 %v816_v43 }
  0xcc   : > { %5418 = vmatpush3.bf16.msra.mxu0 %v5928_v35  ;;  %5373 = vmatprep.mubr.bf16.mxu0 %v817_v45 }
  0xcd   : > { %5419 = vmatprep.subr.bf16.mxu0 %v5929_v44 }
  0xd0   : > { %5420 = vmatpush3.bf16.msra.mxu0 %v5929_v44 }
  0xd1   : > { %5406 = vmatmul.mubr.bf16.gmra.mxu1 %v7033_v34  ;;  %5421 = vmatprep.subr.bf16.mxu0 %v5930_v49 }
  0xd2   : > { %5409 = vmatprep.mubr.bf16.mxu1 %v7037_v38 }
  0xd3   : > { %5374 = vmatmul.mubr.bf16.gmra.mxu0 %v818_v55 }
  0xd4   : > { %5422 = vmatpush3.bf16.msra.mxu0 %v5930_v49  ;;  %5377 = vmatprep.mubr.bf16.mxu0 %v819_v57 }
  0xd5   : > { %5423 = vmatprep.subr.bf16.mxu0 %v5931_v56 }
  0xd8   : > { %5424 = vmatpush3.bf16.msra.mxu0 %v5931_v56 }
  0xd9   : > { %5410 = vmatmul.mubr.bf16.gmra.mxu1 %v828_v48  ;;  %5425 = vmatprep.subr.bf16.mxu0 %v5932_v61 }
  0xda   : > { %5413 = vmatprep.mubr.bf16.mxu1 %v829_v52 }
  0xdb   : > { %5378 = vmatmul.mubr.bf16.gmra.mxu0 %v820_v0 }
  0xdc   : > { %5426 = vmatpush3.bf16.msra.mxu0 %v5932_v61  ;;  %5381 = vmatprep.mubr.bf16.mxu0 %v821_v1 }
  0xdd   : > { %5427 = vmatprep.subr.bf16.mxu0 %v5933_v2 }
  0xe0   : > { %5428 = vmatpush3.bf16.msra.mxu0 %v5933_v2 }
  0xe1   : > { %5414 = vmatmul.mubr.bf16.gmra.mxu1 %v830_v60  ;;  %5429 = vmatprep.subr.bf16.mxu0 %v5934_v5 }
  0xe3   : > { %5382 = vmatmul.mubr.bf16.gmra.mxu0 %v822_v7 }
  0xe4   : > { %5430 = vmatpush3.bf16.msra.mxu0 %v5934_v5  ;;  %5433 = vmatprep.mubr.bf16.mxu0 %v7012_v6 }
  0xe5   : > { %5431 = vmatprep.subr.bf16.mxu0 %v5935_v8 }
  0xe8   : > { %5432 = vmatpush3.bf16.msra.mxu0 %v5935_v8 }
  0xeb   : > { %5434 = vmatmul.mubr.bf16.vlgmr.msra.gmra.mxu0 %v7021_v24 }
  0xec   : > { %5437 = vmatprep.mubr.bf16.mxu0 %v7023_v25 }
  0xf3   : > { %5438 = vmatmul.mubr.bf16.gmra.mxu0 %v7033_v34 }
  0xf4   : > { %5441 = vmatprep.mubr.bf16.mxu0 %v7037_v38 }
  0xfb   : > { %5442 = vmatmul.mubr.bf16.gmra.mxu0 %v828_v48 }
  0xfc   : > { %5445 = vmatprep.mubr.bf16.mxu0 %v829_v52 }
 0x103   : > { %5446 = vmatmul.mubr.bf16.gmra.mxu0 %v830_v60 }
 0x189   : > { %v5403_v9 = vpop.f32.mrf.mxu1 }
 0x18a   : > { %v1129_v12 = vadd.f32 %v5403_v9, %v7065_v10 }
 0x18b   : > { %v7067_v6 = vpop.f32.mrf.mxu1  ;;  %v5371_v20 = vpop.f32.mrf.mxu0 }
 0x18c   : > { %v945_v21 = vadd.f32 %v5371_v20, %v7082_v18 }
 0x18d   : > { %v5404_v11 = vpop.f32.mrf.mxu1  ;;  %v936_v23 = vpop.f32.mrf.mxu0 }
 0x18e   : > { %v1132_v13 = vadd.f32 %v5404_v11, %v7065_v10  ;;  %v937_v24 = vadd.f32 %v7082_v18, %v936_v23  ;;  %v1001_v27 = vmul.f32 0.17677669, %v945_v21 }
 0x18f   : > { %v7071_v14 = vpop.f32.mrf.mxu1  ;;  %v5372_v26 = vpop.f32.mrf.mxu0 }
 0x190   : > { %v7073_v15 = vpack.c.bf16 %v1132_v13, %v1129_v12  ;;  %v948_v28 = vadd.f32 %v5372_v26, %v7082_v18  ;;  %v999_v31 = vmul.f32 0.17677669, %v937_v24 }
 0x191   : > { %v7075_v16 = vpop.f32.mrf.mxu1  ;;  %v939_v30 = vpop.f32.mrf.mxu0 }
 0x192   : > { %v1002_v32 = vmul.f32 0.17677669, %v948_v28  ;;  %v940_v33 = vadd.f32 %v7082_v18, %v939_v30 }
 0x193   : > { %v7077_v17 = vpop.f32.mrf.mxu1  ;;  %v5375_v35 = vpop.f32.mrf.mxu0 }
 0x194   : > { %v7096_v36 = vpack.c.bf16 %v1002_v32, %v1001_v27  ;;  %v1000_v37 = vmul.f32 0.17677669, %v940_v33  ;;  %v961_v38 = vadd.f32 %v5375_v35, %v7082_v18 }
 0x195   : > { %v7084_v19 = vpop.f32.mrf.mxu1  ;;  %v952_v40 = vpop.f32.mrf.mxu0 }
 0x196   : > { %v7101_v41 = vpack.c.bf16 %v1000_v37, %v999_v31  ;;  %v953_v43 = vadd.f32 %v7082_v18, %v952_v40  ;;  %v1005_v45 = vmul.f32 0.17677669, %v961_v38 }
 0x197   : > { %v7087_v22 = vpop.f32.mrf.mxu1  ;;  %v5376_v44 = vpop.f32.mrf.mxu0 }
 0x198   : > { %v964_v46 = vadd.f32 %v5376_v44, %v7082_v18  ;;  %5465 = vmatprep.mubr.msk.bf16.mxu1 %vm1375_vm0, %v7101_v41  ;;  %v1003_v49 = vmul.f32 0.17677669, %v953_v43 }
 0x199   : > { %v7090_v25 = vpop.f32.mrf.mxu1  ;;  %v955_v48 = vpop.f32.mrf.mxu0 }
 0x19a   : > { %v1006_v50 = vmul.f32 0.17677669, %v964_v46  ;;  %v956_v51 = vadd.f32 %v7082_v18, %v955_v48  ;;  %v1161_v27 = vadd.f32 %v7090_v25, %v7065_v10 }
 0x19b   : > { %v7093_v29 = vpop.f32.mrf.mxu1  ;;  %v5379_v54 = vpop.f32.mrf.mxu0 }
 0x19c   : > { %v7110_v56 = vpack.c.bf16 %v1006_v50, %v1005_v45  ;;  %v1004_v57 = vmul.f32 0.17677669, %v956_v51  ;;  %v977_v58 = vadd.f32 %v5379_v54, %v7082_v18 }
 0x19d   : > { %v5412_v34 = vpop.f32.mrf.mxu1  ;;  %v968_v60 = vpop.f32.mrf.mxu0 }
 0x19e   : > { %v7117_v0 = vpack.c.bf16 %v1004_v57, %v1003_v49  ;;  %v969_v1 = vadd.f32 %v7082_v18, %v968_v60  ;;  %v1009_v5 = vmul.f32 0.17677669, %v977_v58  ;;  %v1164_v20 = vadd.f32 %v5412_v34, %v7065_v10 }
 0x19f   : > { %v7099_v39 = vpop.f32.mrf.mxu1  ;;  %v5380_v2 = vpop.f32.mrf.mxu0  ;;  %v1140_v60 = vadd.f32 %v7065_v10, %v7087_v22 }
 0x1a0   : > { %v980_v7 = vadd.f32 %v5380_v2, %v7082_v18  ;;  %v1007_v9 = vmul.f32 0.17677669, %v969_v1  ;;  %v7143_v32 = vpack.c.bf16 %v1164_v20, %v1161_v27  ;;  %v1156_v43 = vadd.f32 %v7065_v10, %v7099_v39 }
 0x1a1   : > { %v5415_v42 = vpop.f32.mrf.mxu1  ;;  %v971_v8 = vpop.f32.mrf.mxu0 }
 0x1a2   : > { %v1177_v52 = vadd.f32 %v5415_v42, %v7065_v10  ;;  %v1010_v11 = vmul.f32 0.17677669, %v980_v7  ;;  %v972_v12 = vadd.f32 %v7082_v18, %v971_v8 }
 0x1a3   : > { %v1168_v47 = vpop.f32.mrf.mxu1  ;;  %v5383_v13 = vpop.f32.mrf.mxu0 }
 0x1a4   : > { %v1169_v61 = vadd.f32 %v7065_v10, %v1168_v47  ;;  %v7135_v21 = vpack.c.bf16 %v1010_v11, %v1009_v5  ;;  %v1008_v23 = vmul.f32 0.17677669, %v972_v12  ;;  %v993_v24 = vadd.f32 %v5383_v13, %v7082_v18 }
 0x1a5   : > { %v5416_v53 = vpop.f32.mrf.mxu1  ;;  %v984_v26 = vpop.f32.mrf.mxu0  ;;  %v1153_v47 = vadd.f32 %v7065_v10, %v7093_v29 }
 0x1a6   : > { %v1180_v55 = vadd.f32 %v5416_v53, %v7065_v10  ;;  %v7140_v28 = vpack.c.bf16 %v1008_v23, %v1007_v9  ;;  %v985_v30 = vadd.f32 %v7082_v18, %v984_v26  ;;  %v1013_v34 = vmul.f32 0.17677669, %v993_v24 }
 0x1a7   : > { %v1171_v59 = vpop.f32.mrf.mxu1  ;;  %v5384_v31 = vpop.f32.mrf.mxu0  ;;  %v7165_v50 = vpack.c.bf16 %v1156_v43, %v1153_v47  ;;  %v1145_v53 = vadd.f32 %v7075_v16, %v7065_v10  ;;  %v1124_v26 = vadd.f32 %v7065_v10, %v7071_v14  ;;  %v1404_v14 = vsel %vm1375_vm0, %v7073_v15, 0 }
 0x1a8   : > { %v7114_v62 = vpack.c.bf16 %v1180_v55, %v1177_v52  ;;  %v1172_v63 = vadd.f32 %v7065_v10, %v1171_v59  ;;  %v996_v35 = vadd.f32 %v5384_v31, %v7082_v18  ;;  %v1011_v38 = vmul.f32 0.17677669, %v985_v30 }
 0x1a9   : > { %v987_v37 = vpop.f32.mrf.mxu0  ;;  %v1148_v52 = vadd.f32 %v7084_v19, %v7065_v10  ;;  %v1413_v57 = vsel %vm1375_vm0, %v7165_v50, 0  ;;  %v1121_v30 = vadd.f32 %v7065_v10, %v7067_v6 }
 0x1aa   : > { %v7120_v3 = vpack.c.bf16 %v1172_v63, %v1169_v61  ;;  %1848 = vrot.lane.b32.xlu0 %v7114_v62, %s6676_s27  ;;  %5737 = vmatprep.subr.msk.bf16.mxu1 %vm1375_vm0, %v7114_v62  ;;  %v1422_v4 = vsel %vm1375_vm0, %v7114_v62, 0  ;;  %v1014_v25 = vmul.f32 0.17677669, %v996_v35  ;;  %v988_v40 = vadd.f32 %v7082_v18, %v987_v37 }
 0x1ab   : > { %5450 = vmatpush3.bf16.xpose.msra.mxu1 %v1422_v4  ;;  %v7151_v42 = vpop.f32.mrf.mxu0  ;;  %v1416_v18 = vsel %vm1375_vm0, %v7143_v32, 0  ;;  %v7177_v55 = vpack.c.bf16 %v1148_v52, %v1145_v53  ;;  %v1137_v61 = vadd.f32 %v7065_v10, %v7077_v17  ;;  %v4950_v4 = vld [vmem:[%s8867_s7] ss:$0 sm:$0xff]  ;;  %v7213_v35 = vpack.c.bf16 %v1124_v26, %v1121_v30 }
 0x1ac   : > { %1846 = vrot.lane.b32.xlu1 %v7120_v3, %s6676_s27  ;;  %5738 = vmatprep.subr.msk.bf16.mxu1 %vm1375_vm0, %v7120_v3  ;;  %v1419_v33 = vsel %vm1375_vm0, %v7120_v3, 0  ;;  %v7155_v44 = vpack.c.bf16 %v1014_v25, %v1013_v34  ;;  %v1012_v45 = vmul.f32 0.17677669, %v988_v40 }
 0x1ad   : > { %v7157_v46 = vpop.f32.mrf.mxu0  ;;  %v7187_v63 = vpack.c.bf16 %v1140_v60, %v1137_v61  ;;  %v1410_v1 = vsel %vm1375_vm0, %v7177_v55, 0  ;;  %v1401_v43 = vsel %vm1375_vm0, %v7213_v35, 0 }
 0x1ae   : > { %v7161_v48 = vpack.c.bf16 %v1012_v45, %v1011_v38  ;;  %v1297_v45 = vadd.f32 %v7151_v42, %v4950_v4 }
 0x1af   : > { %v7163_v49 = vpop.f32.mrf.mxu0  ;;  %v1407_v17 = vsel %vm1375_vm0, %v7187_v63, 0 }
 0x1b0   : > { %v1300_v47 = vadd.f32 %v7163_v49, %v4950_v4 }
 0x1b1   : > { %v7169_v51 = vpop.f32.mrf.mxu0 }
 0x1b2   : > { %v7237_v52 = vpack.c.bf16 %v1300_v47, %v1297_v45 }
 0x1b3   : > { %5452 = vmatpush3.bf16.xpose.msra.mxu1 %v1419_v33  ;;  %v5439_v39 = vpop.f32.mrf.mxu0 }
 0x1b4   : > { %5739 = vmatprep.subr.msk.bf16.mxu1 %vm1375_vm0, %v7143_v32  ;;  %v1313_v37 = vadd.f32 %v5439_v39, %v4950_v4  ;;  %v1289_v39 = vadd.f32 %v4950_v4, %v7157_v46 }
 0x1b5   : > { %v1304_v29 = vpop.f32.mrf.mxu0 }
 0x1b6   : > { %v1305_v6 = vadd.f32 %v4950_v4, %v1304_v29  ;;  %v1292_v29 = vadd.f32 %v4950_v4, %v7169_v51 }
 0x1b7   : > { %v5440_v54 = vpop.f32.mrf.mxu0 }
 0x1b8   : > { %v1316_v38 = vadd.f32 %v5440_v54, %v4950_v4  ;;  %v7246_v42 = vpack.c.bf16 %v1292_v29, %v1289_v39 }
 0x1b9   : > { %v1307_v58 = vpop.f32.mrf.mxu0 }
 0x1ba   : > { %v7224_v25 = vpack.c.bf16 %v1316_v38, %v1313_v37  ;;  %v1308_v40 = vadd.f32 %v4950_v4, %v1307_v58 }
 0x1bb   : > { %5454 = vmatpush3.bf16.xpose.msra.mxu1 %v1416_v18  ;;  %v5443_v59 = vpop.f32.mrf.mxu0 }
 0x1bc   : > { %5740 = vmatprep.subr.msk.bf16.mxu1 %vm1375_vm0, %v7165_v50  ;;  %v1329_v13 = vadd.f32 %v5443_v59, %v4950_v4  ;;  %v7232_v18 = vpack.c.bf16 %v1308_v40, %v1305_v6 }
 0x1bd   : > { %v1320_v19 = vpop.f32.mrf.mxu0 }
 0x1be   : > { %v1321_v31 = vadd.f32 %v4950_v4, %v1320_v19 }
 0x1bf   : > { %v5444_v16 = vpop.f32.mrf.mxu0 }
 0x1c0   : > { %v1332_v20 = vadd.f32 %v5444_v16, %v4950_v4 }
 0x1c1   : > { %v1323_v2 = vpop.f32.mrf.mxu0 }
 0x1c2   : > { %v7210_v33 = vpack.c.bf16 %v1332_v20, %v1329_v13  ;;  %v1324_v34 = vadd.f32 %v4950_v4, %v1323_v2 }
 0x1c3   : > { %5456 = vmatpush3.bf16.xpose.msra.mxu1 %v1413_v57  ;;  %v5447_v22 = vpop.f32.mrf.mxu0 }
 0x1c4   : > { %5741 = vmatprep.subr.msk.bf16.mxu1 %vm1375_vm0, %v7177_v55  ;;  %v1345_v7 = vadd.f32 %v5447_v22, %v4950_v4  ;;  %v7220_v10 = vpack.c.bf16 %v1324_v34, %v1321_v31 }
 0x1c5   : > { %v1336_v5 = vpop.f32.mrf.mxu0 }
 0x1c6   : > { %v1337_v9 = vadd.f32 %v4950_v4, %v1336_v5 }
 0x1c7   : > { %v5448_v8 = vpop.f32.mrf.mxu0 }
 0x1c8   : > { %v1348_v11 = vadd.f32 %v5448_v8, %v4950_v4 }
 0x1c9   : > { %v1339_v12 = vpop.f32.mrf.mxu0 }
 0x1ca   : > { %v7200_v23 = vpack.c.bf16 %v1348_v11, %v1345_v7  ;;  %v1340_v24 = vadd.f32 %v4950_v4, %v1339_v12 }
 0x1cb   : > { %5458 = vmatpush3.bf16.xpose.msra.mxu1 %v1410_v1 }
 0x1cc   : > { %5742 = vmatprep.subr.msk.bf16.mxu1 %vm1375_vm0, %v7187_v63  ;;  %v7204_v27 = vpack.c.bf16 %v1340_v24, %v1337_v9  ;;  %5481 = vmatprep.subr.bf16.mxu0 %v7200_v23 }
 0x1cd   : > { %5482 = vmatpush3.bf16.msra.mxu0 %v7200_v23 }
 0x1ce   : > { %5483 = vmatprep.subr.bf16.mxu0 %v7204_v27 }
 0x1d1   : > { %5484 = vmatpush3.bf16.msra.mxu0 %v7204_v27 }
 0x1d2   : > { %5485 = vmatprep.subr.bf16.mxu0 %v7210_v33 }
 0x1d3   : > { %5460 = vmatpush3.bf16.xpose.msra.mxu1 %v1407_v17 }
 0x1d4   : > { %5743 = vmatprep.subr.msk.bf16.mxu1 %vm1375_vm0, %v7073_v15 }
 0x1d5   : > { %5486 = vmatpush3.bf16.msra.mxu0 %v7210_v33 }
 0x1d6   : > { %5487 = vmatprep.subr.bf16.mxu0 %v7220_v10 }
 0x1d9   : > { %5488 = vmatpush3.bf16.msra.mxu0 %v7220_v10 }
 0x1da   : > { %5489 = vmatprep.subr.bf16.mxu0 %v7224_v25 }
 0x1db   : > { %5462 = vmatpush3.bf16.xpose.msra.mxu1 %v1404_v14 }
 0x1dc   : > { %5744 = vmatprep.subr.msk.bf16.mxu1 %vm1375_vm0, %v7213_v35 }
 0x1dd   : > { %5490 = vmatpush3.bf16.msra.mxu0 %v7224_v25 }
 0x1de   : > { %5491 = vmatprep.subr.bf16.mxu0 %v7232_v18 }
 0x1e1   : > { %5492 = vmatpush3.bf16.msra.mxu0 %v7232_v18 }
 0x1e2   : > { %5493 = vmatprep.subr.bf16.mxu0 %v7237_v52 }
 0x1e3   : > { %5464 = vmatpush3.bf16.xpose.msra.mxu1 %v1401_v43 }
 0x1e5   : > { %5494 = vmatpush3.bf16.msra.mxu0 %v7237_v52 }
 0x1e6   : > { %5495 = vmatprep.subr.bf16.mxu0 %v7246_v42 }
 0x1e9   : > { %5496 = vmatpush3.bf16.msra.mxu0 %v7246_v42 }
 0x1ea   : > { %5466 = vmatmul.mubr.msk.bf16.vlgmr.msra.gmra.mxu1 %vm1375_vm0, %v7096_v36 }
 0x1eb   : > { %5469 = vmatprep.mubr.msk.bf16.mxu1 %vm1375_vm0, %v7117_v0 }
 0x1f2   : > { %5470 = vmatmul.mubr.msk.bf16.gmra.mxu1 %vm1375_vm0, %v7110_v56 }
 0x1f3   : > { %5473 = vmatprep.mubr.msk.bf16.mxu1 %vm1375_vm0, %v7140_v28 }
 0x1fa   : > { %5474 = vmatmul.mubr.msk.bf16.gmra.mxu1 %vm1375_vm0, %v7135_v21 }
 0x1fb   : > { %5477 = vmatprep.mubr.msk.bf16.mxu1 %vm1375_vm0, %v7161_v48 }
 0x202   : > { %5478 = vmatmul.mubr.msk.bf16.gmra.mxu1 %vm1375_vm0, %v7155_v44 }
 0x21c   : > { %v7262_v46 = vpop.permute.xlu0 %1848 }
 0x21d   : > { %5745 = vmatprep.subr.msk.bf16.mxu0 %vm1375_vm0, %v7262_v46 }
 0x21e   : > { %v7300_v7 = vpop.permute.xlu1 %1846 }
 0x2aa   : > { %v5467_v49 = vpop.f32.mrf.mxu1 }
 0x2ab   : > { %1525 = vmax.xlane.f32.xlu1 %v5467_v49 }
 0x2ac   : > { %v1458_v51 = vpop.f32.mrf.mxu1 }
 0x2ad   : > { %1521 = vmax.xlane.f32.xlu0 %v1458_v51 }
 0x2ae   : > { %v5468_v53 = vpop.f32.mrf.mxu1 }
 0x2af   : > { %1527 = vmax.xlane.f32.xlu1 %v5468_v53 }
 0x2b0   : > { %v1461_v54 = vpop.f32.mrf.mxu1 }
 0x2b1   : > { %1523 = vmax.xlane.f32.xlu0 %v1461_v54 }
 0x2b2   : > { %v5471_v57 = vpop.f32.mrf.mxu1 }
 0x2b4   : > { %v7266_v58 = vpop.f32.mrf.mxu1 }
 0x2b5   : > { %1533 = vmax.xlane.f32.xlu0 %v5471_v57 }
 0x2b6   : > { %v7268_v59 = vpop.f32.mrf.mxu1 }
 0x2b7   : > { %1535 = vmax.xlane.f32.xlu1 %v7268_v59 }
 0x2b8   : > { %v7271_v60 = vpop.f32.mrf.mxu1 }
 0x2b9   : > { %1529 = vmax.xlane.f32.xlu0 %v7266_v58 }
 0x2ba   : > { %v7274_v19 = vpop.f32.mrf.mxu1 }
 0x2bb   : > { %1531 = vmax.xlane.f32.xlu1 %v7271_v60 }
 0x2bc   : > { %v7277_v61 = vpop.f32.mrf.mxu1 }
 0x2bd   : > { %1541 = vmax.xlane.f32.xlu0 %v7274_v19 }
 0x2be   : > { %v7280_v16 = vpop.f32.mrf.mxu1 }
 0x2bf   : > { %1543 = vmax.xlane.f32.xlu1 %v7280_v16 }
 0x2c0   : > { %v7283_v1 = vpop.f32.mrf.mxu1 }
 0x2c1   : > { %1537 = vmax.xlane.f32.xlu0 %v7277_v61 }
 0x2c2   : > { %v5479_v2 = vpop.f32.mrf.mxu1 }
 0x2c3   : > { %1539 = vmax.xlane.f32.xlu1 %v7283_v1 }
 0x2c4   : > { %v7287_v4 = vpop.f32.mrf.mxu1 }
 0x2c5   : > { %1549 = vmax.xlane.f32.xlu0 %v5479_v2 }
 0x2c6   : > { %v7294_v22 = vpop.f32.mrf.mxu1 }
 0x2c8   : > { %v7297_v5 = vpop.f32.mrf.mxu1 }
 0x2c9   : > { %1545 = vmax.xlane.f32.xlu0 %v7287_v4 }
 0x2d4   : > { %1842 = vrot.lane.b32.xlu1 %v7165_v50, %s6676_s27 }
 0x2df   : > { %1844 = vrot.lane.b32.xlu0 %v7143_v32, %s6676_s27 }
 0x2f8   : > { %1551 = vmax.xlane.f32.xlu1 %v7294_v22 }
 0x2fc   : > { %1547 = vmax.xlane.f32.xlu1 %v7297_v5 }
 0x334   : > { %v1526_v8 = vpop.xlane.xlu1 %1525 }
 0x335   : > { %v1555_v17 = vsub.f32 %v5467_v49, %v1526_v8 }
 0x336   : > { %v1522_v9 = vpop.xlane.xlu0 %1521 }
 0x337   : > { %v1573_v11 = vmul.f32 1.442695, %v1555_v17  ;;  %v1553_v12 = vsub.f32 %v1458_v51, %v1522_v9 }
 0x338   : > { %v1528_v13 = vpop.xlane.xlu1 %1527 }
 0x339   : > { %5984 = vpow2.f32 %v1573_v11  ;;  %v1569_v20 = vmul.f32 1.442695, %v1553_v12  ;;  %v1556_v24 = vsub.f32 %v5468_v53, %v1528_v13 }
 0x33a   : > { %v1524_v26 = vpop.xlane.xlu0 %1523 }
 0x33b   : > { %v1575_v30 = vmul.f32 1.442695, %v1556_v24  ;;  %v1554_v31 = vsub.f32 %v1461_v54, %v1524_v26  ;;  %5986 = vpow2.f32 %v1569_v20 }
 0x33d   : > { %5988 = vpow2.f32 %v1575_v30  ;;  %v1571_v34 = vmul.f32 1.442695, %v1554_v31 }
 0x33e   : > { %v1534_v40 = vpop.xlane.xlu0 %1533 }
 0x33f   : > { %5990 = vpow2.f32 %v1571_v34  ;;  %v1559_v29 = vsub.f32 %v5471_v57, %v1534_v40 }
 0x340   : > { %v1536_v47 = vpop.xlane.xlu1 %1535 }
 0x341   : > { %v1581_v54 = vmul.f32 1.442695, %v1559_v29  ;;  %v1560_v17 = vsub.f32 %v7268_v59, %v1536_v47 }
 0x342   : > { %v1530_v43 = vpop.xlane.xlu0 %1529 }
 0x343   : > { %v1557_v51 = vsub.f32 %v7266_v58, %v1530_v43  ;;  %5992 = vpow2.f32 %v1581_v54  ;;  %v1583_v24 = vmul.f32 1.442695, %v1560_v17 }
 0x344   : > { %v1532_v49 = vpop.xlane.xlu1 %1531 }
 0x345   : > { %v1558_v8 = vsub.f32 %v7271_v60, %v1532_v49  ;;  %v1577_v9 = vmul.f32 1.442695, %v1557_v51 }
 0x346   : > { %v7302_v14 = vpop.eup %5984  ;;  %v1542_v45 = vpop.xlane.xlu0 %1541 }
 0x347   : > { %1605 = vadd.xlane.f32.xlu0 %v7302_v14  ;;  %v1579_v12 = vmul.f32 1.442695, %v1558_v8  ;;  %5994 = vpow2.f32 %v1577_v9  ;;  %v1563_v26 = vsub.f32 %v7274_v19, %v1542_v45 }
 0x348   : > { %v7305_v37 = vpop.eup %5986  ;;  %v1544_v11 = vpop.xlane.xlu1 %1543 }
 0x349   : > { %5996 = vpow2.f32 %v1579_v12  ;;  %v1589_v31 = vmul.f32 1.442695, %v1563_v26  ;;  %v1564_v34 = vsub.f32 %v7280_v16, %v1544_v11 }
 0x34a   : > { %v7307_v38 = vpop.eup %5988  ;;  %v1538_v39 = vpop.xlane.xlu0 %1537  ;;  %5998 = vpow2.f32 %v1583_v24 }
 0x34b   : > { %1601 = vadd.xlane.f32.xlu0 %v7305_v37  ;;  %1607 = vadd.xlane.f32.xlu1 %v7307_v38  ;;  %v1561_v60 = vsub.f32 %v7277_v61, %v1538_v39  ;;  %v1591_v19 = vmul.f32 1.442695, %v1564_v34 }
 0x34c   : > { %v7311_v6 = vpop.eup %5990  ;;  %v1540_v30 = vpop.xlane.xlu1 %1539 }
 0x34d   : > { %v1585_v40 = vmul.f32 1.442695, %v1561_v60  ;;  %v1562_v61 = vsub.f32 %v7283_v1, %v1540_v30 }
 0x34e   : > { %v1550_v53 = vpop.xlane.xlu0 %1549 }
 0x34f   : > { %1603 = vadd.xlane.f32.xlu1 %v7311_v6  ;;  %v1567_v13 = vsub.f32 %v5479_v2, %v1550_v53  ;;  %v1587_v51 = vmul.f32 1.442695, %v1562_v61  ;;  %v1896_v61 = vsel %vm1375_vm0, %v7262_v46, 0 }
 0x350   : > { %v7325_v2 = vpop.permute.xlu1 %1842  ;;  %v7327_v43 = vpop.eup %5992 }
 0x351   : > { %v1597_v57 = vmul.f32 1.442695, %v1567_v13 }
 0x352   : > { %v1546_v20 = vpop.xlane.xlu0 %1545 }
 0x353   : > { %v1565_v58 = vsub.f32 %v7287_v4, %v1546_v20  ;;  %6000 = vpow2.f32 %v1597_v57 }
 0x354   : > { %6002 = vpow2.f32 %v1589_v31  ;;  %v7330_v45 = vpop.eup %5994 }
 0x355   : > { %v1593_v59 = vmul.f32 1.442695, %v1565_v58 }
 0x356   : > { %v7334_v39 = vpop.eup %5996  ;;  %v1845_v13 = vpop.permute.xlu0 %1844 }
 0x357   : > { %6004 = vpow2.f32 %v1593_v59  ;;  %v7338_v49 = vpop.eup %5998 }
 0x358   : > { %6006 = vpow2.f32 %v1585_v40 }
 0x359   : > { %6008 = vpow2.f32 %v1591_v19 }
 0x360   : > { %1838 = vrot.lane.b32.xlu1 %v7187_v63, %s6676_s27  ;;  %v7341_v54 = vpop.eup %6000 }
 0x361   : > { %1840 = vrot.lane.b32.xlu0 %v7177_v55, %s6676_s27  ;;  %v7345_v1 = vpop.eup %6002 }
 0x364   : > { %v7347_v8 = vpop.eup %6004 }
 0x365   : > { %v7351_v17 = vpop.eup %6006 }
 0x380   : > { %1613 = vadd.xlane.f32.xlu0 %v7327_v43 }
 0x381   : > { %v1552_v4 = vpop.xlane.xlu1 %1551 }
 0x382   : > { %v1568_v47 = vsub.f32 %v7294_v22, %v1552_v4 }
 0x384   : > { %v1599_v16 = vmul.f32 1.442695, %v1568_v47  ;;  %1611 = vadd.xlane.f32.xlu0 %v7334_v39  ;;  %1609 = vadd.xlane.f32.xlu1 %v7330_v45 }
 0x385   : > { %v1548_v29 = vpop.xlane.xlu1 %1547 }
 0x386   : > { %6010 = vpow2.f32 %v1599_v16  ;;  %v1566_v53 = vsub.f32 %v7297_v5, %v1548_v29  ;;  %v7354_v5 = vpop.eup %6008 }
 0x387   : > { %6012 = vpow2.f32 %v1587_v51 }
 0x388   : > { %1629 = vadd.xlane.f32.xlu0 %v7341_v54  ;;  %1615 = vadd.xlane.f32.xlu1 %v7338_v49  ;;  %v1595_v22 = vmul.f32 1.442695, %v1566_v53 }
 0x38a   : > { %6014 = vpow2.f32 %v1595_v22 }
 0x38c   : > { %1625 = vadd.xlane.f32.xlu0 %v7347_v8  ;;  %1621 = vadd.xlane.f32.xlu1 %v7345_v1 }
 0x390   : > { %1617 = vadd.xlane.f32.xlu1 %v7351_v17 }
 0x393   : > { %v7356_v9 = vpop.eup %6010 }
 0x394   : > { %1631 = vadd.xlane.f32.xlu0 %v7356_v9  ;;  %1623 = vadd.xlane.f32.xlu1 %v7354_v5  ;;  %v7360_v11 = vpop.eup %6012 }
 0x397   : > { %v7363_v12 = vpop.eup %6014 }
 0x398   : > { %1619 = vadd.xlane.f32.xlu1 %v7360_v11 }
 0x39c   : > { %1627 = vadd.xlane.f32.xlu1 %v7363_v12 }
 0x3aa   : > { %1836 = vrot.lane.b32.xlu0 %v7073_v15, %s6676_s27 }
 0x3ad   : > { %1834 = vrot.lane.b32.xlu1 %v7213_v35, %s6676_s27 }
 0x3ae   : > { %1810 = vrot.lane.b32.xlu0 %v7101_v41, %s6676_s27 }
 0x3b1   : > { %1812 = vrot.lane.b32.xlu1 %v7096_v36, %s6676_s27 }
 0x3b2   : > { %1814 = vrot.lane.b32.xlu0 %v7117_v0, %s6676_s27 }
 0x3b5   : > { %1816 = vrot.lane.b32.xlu1 %v7110_v56, %s6676_s27 }
 0x3b6   : > { %1818 = vrot.lane.b32.xlu0 %v7140_v28, %s6676_s27 }
 0x3b9   : > { %1820 = vrot.lane.b32.xlu1 %v7135_v21, %s6676_s27 }
 0x3ba   : > { %1822 = vrot.lane.b32.xlu0 %v7161_v48, %s6676_s27 }
 0x3bd   : > { %1824 = vrot.lane.b32.xlu1 %v7155_v44, %s6676_s27 }
 0x3be   : > { %2186 = vrot.lane.b32.xlu0 %v7200_v23, %s6676_s27 }
 0x3c1   : > { %2184 = vrot.lane.b32.xlu1 %v7204_v27, %s6676_s27 }
 0x3c2   : > { %2182 = vrot.lane.b32.xlu0 %v7210_v33, %s6676_s27 }
 0x3c5   : > { %2176 = vrot.lane.b32.xlu1 %v7232_v18, %s6676_s27 }
 0x3c6   : > { %2180 = vrot.lane.b32.xlu0 %v7220_v10, %s6676_s27 }
 0x3c9   : > { %2172 = vrot.lane.b32.xlu1 %v7246_v42, %s6676_s27 }
 0x3ca   : > { %2178 = vrot.lane.b32.xlu0 %v7224_v25, %s6676_s27 }
 0x3d0   : > { %v1606_v20 = vpop.xlane.xlu0 %1605 }
 0x3d1   : > { %6016 = vrcp.f32 %v1606_v20 }
 0x3d4   : > { %v1602_v24 = vpop.xlane.xlu0 %1601  ;;  %v1608_v26 = vpop.xlane.xlu1 %1607 }
 0x3d5   : > { %6018 = vrcp.f32 %v1602_v24 }
 0x3d6   : > { %6020 = vrcp.f32 %v1608_v26 }
 0x3d8   : > { %v1604_v57 = vpop.xlane.xlu1 %1603  ;;  %v1841_v46 = vpop.permute.xlu0 %1840 }
 0x3d9   : > { %6022 = vrcp.f32 %v1604_v57 }
 0x3dc   : > { %v1839_v47 = vpop.permute.xlu1 %1838 }
 0x3de   : > { %v6017_v58 = vpop.eup %6016 }
 0x3df   : > { %v1651_v30 = vmul.f32 %v6017_v58, %v7302_v14 }
 0x3e1   : > { %1667 = vst [vmem:[%s7402_s15 + $0x10] sm:$0xff] %v1651_v30 }
 0x3e2   : > { %v6019_v31 = vpop.eup %6018 }
 0x3e3   : > { %v6021_v60 = vpop.eup %6020  ;;  %v1649_v59 = vmul.f32 %v6019_v31, %v7305_v37  ;;  %v1893_v37 = vsel %vm1375_vm0, %v7300_v7, 0 }
 0x3e4   : > { %v1652_v34 = vmul.f32 %v6021_v60, %v7307_v38  ;;  %v1890_v38 = vsel %vm1375_vm0, %v1845_v13, 0 }
 0x3e5   : > { %1665 = vst [vmem:[%s7402_s15] sm:$0xff] %v1649_v59 }
 0x3e6   : > { %v6023_v40 = vpop.eup %6022  ;;  %1668 = vst [vmem:[%s7402_s15 + $0x18] sm:$0xff] %v1652_v34  ;;  %v1682_v4 = vpack.c.bf16 %v1652_v34, %v1651_v30 }
 0x3e7   : > { %v1650_v19 = vmul.f32 %v6023_v40, %v7311_v6  ;;  %v1887_v6 = vsel %vm1375_vm0, %v7325_v2, 0 }
 0x3e9   : > { %1666 = vst [vmem:[%s7402_s15 + $0x8] sm:$0xff] %v1650_v19  ;;  %v1681_v14 = vpack.c.bf16 %v1650_v19, %v1649_v59 }
 0x3eb   : > { %5497 = vmatprep.mubr.bf16.mxu0 %v1681_v14 }
 0x3ec   : > { %5498 = vmatmul.mubr.bf16.vlgmr.msra.gmra.mxu0 %v1682_v4 }
 0x3ed   : > { %5514 = vmatpush3.bf16.xpose.msra.mxu0 %v1896_v61 }
 0x3ee   : > { %5746 = vmatprep.subr.msk.bf16.mxu0 %vm1375_vm0, %v7300_v7  ;;  %v1884_v7 = vsel %vm1375_vm0, %v1841_v46, 0 }
 0x3f5   : > { %5516 = vmatpush3.bf16.xpose.msra.mxu0 %v1893_v37 }
 0x3f6   : > { %5747 = vmatprep.subr.msk.bf16.mxu0 %vm1375_vm0, %v1845_v13 }
 0x3fd   : > { %5518 = vmatpush3.bf16.xpose.msra.mxu0 %v1890_v38 }
 0x3fe   : > { %5748 = vmatprep.subr.msk.bf16.mxu0 %vm1375_vm0, %v7325_v2  ;;  %v1881_v2 = vsel %vm1375_vm0, %v1839_v47, 0 }
 0x405   : > { %5520 = vmatpush3.bf16.xpose.msra.mxu0 %v1887_v6 }
 0x406   : > { %5749 = vmatprep.subr.msk.bf16.mxu0 %vm1375_vm0, %v1841_v46 }
 0x409   : > { %v1614_v16 = vpop.xlane.xlu0 %1613 }
 0x40a   : > { %6024 = vrcp.f32 %v1614_v16 }
 0x40d   : > { %5522 = vmatpush3.bf16.xpose.msra.mxu0 %v1884_v7  ;;  %v1612_v29 = vpop.xlane.xlu0 %1611  ;;  %v1610_v51 = vpop.xlane.xlu1 %1609 }
 0x40e   : > { %6026 = vrcp.f32 %v1612_v29  ;;  %5750 = vmatprep.subr.msk.bf16.mxu0 %vm1375_vm0, %v1839_v47 }
 0x40f   : > { %6028 = vrcp.f32 %v1610_v51 }
 0x411   : > { %v1630_v53 = vpop.xlane.xlu0 %1629  ;;  %v1616_v22 = vpop.xlane.xlu1 %1615 }
 0x412   : > { %6030 = vrcp.f32 %v1630_v53 }
 0x413   : > { %6032 = vrcp.f32 %v1616_v22 }
 0x415   : > { %5524 = vmatpush3.bf16.xpose.msra.mxu0 %v1881_v2  ;;  %v1626_v13 = vpop.xlane.xlu0 %1625  ;;  %v1622_v20 = vpop.xlane.xlu1 %1621 }
 0x416   : > { %6034 = vrcp.f32 %v1626_v13 }
 0x417   : > { %v6025_v24 = vpop.eup %6024  ;;  %6036 = vrcp.f32 %v1622_v20 }
 0x418   : > { %v1655_v26 = vmul.f32 %v6025_v24, %v7327_v43 }
 0x419   : > { %v1618_v57 = vpop.xlane.xlu1 %1617 }
 0x41a   : > { %6038 = vrcp.f32 %v1618_v57  ;;  %1671 = vst [vmem:[%s7402_s15 + $0x30] sm:$0xff] %v1655_v26 }
 0x41b   : > { %v6027_v58 = vpop.eup %6026 }
 0x41c   : > { %v6029_v30 = vpop.eup %6028  ;;  %v1654_v31 = vmul.f32 %v6027_v58, %v7334_v39 }
 0x41d   : > { %v1632_v60 = vpop.xlane.xlu0 %1631  ;;  %v1624_v59 = vpop.xlane.xlu1 %1623  ;;  %v1653_v34 = vmul.f32 %v6029_v30, %v7330_v45 }
 0x41e   : > { %6040 = vrcp.f32 %v1632_v60  ;;  %1670 = vst [vmem:[%s7402_s15 + $0x28] sm:$0xff] %v1654_v31 }
 0x41f   : > { %v6031_v40 = vpop.eup %6030  ;;  %6042 = vrcp.f32 %v1624_v59  ;;  %1669 = vst [vmem:[%s7402_s15 + $0x20] sm:$0xff] %v1653_v34  ;;  %v1683_v19 = vpack.c.bf16 %v1654_v31, %v1653_v34 }
 0x420   : > { %v6033_v43 = vpop.eup %6032  ;;  %v1663_v14 = vmul.f32 %v6031_v40, %v7341_v54 }
 0x421   : > { %5501 = vmatprep.mubr.bf16.mxu0 %v1683_v19  ;;  %v1837_v4 = vpop.permute.xlu0 %1836  ;;  %v1620_v61 = vpop.xlane.xlu1 %1619  ;;  %v1656_v39 = vmul.f32 %v6033_v43, %v7338_v49 }
 0x422   : > { %6044 = vrcp.f32 %v1620_v61  ;;  %5751 = vmatprep.subr.msk.bf16.mxu0 %vm1375_vm0, %v1837_v4  ;;  %v1878_v45 = vsel %vm1375_vm0, %v1837_v4, 0  ;;  %1679 = vst [vmem:[%s7402_s15 + $0x70] sm:$0xff] %v1663_v14 }
 0x423   : > { %v6035_v37 = vpop.eup %6034  ;;  %5526 = vmatpush3.bf16.xpose.msra.mxu0 %v1878_v45  ;;  %1672 = vst [vmem:[%s7402_s15 + $0x38] sm:$0xff] %v1656_v39  ;;  %v1684_v38 = vpack.c.bf16 %v1656_v39, %v1655_v26 }
 0x424   : > { %v6037_v6 = vpop.eup %6036  ;;  %v1661_v54 = vmul.f32 %v6035_v37, %v7347_v8 }
 0x425   : > { %5502 = vmatmul.mubr.bf16.gmra.mxu0 %v1684_v38  ;;  %v1811_v46 = vpop.permute.xlu0 %1810  ;;  %v1628_v47 = vpop.xlane.xlu1 %1627  ;;  %v1659_v49 = vmul.f32 %v6037_v6, %v7345_v1 }
 0x426   : > { %6046 = vrcp.f32 %v1628_v47  ;;  %1677 = vst [vmem:[%s7402_s15 + $0x60] sm:$0xff] %v1661_v54 }
 0x427   : > { %v6039_v16 = vpop.eup %6038  ;;  %1675 = vst [vmem:[%s7402_s15 + $0x50] sm:$0xff] %v1659_v49 }
 0x428   : > { %v1657_v7 = vmul.f32 %v6039_v16, %v7351_v17 }
 0x429   : > { %v1815_v29 = vpop.permute.xlu0 %1814  ;;  %v1835_v51 = vpop.permute.xlu1 %1834 }
 0x42a   : > { %5752 = vmatprep.subr.msk.bf16.mxu0 %vm1375_vm0, %v1835_v51  ;;  %v1875_v8 = vsel %vm1375_vm0, %v1835_v51, 0  ;;  %1673 = vst [vmem:[%s7402_s15 + $0x40] sm:$0xff] %v1657_v7 }
 0x42b   : > { %v6041_v53 = vpop.eup %6040  ;;  %5528 = vmatpush3.bf16.xpose.msra.mxu0 %v1875_v8 }
 0x42c   : > { %v6043_v22 = vpop.eup %6042  ;;  %v1664_v1 = vmul.f32 %v6041_v53, %v7356_v9 }
 0x42d   : > { %v1819_v2 = vpop.permute.xlu0 %1818  ;;  %v1813_v13 = vpop.permute.xlu1 %1812  ;;  %v1660_v20 = vmul.f32 %v6043_v22, %v7354_v5 }
 0x42e   : > { %1680 = vst [vmem:[%s7402_s15 + $0x78] sm:$0xff] %v1664_v1 }
 0x42f   : > { %v6045_v17 = vpop.eup %6044  ;;  %1676 = vst [vmem:[%s7402_s15 + $0x58] sm:$0xff] %v1660_v20  ;;  %v1686_v31 = vpack.c.bf16 %v1660_v20, %v1659_v49 }
 0x430   : > { %v1658_v24 = vmul.f32 %v6045_v17, %v7360_v11  ;;  %v1688_v11 = vpack.c.bf16 %v1664_v1, %v1663_v14 }
 0x431   : > { %v1823_v26 = vpop.permute.xlu0 %1822  ;;  %v1817_v57 = vpop.permute.xlu1 %1816 }
 0x432   : > { %1674 = vst [vmem:[%s7402_s15 + $0x48] sm:$0xff] %v1658_v24  ;;  %v1685_v58 = vpack.c.bf16 %v1658_v24, %v1657_v7 }
 0x433   : > { %v6047_v30 = vpop.eup %6046 }
 0x434   : > { %5505 = vmatprep.mubr.bf16.mxu0 %v1685_v58  ;;  %v1662_v60 = vmul.f32 %v6047_v30, %v7363_v12 }
 0x435   : > { %5506 = vmatmul.mubr.bf16.gmra.mxu0 %v1686_v31  ;;  %v1821_v9 = vpop.permute.xlu1 %1820  ;;  %v2187_v59 = vpop.permute.xlu0 %2186 }
 0x436   : > { %1678 = vst [vmem:[%s7402_s15 + $0x68] sm:$0xff] %v1662_v60  ;;  %v1687_v5 = vpack.c.bf16 %v1662_v60, %v1661_v54  ;;  %5545 = vmatprep.subr.bf16.mxu1 %v2187_v59 }
 0x437   : > { %5546 = vmatpush3.bf16.msra.mxu1 %v2187_v59 }
 0x438   : > { %5509 = vmatprep.mubr.bf16.mxu0 %v1687_v5 }
 0x439   : > { %v1825_v34 = vpop.permute.xlu1 %1824  ;;  %v2183_v40 = vpop.permute.xlu0 %2182 }
 0x43d   : > { %5510 = vmatmul.mubr.bf16.gmra.mxu0 %v1688_v11  ;;  %v2185_v19 = vpop.permute.xlu1 %2184  ;;  %v2181_v43 = vpop.permute.xlu0 %2180 }
 0x43e   : > { %5529 = vmatprep.mubr.msk.bf16.mxu0 %vm1375_vm0, %v1811_v46  ;;  %5547 = vmatprep.subr.bf16.mxu1 %v2185_v19 }
 0x43f   : > { %5548 = vmatpush3.bf16.msra.mxu1 %v2185_v19 }
 0x440   : > { %5549 = vmatprep.subr.bf16.mxu1 %v2183_v40 }
 0x441   : > { %v2179_v12 = vpop.permute.xlu0 %2178  ;;  %v2177_v4 = vpop.permute.xlu1 %2176 }
 0x443   : > { %5550 = vmatpush3.bf16.msra.mxu1 %v2183_v40 }
 0x444   : > { %5551 = vmatprep.subr.bf16.mxu1 %v2181_v43 }
 0x445   : > { %5530 = vmatmul.mubr.msk.bf16.vlgmr.msra.gmra.mxu0 %vm1375_vm0, %v1813_v13  ;;  %v2173_v40 = vpop.permute.xlu1 %2172 }
 0x446   : > { %5533 = vmatprep.mubr.msk.bf16.mxu0 %vm1375_vm0, %v1815_v29 }
 0x447   : > { %5552 = vmatpush3.bf16.msra.mxu1 %v2181_v43 }
 0x448   : > { %5553 = vmatprep.subr.bf16.mxu1 %v2179_v12 }
 0x44b   : > { %5554 = vmatpush3.bf16.msra.mxu1 %v2179_v12 }
 0x44c   : > { %5555 = vmatprep.subr.bf16.mxu1 %v2177_v4 }
 0x44d   : > { %5534 = vmatmul.mubr.msk.bf16.gmra.mxu0 %vm1375_vm0, %v1817_v57 }
 0x44e   : > { %5537 = vmatprep.mubr.msk.bf16.mxu0 %vm1375_vm0, %v1819_v2 }
 0x44f   : > { %5556 = vmatpush3.bf16.msra.mxu1 %v2177_v4 }
 0x455   : > { %5538 = vmatmul.mubr.msk.bf16.gmra.mxu0 %vm1375_vm0, %v1821_v9 }
 0x456   : > { %5541 = vmatprep.mubr.msk.bf16.mxu0 %vm1375_vm0, %v1823_v26 }
 0x45d   : > { %5542 = vmatmul.mubr.msk.bf16.gmra.mxu0 %vm1375_vm0, %v1825_v34 }
 0x4ac   : > { %v5499_v14 = vpop.f32.mrf.mxu0 }
 0x4ad   : > { %1788 = vst.msk [vmem:[#allocation2 + $0x10] sm:$0xff] %vm1375_vm0, %v5499_v14 }
 0x4ae   : > { %v1723_v61 = vpop.f32.mrf.mxu0 }
 0x4af   : > { %1786 = vst.msk [vmem:[#allocation2] sm:$0xff] %vm1375_vm0, %v1723_v61 }
 0x4b0   : > { %v5500_v39 = vpop.f32.mrf.mxu0 }
 0x4b1   : > { %1789 = vst.msk [vmem:[#allocation2 + $0x18] sm:$0xff] %vm1375_vm0, %v5500_v39 }
 0x4b2   : > { %v1726_v45 = vpop.f32.mrf.mxu0 }
 0x4b3   : > { %1787 = vst.msk [vmem:[#allocation2 + $0x8] sm:$0xff] %vm1375_vm0, %v1726_v45 }
 0x4e5   : > { %v5503_v37 = vpop.f32.mrf.mxu0 }
 0x4e6   : > { %1792 = vst.msk [vmem:[#allocation2 + $0x30] sm:$0xff] %vm1375_vm0, %v5503_v37 }
 0x4e7   : > { %v1739_v38 = vpop.f32.mrf.mxu0 }
 0x4e8   : > { %1790 = vst.msk [vmem:[#allocation2 + $0x20] sm:$0xff] %vm1375_vm0, %v1739_v38 }
 0x4e9   : > { %v5504_v6 = vpop.f32.mrf.mxu0 }
 0x4ea   : > { %1793 = vst.msk [vmem:[#allocation2 + $0x38] sm:$0xff] %vm1375_vm0, %v5504_v6 }
 0x4eb   : > { %v1742_v54 = vpop.f32.mrf.mxu0 }
 0x4ec   : > { %1791 = vst.msk [vmem:[#allocation2 + $0x28] sm:$0xff] %vm1375_vm0, %v1742_v54 }
 0x4f5   : > { %v5507_v46 = vpop.f32.mrf.mxu0 }
 0x4f6   : > { %1796 = vst.msk [vmem:[#allocation2 + $0x50] sm:$0xff] %vm1375_vm0, %v5507_v46 }
 0x4f7   : > { %v1755_v47 = vpop.f32.mrf.mxu0 }
 0x4f8   : > { %1794 = vst.msk [vmem:[#allocation2 + $0x40] sm:$0xff] %vm1375_vm0, %v1755_v47 }
 0x4f9   : > { %v5508_v49 = vpop.f32.mrf.mxu0 }
 0x4fa   : > { %1797 = vst.msk [vmem:[#allocation2 + $0x58] sm:$0xff] %vm1375_vm0, %v5508_v49 }
 0x4fb   : > { %v1758_v16 = vpop.f32.mrf.mxu0 }
 0x4fc   : > { %1795 = vst.msk [vmem:[#allocation2 + $0x48] sm:$0xff] %vm1375_vm0, %v1758_v16 }
 0x4fd   : > { %v5511_v7 = vpop.f32.mrf.mxu0 }
 0x4fe   : > { %1800 = vst.msk [vmem:[#allocation2 + $0x70] sm:$0xff] %vm1375_vm0, %v5511_v7 }
 0x4ff   : > { %v1771_v29 = vpop.f32.mrf.mxu0 }
 0x500   : > { %1798 = vst.msk [vmem:[#allocation2 + $0x60] sm:$0xff] %vm1375_vm0, %v1771_v29 }
 0x501   : > { %v5512_v51 = vpop.f32.mrf.mxu0 }
 0x502   : > { %1801 = vst.msk [vmem:[#allocation2 + $0x78] sm:$0xff] %vm1375_vm0, %v5512_v51 }
 0x503   : > { %v1774_v8 = vpop.f32.mrf.mxu0 }
 0x504   : > { %1799 = vst.msk [vmem:[#allocation2 + $0x68] sm:$0xff] %vm1375_vm0, %v1774_v8 }
 0x505   : > { %v5531_v53 = vpop.f32.mrf.mxu0 }
 0x506   : > { %1999 = vmax.xlane.f32.xlu0 %v5531_v53 }
 0x507   : > { %v1932_v22 = vpop.f32.mrf.mxu0 }
 0x509   : > { %v5532_v1 = vpop.f32.mrf.mxu0 }
 0x50a   : > { %1995 = vmax.xlane.f32.xlu0 %v1932_v22 }
 0x50b   : > { %v1935_v2 = vpop.f32.mrf.mxu0 }
 0x50c   : > { %1997 = vmax.xlane.f32.xlu1 %v1935_v2 }
 0x50d   : > { %v7479_v13 = vpop.f32.mrf.mxu0 }
 0x50e   : > { %2001 = vmax.xlane.f32.xlu0 %v5532_v1 }
 0x50f   : > { %v7481_v20 = vpop.f32.mrf.mxu0 }
 0x511   : > { %v7483_v17 = vpop.f32.mrf.mxu0 }
 0x512   : > { %2009 = vmax.xlane.f32.xlu1 %v7483_v17 }
 0x513   : > { %v7486_v24 = vpop.f32.mrf.mxu0 }
 0x515   : > { %v7488_v26 = vpop.f32.mrf.mxu0 }
 0x516   : > { %2005 = vmax.xlane.f32.xlu1 %v7486_v24 }
 0x517   : > { %v7491_v57 = vpop.f32.mrf.mxu0 }
 0x519   : > { %v7493_v58 = vpop.f32.mrf.mxu0 }
 0x51a   : > { %2017 = vmax.xlane.f32.xlu1 %v7493_v58 }
 0x51b   : > { %v7496_v30 = vpop.f32.mrf.mxu0 }
 0x51d   : > { %v7508_v31 = vpop.f32.mrf.mxu0 }
 0x51e   : > { %2013 = vmax.xlane.f32.xlu1 %v7496_v30 }
 0x51f   : > { %v7511_v60 = vpop.f32.mrf.mxu0 }
 0x521   : > { %v7514_v9 = vpop.f32.mrf.mxu0 }
 0x523   : > { %v7518_v59 = vpop.f32.mrf.mxu0 }
 0x524   : > { %2174 = vrot.lane.b32.xlu0 %v7237_v52, %s6676_s27 }
 0x52f   : > { %2402 = vrot.lane.b32.xlu1 %v7120_v3, %s6677_s8 }
 0x533   : > { %2398 = vrot.lane.b32.xlu1 %v7165_v50, %s6677_s8 }
 0x543   : > { %2007 = vmax.xlane.f32.xlu0 %v7479_v13 }
 0x547   : > { %2003 = vmax.xlane.f32.xlu0 %v7481_v20 }
 0x54b   : > { %2015 = vmax.xlane.f32.xlu0 %v7488_v26 }
 0x54f   : > { %2011 = vmax.xlane.f32.xlu0 %v7491_v57 }
 0x553   : > { %2023 = vmax.xlane.f32.xlu0 %v7508_v31 }
 0x557   : > { %2019 = vmax.xlane.f32.xlu0 %v7511_v60  ;;  %2025 = vmax.xlane.f32.xlu1 %v7514_v9 }
 0x55b   : > { %2021 = vmax.xlane.f32.xlu1 %v7518_v59 }
 0x56d   : > { %2404 = vrot.lane.b32.xlu0 %v7114_v62, %s6677_s8 }
 0x571   : > { %2400 = vrot.lane.b32.xlu0 %v7143_v32, %s6677_s8 }
 0x575   : > { %2396 = vrot.lane.b32.xlu0 %v7177_v55, %s6677_s8 }
 0x58f   : > { %v2000_v5 = vpop.xlane.xlu0 %1999 }
 0x590   : > { %v2029_v34 = vsub.f32 %v5531_v53, %v2000_v5 }
 0x592   : > { %v2047_v11 = vmul.f32 1.442695, %v2029_v34 }
 0x593   : > { %v1996_v19 = vpop.xlane.xlu0 %1995 }
 0x594   : > { %6048 = vpow2.f32 %v2047_v11  ;;  %v2027_v43 = vsub.f32 %v1932_v22, %v1996_v19 }
 0x595   : > { %v1998_v12 = vpop.xlane.xlu1 %1997 }
 0x596   : > { %v2043_v4 = vmul.f32 1.442695, %v2027_v43  ;;  %v2028_v61 = vsub.f32 %v1935_v2, %v1998_v12 }
 0x597   : > { %v2002_v14 = vpop.xlane.xlu0 %2001 }
 0x598   : > { %6050 = vpow2.f32 %v2043_v4  ;;  %v2030_v39 = vsub.f32 %v5532_v1, %v2002_v14  ;;  %v2045_v38 = vmul.f32 1.442695, %v2028_v61 }
 0x59a   : > { %v2049_v45 = vmul.f32 1.442695, %v2030_v39 }
 0x59b   : > { %v2175_v37 = vpop.permute.xlu0 %2174  ;;  %v2010_v49 = vpop.xlane.xlu1 %2009 }
 0x59c   : > { %6052 = vpow2.f32 %v2049_v45  ;;  %5557 = vmatprep.subr.bf16.mxu1 %v2175_v37  ;;  %v2034_v22 = vsub.f32 %v7483_v17, %v2010_v49 }
 0x59d   : > { %5558 = vmatpush3.bf16.msra.mxu1 %v2175_v37  ;;  %6054 = vpow2.f32 %v2045_v38 }
 0x59e   : > { %5559 = vmatprep.subr.bf16.mxu1 %v2173_v40  ;;  %v2057_v11 = vmul.f32 1.442695, %v2034_v22 }
 0x59f   : > { %v2006_v16 = vpop.xlane.xlu1 %2005 }
 0x5a0   : > { %v2032_v29 = vsub.f32 %v7486_v24, %v2006_v16 }
 0x5a1   : > { %v7527_v6 = vpop.eup %6048  ;;  %5560 = vmatpush3.bf16.msra.mxu1 %v2173_v40 }
 0x5a2   : > { %2079 = vadd.xlane.f32.xlu1 %v7527_v6  ;;  %v2053_v1 = vmul.f32 1.442695, %v2032_v29 }
 0x5a3   : > { %v2018_v7 = vpop.xlane.xlu1 %2017 }
 0x5a5   : > { %v7530_v54 = vpop.eup %6050 }
 0x5a6   : > { %2075 = vadd.xlane.f32.xlu1 %v7530_v54 }
 0x5a7   : > { %v2014_v2 = vpop.xlane.xlu1 %2013 }
 0x5a9   : > { %v7533_v46 = vpop.eup %6052 }
 0x5aa   : > { %2081 = vadd.xlane.f32.xlu1 %v7533_v46  ;;  %v7536_v47 = vpop.eup %6054 }
 0x5ab   : > { %v7546_v24 = vpop.permute.xlu1 %2402 }
 0x5ae   : > { %2077 = vadd.xlane.f32.xlu1 %v7536_v47 }
 0x5af   : > { %v7551_v39 = vpop.permute.xlu1 %2398 }
 0x5bf   : > { %2394 = vrot.lane.b32.xlu1 %v7187_v63, %s6677_s8 }
 0x5cc   : > { %v2008_v51 = vpop.xlane.xlu0 %2007 }
 0x5cd   : > { %v2033_v8 = vsub.f32 %v7479_v13, %v2008_v51  ;;  %v2038_v13 = vsub.f32 %v7493_v58, %v2018_v7 }
 0x5cf   : > { %v2055_v53 = vmul.f32 1.442695, %v2033_v8  ;;  %v2065_v61 = vmul.f32 1.442695, %v2038_v13 }
 0x5d0   : > { %v2004_v5 = vpop.xlane.xlu0 %2003 }
 0x5d1   : > { %6056 = vpow2.f32 %v2055_v53  ;;  %v2031_v34 = vsub.f32 %v7481_v20, %v2004_v5  ;;  %v2036_v20 = vsub.f32 %v7496_v30, %v2014_v2 }
 0x5d2   : > { %6058 = vpow2.f32 %v2053_v1 }
 0x5d3   : > { %v2051_v40 = vmul.f32 1.442695, %v2031_v34  ;;  %v2061_v58 = vmul.f32 1.442695, %v2036_v20 }
 0x5d4   : > { %v2016_v19 = vpop.xlane.xlu0 %2015 }
 0x5d5   : > { %6060 = vpow2.f32 %v2051_v40  ;;  %v2037_v43 = vsub.f32 %v7488_v26, %v2016_v19 }
 0x5d6   : > { %6062 = vpow2.f32 %v2057_v11 }
 0x5d7   : > { %v2063_v12 = vmul.f32 1.442695, %v2037_v43 }
 0x5d8   : > { %v2012_v17 = vpop.xlane.xlu0 %2011 }
 0x5d9   : > { %6064 = vpow2.f32 %v2063_v12  ;;  %v2035_v4 = vsub.f32 %v7491_v57, %v2012_v17 }
 0x5db   : > { %v2059_v14 = vmul.f32 1.442695, %v2035_v4 }
 0x5dc   : > { %v2024_v45 = vpop.xlane.xlu0 %2023 }
 0x5dd   : > { %6066 = vpow2.f32 %v2059_v14  ;;  %v2041_v26 = vsub.f32 %v7508_v31, %v2024_v45 }
 0x5de   : > { %v7554_v37 = vpop.eup %6056  ;;  %6068 = vpow2.f32 %v2065_v61 }
 0x5df   : > { %v2071_v38 = vmul.f32 1.442695, %v2041_v26  ;;  %2087 = vadd.xlane.f32.xlu0 %v7554_v37  ;;  %v7557_v57 = vpop.eup %6058 }
 0x5e0   : > { %v2020_v49 = vpop.xlane.xlu0 %2019  ;;  %v2026_v16 = vpop.xlane.xlu1 %2025 }
 0x5e1   : > { %6070 = vpow2.f32 %v2071_v38  ;;  %v2039_v30 = vsub.f32 %v7511_v60, %v2020_v49  ;;  %v2042_v7 = vsub.f32 %v7514_v9, %v2026_v16 }
 0x5e2   : > { %v7561_v29 = vpop.eup %6060  ;;  %6072 = vpow2.f32 %v2061_v58 }
 0x5e3   : > { %v2067_v51 = vmul.f32 1.442695, %v2039_v30  ;;  %2083 = vadd.xlane.f32.xlu0 %v7561_v29  ;;  %2085 = vadd.xlane.f32.xlu1 %v7557_v57  ;;  %v2073_v31 = vmul.f32 1.442695, %v2042_v7  ;;  %v7567_v22 = vpop.eup %6062  ;;  %v2443_v30 = vsel %vm1375_vm0, %v7551_v39, 0 }
 0x5e4   : > { %v7565_v8 = vpop.permute.xlu0 %2404  ;;  %v2022_v53 = vpop.xlane.xlu1 %2021 }
 0x5e5   : > { %6074 = vpow2.f32 %v2067_v51  ;;  %v2040_v1 = vsub.f32 %v7518_v59, %v2022_v53  ;;  %5753 = vmatprep.subr.msk.bf16.mxu1 %vm1375_vm0, %v7565_v8 }
 0x5e6   : > { %v7572_v60 = vpop.eup %6064  ;;  %6076 = vpow2.f32 %v2073_v31 }
 0x5e7   : > { %v2069_v9 = vmul.f32 1.442695, %v2040_v1  ;;  %2089 = vadd.xlane.f32.xlu0 %v7567_v22  ;;  %2095 = vadd.xlane.f32.xlu1 %v7572_v60 }
 0x5e9   : > { %6078 = vpow2.f32 %v2069_v9 }
 0x5ea   : > { %v7576_v2 = vpop.eup %6066 }
 0x5eb   : > { %2091 = vadd.xlane.f32.xlu1 %v7576_v2  ;;  %v7579_v5 = vpop.eup %6068 }
 0x5ee   : > { %v7581_v34 = vpop.eup %6070 }
 0x5ef   : > { %2103 = vadd.xlane.f32.xlu0 %v7581_v34  ;;  %2097 = vadd.xlane.f32.xlu1 %v7579_v5  ;;  %v7585_v59 = vpop.eup %6072 }
 0x5f2   : > { %v7587_v40 = vpop.eup %6074 }
 0x5f3   : > { %2099 = vadd.xlane.f32.xlu0 %v7587_v40  ;;  %2093 = vadd.xlane.f32.xlu1 %v7585_v59  ;;  %v7591_v11 = vpop.eup %6076 }
 0x5f6   : > { %v7593_v19 = vpop.eup %6078 }
 0x5f7   : > { %2105 = vadd.xlane.f32.xlu0 %v7591_v11  ;;  %2101 = vadd.xlane.f32.xlu1 %v7593_v19 }
 0x608   : > { %2390 = vrot.lane.b32.xlu1 %v7213_v35, %s6677_s8 }
 0x60c   : > { %2376 = vrot.lane.b32.xlu1 %v7096_v36, %s6677_s8 }
 0x60d   : > { %2392 = vrot.lane.b32.xlu0 %v7073_v15, %s6677_s8 }
 0x610   : > { %2380 = vrot.lane.b32.xlu1 %v7110_v56, %s6677_s8 }
 0x611   : > { %2374 = vrot.lane.b32.xlu0 %v7101_v41, %s6677_s8 }
 0x614   : > { %2384 = vrot.lane.b32.xlu1 %v7135_v21, %s6677_s8 }
 0x615   : > { %2378 = vrot.lane.b32.xlu0 %v7117_v0, %s6677_s8 }
 0x618   : > { %2388 = vrot.lane.b32.xlu1 %v7155_v44, %s6677_s8 }
 0x619   : > { %2382 = vrot.lane.b32.xlu0 %v7140_v28, %s6677_s8 }
 0x61c   : > { %2732 = vrot.lane.b32.xlu1 %v7204_v27, %s6677_s8 }
 0x61d   : > { %2386 = vrot.lane.b32.xlu0 %v7161_v48, %s6677_s8 }
 0x620   : > { %2724 = vrot.lane.b32.xlu1 %v7232_v18, %s6677_s8 }
 0x621   : > { %2734 = vrot.lane.b32.xlu0 %v7200_v23, %s6677_s8 }
 0x624   : > { %2720 = vrot.lane.b32.xlu1 %v7246_v42, %s6677_s8 }
 0x625   : > { %2730 = vrot.lane.b32.xlu0 %v7210_v33, %s6677_s8 }
 0x629   : > { %2728 = vrot.lane.b32.xlu0 %v7220_v10, %s6677_s8 }
 0x62b   : > { %v2080_v43 = vpop.xlane.xlu1 %2079 }
 0x62c   : > { %6080 = vrcp.f32 %v2080_v43 }
 0x62d   : > { %2726 = vrot.lane.b32.xlu0 %v7224_v25, %s6677_s8 }
 0x62f   : > { %v2076_v12 = vpop.xlane.xlu1 %2075 }
 0x630   : > { %6082 = vrcp.f32 %v2076_v12 }
 0x633   : > { %v2082_v13 = vpop.xlane.xlu1 %2081 }
 0x634   : > { %6084 = vrcp.f32 %v2082_v13 }
 0x637   : > { %v2078_v17 = vpop.xlane.xlu1 %2077 }
 0x638   : > { %6086 = vrcp.f32 %v2078_v17 }
 0x639   : > { %v6081_v4 = vpop.eup %6080 }
 0x63a   : > { %v2125_v14 = vmul.f32 %v6081_v4, %v7527_v6  ;;  %v2452_v6 = vsel %vm1375_vm0, %v7565_v8, 0 }
 0x63b   : > { %v2395_v51 = vpop.permute.xlu1 %2394 }
 0x63c   : > { %4977 = vst [vmem:[%s7402_s15 + $0x90] sm:$0xff] %v2125_v14 }
 0x63d   : > { %v6083_v61 = vpop.eup %6082 }
 0x63e   : > { %v2123_v20 = vmul.f32 %v6083_v61, %v7530_v54  ;;  %v2449_v54 = vsel %vm1375_vm0, %v7546_v24, 0 }
 0x640   : > { %4975 = vst [vmem:[%s7402_s15 + $0x80] sm:$0xff] %v2123_v20 }
 0x641   : > { %v6085_v45 = vpop.eup %6084 }
 0x642   : > { %v2126_v26 = vmul.f32 %v6085_v45, %v7533_v46  ;;  %v2401_v46 = vpop.permute.xlu0 %2400 }
 0x644   : > { %4978 = vst [vmem:[%s7402_s15 + $0x98] sm:$0xff] %v2126_v26  ;;  %v2157_v16 = vpack.c.bf16 %v2126_v26, %v2125_v14 }
 0x645   : > { %v6087_v38 = vpop.eup %6086 }
 0x646   : > { %v2124_v58 = vmul.f32 %v6087_v38, %v7536_v47  ;;  %v2446_v47 = vsel %vm1375_vm0, %v2401_v46, 0  ;;  %v2397_v7 = vpop.permute.xlu0 %2396 }
 0x648   : > { %4976 = vst [vmem:[%s7402_s15 + $0x88] sm:$0xff] %v2124_v58  ;;  %v2156_v49 = vpack.c.bf16 %v2124_v58, %v2123_v20 }
 0x64a   : > { %5561 = vmatprep.mubr.bf16.mxu1 %v2156_v49 }
 0x64b   : > { %5562 = vmatmul.mubr.bf16.vlgmr.msra.gmra.mxu1 %v2157_v16 }
 0x64c   : > { %5578 = vmatpush3.bf16.xpose.msra.mxu1 %v2452_v6 }
 0x64d   : > { %5754 = vmatprep.subr.msk.bf16.mxu1 %vm1375_vm0, %v7546_v24  ;;  %v2440_v24 = vsel %vm1375_vm0, %v2397_v7, 0 }
 0x654   : > { %5580 = vmatpush3.bf16.xpose.msra.mxu1 %v2449_v54 }
 0x655   : > { %5755 = vmatprep.subr.msk.bf16.mxu1 %vm1375_vm0, %v2401_v46 }
 0x65c   : > { %5582 = vmatpush3.bf16.xpose.msra.mxu1 %v2446_v47 }
 0x65d   : > { %5756 = vmatprep.subr.msk.bf16.mxu1 %vm1375_vm0, %v7551_v39  ;;  %v2437_v39 = vsel %vm1375_vm0, %v2395_v51, 0 }
 0x664   : > { %5584 = vmatpush3.bf16.xpose.msra.mxu1 %v2443_v30 }
 0x665   : > { %5757 = vmatprep.subr.msk.bf16.mxu1 %vm1375_vm0, %v2397_v7 }
 0x668   : > { %v2088_v31 = vpop.xlane.xlu0 %2087 }
 0x669   : > { %6088 = vrcp.f32 %v2088_v31 }
 0x66c   : > { %5586 = vmatpush3.bf16.xpose.msra.mxu1 %v2440_v24  ;;  %v2084_v8 = vpop.xlane.xlu0 %2083  ;;  %v2086_v53 = vpop.xlane.xlu1 %2085 }
 0x66d   : > { %6090 = vrcp.f32 %v2084_v8  ;;  %5758 = vmatprep.subr.msk.bf16.mxu1 %vm1375_vm0, %v2395_v51 }
 0x66e   : > { %6092 = vrcp.f32 %v2086_v53 }
 0x670   : > { %v2090_v1 = vpop.xlane.xlu0 %2089  ;;  %v2096_v9 = vpop.xlane.xlu1 %2095 }
 0x671   : > { %6094 = vrcp.f32 %v2090_v1 }
 0x672   : > { %6096 = vrcp.f32 %v2096_v9 }
 0x674   : > { %5588 = vmatpush3.bf16.xpose.msra.mxu1 %v2437_v39  ;;  %v2092_v43 = vpop.xlane.xlu1 %2091 }
 0x675   : > { %6098 = vrcp.f32 %v2092_v43 }
 0x676   : > { %v6089_v12 = vpop.eup %6088 }
 0x677   : > { %v2129_v13 = vmul.f32 %v6089_v12, %v7554_v37 }
 0x678   : > { %v2104_v17 = vpop.xlane.xlu0 %2103  ;;  %v2098_v4 = vpop.xlane.xlu1 %2097 }
 0x679   : > { %6100 = vrcp.f32 %v2104_v17  ;;  %4981 = vst [vmem:[%s7402_s15 + $0xb0] sm:$0xff] %v2129_v13 }
 0x67a   : > { %v6091_v14 = vpop.eup %6090  ;;  %6102 = vrcp.f32 %v2098_v4 }
 0x67b   : > { %v6093_v61 = vpop.eup %6092  ;;  %v2127_v20 = vmul.f32 %v6091_v14, %v7561_v29 }
 0x67c   : > { %v2100_v45 = vpop.xlane.xlu0 %2099  ;;  %v2094_v26 = vpop.xlane.xlu1 %2093  ;;  %v2128_v38 = vmul.f32 %v6093_v61, %v7557_v57 }
 0x67d   : > { %6104 = vrcp.f32 %v2100_v45  ;;  %4979 = vst [vmem:[%s7402_s15 + $0xa0] sm:$0xff] %v2127_v20 }
 0x67e   : > { %v6095_v58 = vpop.eup %6094  ;;  %6106 = vrcp.f32 %v2094_v26  ;;  %4980 = vst [vmem:[%s7402_s15 + $0xa8] sm:$0xff] %v2128_v38  ;;  %v2158_v37 = vpack.c.bf16 %v2128_v38, %v2127_v20 }
 0x67f   : > { %v6097_v49 = vpop.eup %6096  ;;  %v2130_v16 = vmul.f32 %v6095_v58, %v7567_v22 }
 0x680   : > { %5565 = vmatprep.mubr.bf16.mxu1 %v2158_v37  ;;  %v2106_v6 = vpop.xlane.xlu0 %2105  ;;  %v2102_v54 = vpop.xlane.xlu1 %2101  ;;  %v2133_v29 = vmul.f32 %v6097_v49, %v7572_v60 }
 0x681   : > { %6108 = vrcp.f32 %v2106_v6  ;;  %4982 = vst [vmem:[%s7402_s15 + $0xb8] sm:$0xff] %v2130_v16  ;;  %v2159_v46 = vpack.c.bf16 %v2130_v16, %v2129_v13 }
 0x682   : > { %v6099_v57 = vpop.eup %6098  ;;  %6110 = vrcp.f32 %v2102_v54  ;;  %4985 = vst [vmem:[%s7402_s15 + $0xd0] sm:$0xff] %v2133_v29 }
 0x683   : > { %5566 = vmatmul.mubr.bf16.gmra.mxu1 %v2159_v46  ;;  %v2131_v47 = vmul.f32 %v6099_v57, %v7576_v2 }
 0x684   : > { %v2393_v30 = vpop.permute.xlu0 %2392  ;;  %v2391_v7 = vpop.permute.xlu1 %2390 }
 0x685   : > { %5759 = vmatprep.subr.msk.bf16.mxu1 %vm1375_vm0, %v2393_v30  ;;  %v2434_v22 = vsel %vm1375_vm0, %v2393_v30, 0  ;;  %4983 = vst [vmem:[%s7402_s15 + $0xc0] sm:$0xff] %v2131_v47  ;;  %v2431_v13 = vsel %vm1375_vm0, %v2391_v7, 0 }
 0x686   : > { %v6101_v51 = vpop.eup %6100  ;;  %5590 = vmatpush3.bf16.xpose.msra.mxu1 %v2434_v22 }
 0x687   : > { %v6103_v60 = vpop.eup %6102  ;;  %5760 = vmatprep.subr.msk.bf16.mxu1 %vm1375_vm0, %v2391_v7  ;;  %v2137_v31 = vmul.f32 %v6101_v51, %v7581_v34 }
 0x688   : > { %v2375_v24 = vpop.permute.xlu0 %2374  ;;  %v2377_v8 = vpop.permute.xlu1 %2376  ;;  %v2134_v2 = vmul.f32 %v6103_v60, %v7579_v5 }
 0x689   : > { %4989 = vst [vmem:[%s7402_s15 + $0xf0] sm:$0xff] %v2137_v31 }
 0x68a   : > { %v6105_v53 = vpop.eup %6104  ;;  %4986 = vst [vmem:[%s7402_s15 + $0xd8] sm:$0xff] %v2134_v2  ;;  %v2161_v4 = vpack.c.bf16 %v2134_v2, %v2133_v29 }
 0x68b   : > { %v6107_v1 = vpop.eup %6106  ;;  %v2135_v9 = vmul.f32 %v6105_v53, %v7587_v40 }
 0x68c   : > { %v2379_v39 = vpop.permute.xlu0 %2378  ;;  %v2381_v43 = vpop.permute.xlu1 %2380  ;;  %v2132_v12 = vmul.f32 %v6107_v1, %v7585_v59 }
 0x68d   : > { %4987 = vst [vmem:[%s7402_s15 + $0xe0] sm:$0xff] %v2135_v9 }
 0x68e   : > { %v6109_v34 = vpop.eup %6108  ;;  %5592 = vmatpush3.bf16.xpose.msra.mxu1 %v2431_v13  ;;  %4984 = vst [vmem:[%s7402_s15 + $0xc8] sm:$0xff] %v2132_v12  ;;  %v2160_v17 = vpack.c.bf16 %v2132_v12, %v2131_v47 }
 0x68f   : > { %v6111_v5 = vpop.eup %6110  ;;  %v2138_v14 = vmul.f32 %v6109_v34, %v7591_v11 }
 0x690   : > { %5569 = vmatprep.mubr.bf16.mxu1 %v2160_v17  ;;  %v2383_v61 = vpop.permute.xlu0 %2382  ;;  %v2385_v40 = vpop.permute.xlu1 %2384  ;;  %v2136_v20 = vmul.f32 %v6111_v5, %v7593_v19 }
 0x691   : > { %5570 = vmatmul.mubr.bf16.gmra.mxu1 %v2161_v4  ;;  %4990 = vst [vmem:[%s7402_s15 + $0xf8] sm:$0xff] %v2138_v14  ;;  %v2163_v38 = vpack.c.bf16 %v2138_v14, %v2137_v31 }
 0x692   : > { %4988 = vst [vmem:[%s7402_s15 + $0xe8] sm:$0xff] %v2136_v20  ;;  %v2162_v59 = vpack.c.bf16 %v2136_v20, %v2135_v9 }
 0x694   : > { %5573 = vmatprep.mubr.bf16.mxu1 %v2162_v59  ;;  %v2387_v45 = vpop.permute.xlu0 %2386  ;;  %v2389_v26 = vpop.permute.xlu1 %2388 }
 0x698   : > { %v2735_v58 = vpop.permute.xlu0 %2734  ;;  %v2733_v37 = vpop.permute.xlu1 %2732 }
 0x699   : > { %5574 = vmatmul.mubr.bf16.gmra.mxu1 %v2163_v38  ;;  %5609 = vmatprep.subr.bf16.mxu0 %v2735_v58 }
 0x69a   : > { %5593 = vmatprep.mubr.msk.bf16.mxu1 %vm1375_vm0, %v2375_v24  ;;  %5610 = vmatpush3.bf16.msra.mxu0 %v2735_v58 }
 0x69b   : > { %5611 = vmatprep.subr.bf16.mxu0 %v2733_v37 }
 0x69c   : > { %v2731_v11 = vpop.permute.xlu0 %2730  ;;  %v2725_v16 = vpop.permute.xlu1 %2724 }
 0x69e   : > { %5612 = vmatpush3.bf16.msra.mxu0 %v2733_v37 }
 0x69f   : > { %5613 = vmatprep.subr.bf16.mxu0 %v2731_v11 }
 0x6a0   : > { %v2729_v19 = vpop.permute.xlu0 %2728 }
 0x6a1   : > { %5594 = vmatmul.mubr.msk.bf16.vlgmr.msra.gmra.mxu1 %vm1375_vm0, %v2377_v8 }
 0x6a2   : > { %5597 = vmatprep.mubr.msk.bf16.mxu1 %vm1375_vm0, %v2379_v39  ;;  %5614 = vmatpush3.bf16.msra.mxu0 %v2731_v11 }
 0x6a3   : > { %5615 = vmatprep.subr.bf16.mxu0 %v2729_v19 }
 0x6a4   : > { %v2727_v49 = vpop.permute.xlu0 %2726 }
 0x6a6   : > { %5616 = vmatpush3.bf16.msra.mxu0 %v2729_v19 }
 0x6a7   : > { %5617 = vmatprep.subr.bf16.mxu0 %v2727_v49 }
 0x6a9   : > { %5598 = vmatmul.mubr.msk.bf16.gmra.mxu1 %vm1375_vm0, %v2381_v43 }
 0x6aa   : > { %5601 = vmatprep.mubr.msk.bf16.mxu1 %vm1375_vm0, %v2383_v61  ;;  %5618 = vmatpush3.bf16.msra.mxu0 %v2727_v49 }
 0x6ab   : > { %5619 = vmatprep.subr.bf16.mxu0 %v2725_v16 }
 0x6ae   : > { %5620 = vmatpush3.bf16.msra.mxu0 %v2725_v16 }
 0x6b1   : > { %5602 = vmatmul.mubr.msk.bf16.gmra.mxu1 %vm1375_vm0, %v2385_v40 }
 0x6b2   : > { %5605 = vmatprep.mubr.msk.bf16.mxu1 %vm1375_vm0, %v2387_v45 }
 0x6b9   : > { %5606 = vmatmul.mubr.msk.bf16.gmra.mxu1 %vm1375_vm0, %v2389_v26  ;;  %v2721_v26 = vpop.permute.xlu1 %2720 }
 0x70b   : > { %v7691_v6 = vpop.f32.mrf.mxu1 }
 0x70d   : > { %v7693_v54 = vpop.f32.mrf.mxu1 }
 0x70f   : > { %v7695_v29 = vpop.f32.mrf.mxu1 }
 0x711   : > { %v7697_v46 = vpop.f32.mrf.mxu1 }
 0x743   : > { %v7699_v57 = vpop.f32.mrf.mxu1 }
 0x745   : > { %v7701_v47 = vpop.f32.mrf.mxu1 }
 0x747   : > { %v7703_v30 = vpop.f32.mrf.mxu1 }
 0x749   : > { %v7705_v7 = vpop.f32.mrf.mxu1 }
 0x751   : > { %v7707_v22 = vpop.f32.mrf.mxu1 }
 0x753   : > { %v7709_v51 = vpop.f32.mrf.mxu1 }
 0x755   : > { %v7711_v60 = vpop.f32.mrf.mxu1 }
 0x757   : > { %v7713_v31 = vpop.f32.mrf.mxu1 }
 0x759   : > { %v7715_v24 = vpop.f32.mrf.mxu1 }
 0x75a   : > { %8926 = vst [vmem:[#allocation32_spill] sm:$0xff] %v7715_v24 }
 0x75b   : > { %v7717_v8 = vpop.f32.mrf.mxu1 }
 0x75d   : > { %v7719_v2 = vpop.f32.mrf.mxu1 }
 0x75e   : > { %8927 = vst [vmem:[#allocation33_spill] sm:$0xff] %v7719_v2 }
 0x75f   : > { %v7721_v53 = vpop.f32.mrf.mxu1 }
 0x760   : > { %8928 = vst [vmem:[#allocation34_spill] sm:$0xff] %v7721_v53 }
 0x761   : > { %v5595_v1 = vpop.f32.mrf.mxu1 }
 0x762   : > { %2555 = vmax.xlane.f32.xlu0 %v5595_v1 }
 0x763   : > { %v2488_v9 = vpop.f32.mrf.mxu1 }
 0x765   : > { %v5596_v39 = vpop.f32.mrf.mxu1 }
 0x766   : > { %2551 = vmax.xlane.f32.xlu0 %v2488_v9 }
 0x767   : > { %v2491_v43 = vpop.f32.mrf.mxu1 }
 0x768   : > { %2553 = vmax.xlane.f32.xlu1 %v2491_v43 }
 0x769   : > { %v7723_v12 = vpop.f32.mrf.mxu1 }
 0x76a   : > { %2557 = vmax.xlane.f32.xlu0 %v5596_v39 }
 0x76b   : > { %v7725_v13 = vpop.f32.mrf.mxu1 }
 0x76d   : > { %v7727_v34 = vpop.f32.mrf.mxu1 }
 0x76e   : > { %2565 = vmax.xlane.f32.xlu1 %v7727_v34 }
 0x76f   : > { %v7730_v17 = vpop.f32.mrf.mxu1 }
 0x771   : > { %v7732_v5 = vpop.f32.mrf.mxu1 }
 0x772   : > { %2561 = vmax.xlane.f32.xlu1 %v7730_v17 }
 0x773   : > { %v7735_v4 = vpop.f32.mrf.mxu1 }
 0x775   : > { %v7737_v14 = vpop.f32.mrf.mxu1 }
 0x776   : > { %2573 = vmax.xlane.f32.xlu1 %v7737_v14 }
 0x777   : > { %v7740_v61 = vpop.f32.mrf.mxu1 }
 0x779   : > { %v7752_v40 = vpop.f32.mrf.mxu1 }
 0x77a   : > { %2569 = vmax.xlane.f32.xlu1 %v7740_v61 }
 0x77b   : > { %v7755_v20 = vpop.f32.mrf.mxu1 }
 0x77d   : > { %v7758_v59 = vpop.f32.mrf.mxu1 }
 0x780   : > { %2722 = vrot.lane.b32.xlu0 %v7237_v52, %s6677_s8 }
 0x78b   : > { %2950 = vrot.lane.b32.xlu1 %v7120_v3, %s6678_s19  ;;  %v7762_v3 = vpop.f32.mrf.mxu1 }
 0x78f   : > { %2946 = vrot.lane.b32.xlu1 %v7165_v50, %s6678_s19 }
 0x79f   : > { %2563 = vmax.xlane.f32.xlu0 %v7723_v12 }
 0x7a3   : > { %2559 = vmax.xlane.f32.xlu0 %v7725_v13 }
 0x7a7   : > { %2571 = vmax.xlane.f32.xlu0 %v7732_v5 }
 0x7ab   : > { %2567 = vmax.xlane.f32.xlu0 %v7735_v4 }
 0x7af   : > { %2579 = vmax.xlane.f32.xlu0 %v7752_v40 }
 0x7b3   : > { %2575 = vmax.xlane.f32.xlu0 %v7755_v20  ;;  %2581 = vmax.xlane.f32.xlu1 %v7758_v59 }
 0x7b7   : > { %2577 = vmax.xlane.f32.xlu1 %v7762_v3 }
 0x7c9   : > { %2952 = vrot.lane.b32.xlu0 %v7114_v62, %s6678_s19 }
 0x7cd   : > { %2948 = vrot.lane.b32.xlu0 %v7143_v32, %s6678_s19 }
 0x7d1   : > { %2944 = vrot.lane.b32.xlu0 %v7177_v55, %s6678_s19 }
 0x7eb   : > { %v2556_v50 = vpop.xlane.xlu0 %2555 }
 0x7ec   : > { %v2585_v45 = vsub.f32 %v5595_v1, %v2556_v50 }
 0x7ee   : > { %v2603_v38 = vmul.f32 1.442695, %v2585_v45 }
 0x7ef   : > { %v2552_v58 = vpop.xlane.xlu0 %2551 }
 0x7f0   : > { %6112 = vpow2.f32 %v2603_v38  ;;  %v2583_v37 = vsub.f32 %v2488_v9, %v2552_v58 }
 0x7f1   : > { %v2554_v11 = vpop.xlane.xlu1 %2553 }
 0x7f2   : > { %v2599_v19 = vmul.f32 1.442695, %v2583_v37  ;;  %v2584_v16 = vsub.f32 %v2491_v43, %v2554_v11 }
 0x7f3   : > { %v2558_v49 = vpop.xlane.xlu0 %2557 }
 0x7f4   : > { %6114 = vpow2.f32 %v2599_v19  ;;  %v2586_v2 = vsub.f32 %v5596_v39, %v2558_v49  ;;  %v2601_v53 = vmul.f32 1.442695, %v2584_v16 }
 0x7f6   : > { %v2605_v62 = vmul.f32 1.442695, %v2586_v2 }
 0x7f7   : > { %v2723_v24 = vpop.permute.xlu0 %2722 }
 0x7f8   : > { %6116 = vpow2.f32 %v2605_v62  ;;  %5621 = vmatprep.subr.bf16.mxu0 %v2723_v24 }
 0x7f9   : > { %5622 = vmatpush3.bf16.msra.mxu0 %v2723_v24  ;;  %6118 = vpow2.f32 %v2601_v53  ;;  %v2566_v24 = vpop.xlane.xlu1 %2565 }
 0x7fa   : > { %5623 = vmatprep.subr.bf16.mxu0 %v2721_v26 }
 0x7fd   : > { %v7771_v32 = vpop.eup %6112  ;;  %5624 = vmatpush3.bf16.msra.mxu0 %v2721_v26  ;;  %v2562_v53 = vpop.xlane.xlu1 %2561  ;;  %v2590_v26 = vsub.f32 %v7727_v34, %v2566_v24 }
 0x7fe   : > { %2635 = vadd.xlane.f32.xlu1 %v7771_v32  ;;  %v2588_v39 = vsub.f32 %v7730_v17, %v2562_v53 }
 0x7ff   : > { %v2613_v49 = vmul.f32 1.442695, %v2590_v26 }
 0x800   : > { %v2609_v38 = vmul.f32 1.442695, %v2588_v39 }
 0x801   : > { %v7774_v55 = vpop.eup %6114  ;;  %v2574_v9 = vpop.xlane.xlu1 %2573 }
 0x802   : > { %2631 = vadd.xlane.f32.xlu1 %v7774_v55 }
 0x805   : > { %v7777_v1 = vpop.eup %6116  ;;  %v2570_v58 = vpop.xlane.xlu1 %2569 }
 0x806   : > { %2637 = vadd.xlane.f32.xlu1 %v7777_v1  ;;  %v7780_v2 = vpop.eup %6118 }
 0x809   : > { %v7790_v17 = vpop.permute.xlu1 %2950 }
 0x80a   : > { %2633 = vadd.xlane.f32.xlu1 %v7780_v2 }
 0x81b   : > { %2942 = vrot.lane.b32.xlu1 %v7187_v63, %s6678_s19 }
 0x828   : > { %v2564_v43 = vpop.xlane.xlu0 %2563 }
 0x829   : > { %v2589_v50 = vsub.f32 %v7723_v12, %v2564_v43  ;;  %v2594_v12 = vsub.f32 %v7737_v14, %v2574_v9  ;;  %v7795_v43 = vpop.permute.xlu1 %2946 }
 0x82b   : > { %v2611_v45 = vmul.f32 1.442695, %v2589_v50  ;;  %v2621_v39 = vmul.f32 1.442695, %v2594_v12 }
 0x82c   : > { %v2560_v37 = vpop.xlane.xlu0 %2559 }
 0x82d   : > { %6120 = vpow2.f32 %v2611_v45  ;;  %v2587_v11 = vsub.f32 %v7725_v13, %v2560_v37  ;;  %v2592_v13 = vsub.f32 %v7740_v61, %v2570_v58 }
 0x82e   : > { %6122 = vpow2.f32 %v2609_v38 }
 0x82f   : > { %v2607_v19 = vmul.f32 1.442695, %v2587_v11  ;;  %v2617_v14 = vmul.f32 1.442695, %v2592_v13  ;;  %v2991_v13 = vsel %vm1375_vm0, %v7795_v43, 0 }
 0x830   : > { %v2572_v63 = vpop.xlane.xlu0 %2571 }
 0x831   : > { %6124 = vpow2.f32 %v2607_v19  ;;  %v2593_v16 = vsub.f32 %v7732_v5, %v2572_v63 }
 0x832   : > { %6126 = vpow2.f32 %v2613_v49 }
 0x833   : > { %v2619_v62 = vmul.f32 1.442695, %v2593_v16 }
 0x834   : > { %v2568_v34 = vpop.xlane.xlu0 %2567 }
 0x835   : > { %6128 = vpow2.f32 %v2619_v62  ;;  %v2591_v24 = vsub.f32 %v7735_v4, %v2568_v34 }
 0x837   : > { %v2615_v53 = vmul.f32 1.442695, %v2591_v24 }
 0x838   : > { %v2580_v50 = vpop.xlane.xlu0 %2579 }
 0x839   : > { %6130 = vpow2.f32 %v2615_v53  ;;  %v2597_v5 = vsub.f32 %v7752_v40, %v2580_v50 }
 0x83a   : > { %v7798_v45 = vpop.eup %6120  ;;  %6132 = vpow2.f32 %v2621_v39 }
 0x83b   : > { %v2627_v26 = vmul.f32 1.442695, %v2597_v5  ;;  %2643 = vadd.xlane.f32.xlu0 %v7798_v45  ;;  %v7801_v4 = vpop.eup %6122 }
 0x83c   : > { %v2576_v9 = vpop.xlane.xlu0 %2575  ;;  %v2582_v38 = vpop.xlane.xlu1 %2581 }
 0x83d   : > { %6134 = vpow2.f32 %v2627_v26  ;;  %v2595_v61 = vsub.f32 %v7755_v20, %v2576_v9  ;;  %v2598_v58 = vsub.f32 %v7758_v59, %v2582_v38 }
 0x83e   : > { %v7805_v37 = vpop.eup %6124  ;;  %6136 = vpow2.f32 %v2617_v14 }
 0x83f   : > { %v2623_v11 = vmul.f32 1.442695, %v2595_v61  ;;  %2639 = vadd.xlane.f32.xlu0 %v7805_v37  ;;  %2641 = vadd.xlane.f32.xlu1 %v7801_v4  ;;  %v2629_v40 = vmul.f32 1.442695, %v2598_v58  ;;  %v7811_v63 = vpop.eup %6126 }
 0x840   : > { %v7809_v19 = vpop.permute.xlu0 %2952  ;;  %v2578_v49 = vpop.xlane.xlu1 %2577 }
 0x841   : > { %6138 = vpow2.f32 %v2623_v11  ;;  %v2596_v16 = vsub.f32 %v7762_v3, %v2578_v49  ;;  %5761 = vmatprep.subr.msk.bf16.mxu0 %vm1375_vm0, %v7809_v19 }
 0x842   : > { %v7816_v20 = vpop.eup %6128  ;;  %6140 = vpow2.f32 %v2629_v40 }
 0x843   : > { %v2625_v59 = vmul.f32 1.442695, %v2596_v16  ;;  %2645 = vadd.xlane.f32.xlu0 %v7811_v63  ;;  %2651 = vadd.xlane.f32.xlu1 %v7816_v20 }
 0x845   : > { %6142 = vpow2.f32 %v2625_v59 }
 0x846   : > { %v7820_v62 = vpop.eup %6130 }
 0x847   : > { %2647 = vadd.xlane.f32.xlu1 %v7820_v62  ;;  %v7823_v12 = vpop.eup %6132 }
 0x84a   : > { %v7825_v34 = vpop.eup %6134 }
 0x84b   : > { %2659 = vadd.xlane.f32.xlu0 %v7825_v34  ;;  %2653 = vadd.xlane.f32.xlu1 %v7823_v12  ;;  %v7829_v3 = vpop.eup %6136 }
 0x84e   : > { %v7831_v24 = vpop.eup %6138 }
 0x84f   : > { %2655 = vadd.xlane.f32.xlu0 %v7831_v24  ;;  %2649 = vadd.xlane.f32.xlu1 %v7829_v3  ;;  %v7835_v53 = vpop.eup %6140 }
 0x852   : > { %v7837_v39 = vpop.eup %6142 }
 0x853   : > { %2661 = vadd.xlane.f32.xlu0 %v7835_v53  ;;  %2657 = vadd.xlane.f32.xlu1 %v7837_v39 }
 0x864   : > { %2938 = vrot.lane.b32.xlu1 %v7213_v35, %s6678_s19 }
 0x868   : > { %2924 = vrot.lane.b32.xlu1 %v7096_v36, %s6678_s19 }
 0x869   : > { %2940 = vrot.lane.b32.xlu0 %v7073_v15, %s6678_s19 }
 0x86c   : > { %2928 = vrot.lane.b32.xlu1 %v7110_v56, %s6678_s19 }
 0x86d   : > { %2922 = vrot.lane.b32.xlu0 %v7101_v41, %s6678_s19 }
 0x870   : > { %2932 = vrot.lane.b32.xlu1 %v7135_v21, %s6678_s19 }
 0x871   : > { %2926 = vrot.lane.b32.xlu0 %v7117_v0, %s6678_s19 }
 0x874   : > { %2936 = vrot.lane.b32.xlu1 %v7155_v44, %s6678_s19 }
 0x875   : > { %2930 = vrot.lane.b32.xlu0 %v7140_v28, %s6678_s19 }
 0x878   : > { %3280 = vrot.lane.b32.xlu1 %v7204_v27, %s6678_s19 }
 0x879   : > { %2934 = vrot.lane.b32.xlu0 %v7161_v48, %s6678_s19 }
 0x87d   : > { %3282 = vrot.lane.b32.xlu0 %v7200_v23, %s6678_s19 }
 0x881   : > { %3278 = vrot.lane.b32.xlu0 %v7210_v33, %s6678_s19 }
 0x885   : > { %3276 = vrot.lane.b32.xlu0 %v7220_v10, %s6678_s19 }
 0x887   : > { %v2636_v15 = vpop.xlane.xlu1 %2635 }
 0x888   : > { %6144 = vrcp.f32 %v2636_v15 }
 0x88b   : > { %v2632_v36 = vpop.xlane.xlu1 %2631 }
 0x88c   : > { %6146 = vrcp.f32 %v2632_v36 }
 0x88f   : > { %v2638_v41 = vpop.xlane.xlu1 %2637 }
 0x890   : > { %6148 = vrcp.f32 %v2638_v41 }
 0x893   : > { %v2634_v56 = vpop.xlane.xlu1 %2633 }
 0x894   : > { %6150 = vrcp.f32 %v2634_v56 }
 0x895   : > { %v6145_v0 = vpop.eup %6144 }
 0x896   : > { %v2681_v21 = vmul.f32 %v6145_v0, %v7771_v32  ;;  %v3000_v32 = vsel %vm1375_vm0, %v7809_v19, 0 }
 0x897   : > { %v2943_v5 = vpop.permute.xlu1 %2942 }
 0x898   : > { %5001 = vst [vmem:[%s7402_s15 + $0x110] sm:$0xff] %v2681_v21 }
 0x899   : > { %v6147_v28 = vpop.eup %6146 }
 0x89a   : > { %v2679_v44 = vmul.f32 %v6147_v28, %v7774_v55  ;;  %v2997_v55 = vsel %vm1375_vm0, %v7790_v17, 0 }
 0x89c   : > { %4999 = vst [vmem:[%s7402_s15 + $0x100] sm:$0xff] %v2679_v44 }
 0x89d   : > { %v6149_v48 = vpop.eup %6148 }
 0x89e   : > { %v2682_v23 = vmul.f32 %v6149_v48, %v7777_v1  ;;  %v2949_v1 = vpop.permute.xlu0 %2948 }
 0x8a0   : > { %5002 = vst [vmem:[%s7402_s15 + $0x118] sm:$0xff] %v2682_v23  ;;  %v2713_v10 = vpack.c.bf16 %v2682_v23, %v2681_v21 }
 0x8a1   : > { %v6151_v27 = vpop.eup %6150 }
 0x8a2   : > { %v2680_v33 = vmul.f32 %v6151_v27, %v7780_v2  ;;  %v2994_v2 = vsel %vm1375_vm0, %v2949_v1, 0  ;;  %v2945_v50 = vpop.permute.xlu0 %2944 }
 0x8a4   : > { %5000 = vst [vmem:[%s7402_s15 + $0x108] sm:$0xff] %v2680_v33  ;;  %v2712_v35 = vpack.c.bf16 %v2680_v33, %v2679_v44 }
 0x8a6   : > { %5625 = vmatprep.mubr.bf16.mxu0 %v2712_v35 }
 0x8a7   : > { %5626 = vmatmul.mubr.bf16.vlgmr.msra.gmra.mxu0 %v2713_v10 }
 0x8a8   : > { %5642 = vmatpush3.bf16.xpose.msra.mxu0 %v3000_v32 }
 0x8a9   : > { %5762 = vmatprep.subr.msk.bf16.mxu0 %vm1375_vm0, %v7790_v17  ;;  %v2988_v17 = vsel %vm1375_vm0, %v2945_v50, 0 }
 0x8b0   : > { %5644 = vmatpush3.bf16.xpose.msra.mxu0 %v2997_v55 }
 0x8b1   : > { %5763 = vmatprep.subr.msk.bf16.mxu0 %vm1375_vm0, %v2949_v1 }
 0x8b8   : > { %5646 = vmatpush3.bf16.xpose.msra.mxu0 %v2994_v2 }
 0x8b9   : > { %5764 = vmatprep.subr.msk.bf16.mxu0 %vm1375_vm0, %v7795_v43  ;;  %v2985_v43 = vsel %vm1375_vm0, %v2943_v5, 0 }
 0x8c0   : > { %5648 = vmatpush3.bf16.xpose.msra.mxu0 %v2991_v13 }
 0x8c1   : > { %5765 = vmatprep.subr.msk.bf16.mxu0 %vm1375_vm0, %v2945_v50 }
 0x8c4   : > { %v2644_v26 = vpop.xlane.xlu0 %2643 }
 0x8c5   : > { %6152 = vrcp.f32 %v2644_v26 }
 0x8c8   : > { %5650 = vmatpush3.bf16.xpose.msra.mxu0 %v2988_v17  ;;  %v2640_v14 = vpop.xlane.xlu0 %2639  ;;  %v2642_v9 = vpop.xlane.xlu1 %2641 }
 0x8c9   : > { %6154 = vrcp.f32 %v2640_v14  ;;  %5766 = vmatprep.subr.msk.bf16.mxu0 %vm1375_vm0, %v2943_v5 }
 0x8ca   : > { %6156 = vrcp.f32 %v2642_v9 }
 0x8cc   : > { %v2646_v38 = vpop.xlane.xlu0 %2645  ;;  %v2652_v61 = vpop.xlane.xlu1 %2651 }
 0x8cd   : > { %6158 = vrcp.f32 %v2646_v38 }
 0x8ce   : > { %6160 = vrcp.f32 %v2652_v61 }
 0x8d0   : > { %5652 = vmatpush3.bf16.xpose.msra.mxu0 %v2985_v43  ;;  %v2648_v58 = vpop.xlane.xlu1 %2647 }
 0x8d1   : > { %6162 = vrcp.f32 %v2648_v58 }
 0x8d2   : > { %v6153_v11 = vpop.eup %6152 }
 0x8d3   : > { %v2685_v40 = vmul.f32 %v6153_v11, %v7798_v45 }
 0x8d4   : > { %v2660_v19 = vpop.xlane.xlu0 %2659  ;;  %v2654_v49 = vpop.xlane.xlu1 %2653 }
 0x8d5   : > { %6164 = vrcp.f32 %v2660_v19  ;;  %5005 = vst [vmem:[%s7402_s15 + $0x130] sm:$0xff] %v2685_v40 }
 0x8d6   : > { %v6155_v16 = vpop.eup %6154  ;;  %6166 = vrcp.f32 %v2654_v49 }
 0x8d7   : > { %v6157_v59 = vpop.eup %6156  ;;  %v2683_v15 = vmul.f32 %v6155_v16, %v7805_v37 }
 0x8d8   : > { %v2656_v36 = vpop.xlane.xlu0 %2655  ;;  %v2650_v41 = vpop.xlane.xlu1 %2649  ;;  %v2684_v56 = vmul.f32 %v6157_v59, %v7801_v4 }
 0x8d9   : > { %6168 = vrcp.f32 %v2656_v36  ;;  %5003 = vst [vmem:[%s7402_s15 + $0x120] sm:$0xff] %v2683_v15 }
 0x8da   : > { %v6159_v0 = vpop.eup %6158  ;;  %6170 = vrcp.f32 %v2650_v41  ;;  %5004 = vst [vmem:[%s7402_s15 + $0x128] sm:$0xff] %v2684_v56  ;;  %v2714_v45 = vpack.c.bf16 %v2684_v56, %v2683_v15 }
 0x8db   : > { %v6161_v21 = vpop.eup %6160  ;;  %v2686_v28 = vmul.f32 %v6159_v0, %v7811_v63 }
 0x8dc   : > { %5629 = vmatprep.mubr.bf16.mxu0 %v2714_v45  ;;  %v2662_v44 = vpop.xlane.xlu0 %2661  ;;  %v2658_v48 = vpop.xlane.xlu1 %2657  ;;  %v2689_v37 = vmul.f32 %v6161_v21, %v7816_v20 }
 0x8dd   : > { %6172 = vrcp.f32 %v2662_v44  ;;  %5006 = vst [vmem:[%s7402_s15 + $0x138] sm:$0xff] %v2686_v28  ;;  %v2715_v23 = vpack.c.bf16 %v2686_v28, %v2685_v40 }
 0x8de   : > { %v6163_v4 = vpop.eup %6162  ;;  %6174 = vrcp.f32 %v2658_v48  ;;  %5009 = vst [vmem:[%s7402_s15 + $0x150] sm:$0xff] %v2689_v37 }
 0x8df   : > { %5630 = vmatmul.mubr.bf16.gmra.mxu0 %v2715_v23  ;;  %v2687_v27 = vmul.f32 %v6163_v4, %v7820_v62 }
 0x8e0   : > { %v2941_v33 = vpop.permute.xlu0 %2940  ;;  %v2939_v35 = vpop.permute.xlu1 %2938 }
 0x8e1   : > { %5767 = vmatprep.subr.msk.bf16.mxu0 %vm1375_vm0, %v2941_v33  ;;  %v2982_v63 = vsel %vm1375_vm0, %v2941_v33, 0  ;;  %5007 = vst [vmem:[%s7402_s15 + $0x140] sm:$0xff] %v2687_v27  ;;  %v2979_v14 = vsel %vm1375_vm0, %v2939_v35, 0 }
 0x8e2   : > { %v6165_v10 = vpop.eup %6164  ;;  %5654 = vmatpush3.bf16.xpose.msra.mxu0 %v2982_v63 }
 0x8e3   : > { %v6167_v20 = vpop.eup %6166  ;;  %5768 = vmatprep.subr.msk.bf16.mxu0 %vm1375_vm0, %v2939_v35  ;;  %v2693_v32 = vmul.f32 %v6165_v10, %v7825_v34 }
 0x8e4   : > { %v2923_v55 = vpop.permute.xlu0 %2922  ;;  %v2925_v1 = vpop.permute.xlu1 %2924  ;;  %v2690_v62 = vmul.f32 %v6167_v20, %v7823_v12 }
 0x8e5   : > { %5013 = vst [vmem:[%s7402_s15 + $0x170] sm:$0xff] %v2693_v32 }
 0x8e6   : > { %v6169_v2 = vpop.eup %6168  ;;  %5010 = vst [vmem:[%s7402_s15 + $0x158] sm:$0xff] %v2690_v62  ;;  %v2717_v38 = vpack.c.bf16 %v2690_v62, %v2689_v37 }
 0x8e7   : > { %v6171_v13 = vpop.eup %6170  ;;  %v2691_v50 = vmul.f32 %v6169_v2, %v7831_v24 }
 0x8e8   : > { %v2927_v5 = vpop.permute.xlu0 %2926  ;;  %v2929_v26 = vpop.permute.xlu1 %2928  ;;  %v2688_v17 = vmul.f32 %v6171_v13, %v7829_v3 }
 0x8e9   : > { %5011 = vst [vmem:[%s7402_s15 + $0x160] sm:$0xff] %v2691_v50 }
 0x8ea   : > { %v6173_v34 = vpop.eup %6172  ;;  %5656 = vmatpush3.bf16.xpose.msra.mxu0 %v2979_v14  ;;  %5008 = vst [vmem:[%s7402_s15 + $0x148] sm:$0xff] %v2688_v17  ;;  %v2716_v9 = vpack.c.bf16 %v2688_v17, %v2687_v27 }
 0x8eb   : > { %v6175_v12 = vpop.eup %6174  ;;  %v2694_v61 = vmul.f32 %v6173_v34, %v7835_v53 }
 0x8ec   : > { %5633 = vmatprep.mubr.bf16.mxu0 %v2716_v9  ;;  %v2931_v43 = vpop.permute.xlu0 %2930  ;;  %v2933_v24 = vpop.permute.xlu1 %2932  ;;  %v2692_v58 = vmul.f32 %v6175_v12, %v7837_v39 }
 0x8ed   : > { %5634 = vmatmul.mubr.bf16.gmra.mxu0 %v2717_v38  ;;  %5014 = vst [vmem:[%s7402_s15 + $0x178] sm:$0xff] %v2694_v61  ;;  %v2719_v19 = vpack.c.bf16 %v2694_v61, %v2693_v32 }
 0x8ee   : > { %5012 = vst [vmem:[%s7402_s15 + $0x168] sm:$0xff] %v2692_v58  ;;  %v2718_v3 = vpack.c.bf16 %v2692_v58, %v2691_v50 }
 0x8f0   : > { %5637 = vmatprep.mubr.bf16.mxu0 %v2718_v3  ;;  %v2935_v11 = vpop.permute.xlu0 %2934  ;;  %v2937_v40 = vpop.permute.xlu1 %2936 }
 0x8f4   : > { %v3283_v49 = vpop.permute.xlu0 %3282  ;;  %v3281_v16 = vpop.permute.xlu1 %3280 }
 0x8f5   : > { %5638 = vmatmul.mubr.bf16.gmra.mxu0 %v2719_v19  ;;  %5673 = vmatprep.subr.bf16.mxu1 %v3283_v49 }
 0x8f6   : > { %5657 = vmatprep.mubr.msk.bf16.mxu0 %vm1375_vm0, %v2923_v55  ;;  %5674 = vmatpush3.bf16.msra.mxu1 %v3283_v49 }
 0x8f7   : > { %5675 = vmatprep.subr.bf16.mxu1 %v3281_v16 }
 0x8f8   : > { %v3279_v53 = vpop.permute.xlu0 %3278 }
 0x8fa   : > { %5676 = vmatpush3.bf16.msra.mxu1 %v3281_v16 }
 0x8fb   : > { %5677 = vmatprep.subr.bf16.mxu1 %v3279_v53 }
 0x8fc   : > { %v3277_v39 = vpop.permute.xlu0 %3276 }
 0x8fd   : > { %5658 = vmatmul.mubr.msk.bf16.vlgmr.msra.gmra.mxu0 %vm1375_vm0, %v2925_v1 }
 0x8fe   : > { %5661 = vmatprep.mubr.msk.bf16.mxu0 %vm1375_vm0, %v2927_v5  ;;  %5678 = vmatpush3.bf16.msra.mxu1 %v3279_v53 }
 0x8ff   : > { %5679 = vmatprep.subr.bf16.mxu1 %v3277_v39 }
 0x902   : > { %5680 = vmatpush3.bf16.msra.mxu1 %v3277_v39 }
 0x905   : > { %5662 = vmatmul.mubr.msk.bf16.gmra.mxu0 %vm1375_vm0, %v2929_v26 }
 0x906   : > { %5665 = vmatprep.mubr.msk.bf16.mxu0 %vm1375_vm0, %v2931_v43 }
 0x90d   : > { %5666 = vmatmul.mubr.msk.bf16.gmra.mxu0 %vm1375_vm0, %v2933_v24 }
 0x90e   : > { %5669 = vmatprep.mubr.msk.bf16.mxu0 %vm1375_vm0, %v2935_v11 }
 0x915   : > { %5670 = vmatmul.mubr.msk.bf16.gmra.mxu0 %vm1375_vm0, %v2937_v40 }
 0x967   : > { %v7929_v59 = vpop.f32.mrf.mxu0 }
 0x969   : > { %v7931_v15 = vpop.f32.mrf.mxu0 }
 0x96b   : > { %v7933_v36 = vpop.f32.mrf.mxu0 }
 0x96d   : > { %v7935_v41 = vpop.f32.mrf.mxu0 }
 0x99f   : > { %v7937_v56 = vpop.f32.mrf.mxu0 }
 0x9a1   : > { %v7939_v0 = vpop.f32.mrf.mxu0 }
 0x9a3   : > { %v7941_v45 = vpop.f32.mrf.mxu0 }
 0x9a5   : > { %v7943_v21 = vpop.f32.mrf.mxu0 }
 0x9ad   : > { %v7945_v28 = vpop.f32.mrf.mxu0 }
 0x9af   : > { %v7947_v44 = vpop.f32.mrf.mxu0 }
 0x9b1   : > { %v7949_v48 = vpop.f32.mrf.mxu0 }
 0x9b3   : > { %v7951_v37 = vpop.f32.mrf.mxu0 }
 0x9b5   : > { %v7953_v23 = vpop.f32.mrf.mxu0 }
 0x9b7   : > { %v7955_v4 = vpop.f32.mrf.mxu0 }
 0x9b9   : > { %v7957_v27 = vpop.f32.mrf.mxu0 }
 0x9bb   : > { %v7959_v33 = vpop.f32.mrf.mxu0 }
 0x9bd   : > { %v5659_v35 = vpop.f32.mrf.mxu0 }
 0x9be   : > { %3103 = vmax.xlane.f32.xlu0 %v5659_v35 }
 0x9bf   : > { %v3036_v63 = vpop.f32.mrf.mxu0 }
 0x9c1   : > { %v5660_v10 = vpop.f32.mrf.mxu0 }
 0x9c2   : > { %3099 = vmax.xlane.f32.xlu0 %v3036_v63 }
 0x9c3   : > { %v3039_v20 = vpop.f32.mrf.mxu0 }
 0x9c4   : > { %3101 = vmax.xlane.f32.xlu1 %v3039_v20 }
 0x9c5   : > { %v5663_v32 = vpop.f32.mrf.mxu0 }
 0x9c6   : > { %3105 = vmax.xlane.f32.xlu0 %v5660_v10 }
 0x9c7   : > { %v3052_v55 = vpop.f32.mrf.mxu0 }
 0x9c9   : > { %v5664_v1 = vpop.f32.mrf.mxu0 }
 0x9ca   : > { %3111 = vmax.xlane.f32.xlu0 %v5663_v32  ;;  %3113 = vmax.xlane.f32.xlu1 %v5664_v1 }
 0x9cb   : > { %v3055_v62 = vpop.f32.mrf.mxu0 }
 0x9cd   : > { %v7961_v2 = vpop.f32.mrf.mxu0 }
 0x9ce   : > { %3107 = vmax.xlane.f32.xlu0 %v3052_v55  ;;  %3109 = vmax.xlane.f32.xlu1 %v3055_v62 }
 0x9cf   : > { %v7963_v13 = vpop.f32.mrf.mxu0 }
 0x9d1   : > { %v7965_v50 = vpop.f32.mrf.mxu0 }
 0x9d2   : > { %3119 = vmax.xlane.f32.xlu0 %v7961_v2  ;;  %3121 = vmax.xlane.f32.xlu1 %v7965_v50 }
 0x9d3   : > { %v7969_v5 = vpop.f32.mrf.mxu0 }
 0x9d5   : > { %v7973_v26 = vpop.f32.mrf.mxu0 }
 0x9d6   : > { %3115 = vmax.xlane.f32.xlu0 %v7963_v13  ;;  %3117 = vmax.xlane.f32.xlu1 %v7969_v5 }
 0x9d7   : > { %v7976_v17 = vpop.f32.mrf.mxu0 }
 0x9d9   : > { %v7983_v14 = vpop.f32.mrf.mxu0 }
 0x9da   : > { %3127 = vmax.xlane.f32.xlu0 %v7973_v26 }
 0x9db   : > { %v7986_v34 = vpop.f32.mrf.mxu0 }
 0x9de   : > { %3123 = vmax.xlane.f32.xlu0 %v7976_v17 }
 0x9e7   : > { %3272 = vrot.lane.b32.xlu1 %v7232_v18, %s6678_s19 }
 0x9f4   : > { %3274 = vrot.lane.b32.xlu0 %v7224_v25, %s6678_s19 }
 0xa0b   : > { %3129 = vmax.xlane.f32.xlu1 %v7983_v14 }
 0xa0f   : > { %3125 = vmax.xlane.f32.xlu1 %v7986_v34 }
 0xa47   : > { %v3104_v9 = vpop.xlane.xlu0 %3103 }
 0xa48   : > { %v3133_v12 = vsub.f32 %v5659_v35, %v3104_v9 }
 0xa4a   : > { %v3151_v38 = vmul.f32 1.442695, %v3133_v12 }
 0xa4b   : > { %v3100_v61 = vpop.xlane.xlu0 %3099 }
 0xa4c   : > { %6176 = vpow2.f32 %v3151_v38  ;;  %v3131_v43 = vsub.f32 %v3036_v63, %v3100_v61 }
 0xa4d   : > { %v3102_v24 = vpop.xlane.xlu1 %3101 }
 0xa4e   : > { %v3147_v58 = vmul.f32 1.442695, %v3131_v43  ;;  %v3132_v18 = vsub.f32 %v3039_v20, %v3102_v24 }
 0xa4f   : > { %v3106_v3 = vpop.xlane.xlu0 %3105 }
 0xa50   : > { %6178 = vpow2.f32 %v3147_v58  ;;  %v3134_v25 = vsub.f32 %v5660_v10, %v3106_v3  ;;  %v3149_v40 = vmul.f32 1.442695, %v3132_v18 }
 0xa52   : > { %v3153_v11 = vmul.f32 1.442695, %v3134_v25 }
 0xa53   : > { %v3112_v19 = vpop.xlane.xlu0 %3111  ;;  %v3114_v49 = vpop.xlane.xlu1 %3113 }
 0xa54   : > { %6180 = vpow2.f32 %v3153_v11  ;;  %v3137_v16 = vsub.f32 %v5663_v32, %v3112_v19  ;;  %v3138_v53 = vsub.f32 %v5664_v1, %v3114_v49 }
 0xa55   : > { %6182 = vpow2.f32 %v3149_v40 }
 0xa56   : > { %v3159_v39 = vmul.f32 1.442695, %v3137_v16  ;;  %v3161_v35 = vmul.f32 1.442695, %v3138_v53 }
 0xa57   : > { %v3108_v9 = vpop.xlane.xlu0 %3107  ;;  %v3110_v12 = vpop.xlane.xlu1 %3109 }
 0xa58   : > { %6184 = vpow2.f32 %v3159_v39  ;;  %v3135_v63 = vsub.f32 %v3052_v55, %v3108_v9  ;;  %v3136_v38 = vsub.f32 %v3055_v62, %v3110_v12 }
 0xa59   : > { %v7989_v61 = vpop.eup %6176  ;;  %6186 = vpow2.f32 %v3161_v35 }
 0xa5a   : > { %v3155_v20 = vmul.f32 1.442695, %v3135_v63  ;;  %3183 = vadd.xlane.f32.xlu1 %v7989_v61  ;;  %v3157_v43 = vmul.f32 1.442695, %v3136_v38 }
 0xa5b   : > { %v3120_v10 = vpop.xlane.xlu0 %3119  ;;  %v3122_v58 = vpop.xlane.xlu1 %3121 }
 0xa5c   : > { %6188 = vpow2.f32 %v3155_v20  ;;  %v3142_v39 = vsub.f32 %v7965_v50, %v3122_v58  ;;  %v3141_v63 = vsub.f32 %v7961_v2, %v3120_v10 }
 0xa5d   : > { %v7992_v24 = vpop.eup %6178  ;;  %6190 = vpow2.f32 %v3157_v43 }
 0xa5e   : > { %3179 = vadd.xlane.f32.xlu1 %v7992_v24  ;;  %v3169_v12 = vmul.f32 1.442695, %v3142_v39 }
 0xa5f   : > { %v3116_v32 = vpop.xlane.xlu0 %3115  ;;  %v3118_v3 = vpop.xlane.xlu1 %3117 }
 0xa60   : > { %v3139_v53 = vsub.f32 %v7963_v13, %v3116_v32  ;;  %v3140_v9 = vsub.f32 %v7969_v5, %v3118_v3 }
 0xa61   : > { %v7995_v1 = vpop.eup %6180 }
 0xa62   : > { %3185 = vadd.xlane.f32.xlu1 %v7995_v1  ;;  %v7998_v62 = vpop.eup %6182  ;;  %v3163_v35 = vmul.f32 1.442695, %v3139_v53  ;;  %v3165_v38 = vmul.f32 1.442695, %v3140_v9 }
 0xa63   : > { %v3128_v55 = vpop.xlane.xlu0 %3127  ;;  %v3273_v16 = vpop.permute.xlu1 %3272 }
 0xa64   : > { %6192 = vpow2.f32 %v3163_v35 }
 0xa65   : > { %v8000_v18 = vpop.eup %6184  ;;  %6194 = vpow2.f32 %v3169_v12 }
 0xa66   : > { %3191 = vadd.xlane.f32.xlu0 %v8000_v18  ;;  %3181 = vadd.xlane.f32.xlu1 %v7998_v62  ;;  %v8004_v11 = vpop.eup %6186  ;;  %6196 = vpow2.f32 %v3165_v38 }
 0xa67   : > { %v3124_v25 = vpop.xlane.xlu0 %3123 }
 0xa68   : > { %v3143_v20 = vsub.f32 %v7976_v17, %v3124_v25 }
 0xa69   : > { %v8006_v40 = vpop.eup %6188 }
 0xa6a   : > { %3187 = vadd.xlane.f32.xlu1 %v8006_v40  ;;  %3193 = vadd.xlane.f32.xlu0 %v8004_v11  ;;  %v8010_v49 = vpop.eup %6190 }
 0xa6b   : > { %v3275_v19 = vpop.permute.xlu0 %3274 }
 0xa6c   : > { %5681 = vmatprep.subr.bf16.mxu1 %v3275_v19 }
 0xa6d   : > { %5682 = vmatpush3.bf16.msra.mxu1 %v3275_v19  ;;  %v3171_v19 = vmul.f32 1.442695, %v3143_v20 }
 0xa6e   : > { %3189 = vadd.xlane.f32.xlu0 %v8010_v49  ;;  %5683 = vmatprep.subr.bf16.mxu1 %v3273_v16 }
 0xa71   : > { %5684 = vmatpush3.bf16.msra.mxu1 %v3273_v16  ;;  %v8025_v10 = vpop.eup %6192 }
 0xa72   : > { %v8028_v17 = vpop.eup %6194 }
 0xa7b   : > { %3268 = vrot.lane.b32.xlu1 %v7246_v42, %s6678_s19  ;;  %v3167_v42 = vmul.f32 1.442695, %v3141_v63 }
 0xa7d   : > { %6198 = vpow2.f32 %v3167_v42 }
 0xa7e   : > { %6200 = vpow2.f32 %v3171_v19 }
 0xa84   : > { %3270 = vrot.lane.b32.xlu0 %v7237_v52, %s6678_s19  ;;  %v3145_v52 = vsub.f32 %v7973_v26, %v3128_v55  ;;  %v8030_v26 = vpop.eup %6196 }
 0xa86   : > { %v3175_v58 = vmul.f32 1.442695, %v3145_v52 }
 0xa94   : > { %v3130_v43 = vpop.xlane.xlu1 %3129 }
 0xa95   : > { %v3146_v50 = vsub.f32 %v7983_v14, %v3130_v43  ;;  %v8034_v14 = vpop.eup %6198 }
 0xa97   : > { %v3177_v2 = vmul.f32 1.442695, %v3146_v50 }
 0xa98   : > { %v3126_v13 = vpop.xlane.xlu1 %3125 }
 0xa99   : > { %v3144_v5 = vsub.f32 %v7986_v34, %v3126_v13  ;;  %v8037_v34 = vpop.eup %6200 }
 0xa9b   : > { %v3173_v32 = vmul.f32 1.442695, %v3144_v5 }
 0xa9d   : > { %6202 = vpow2.f32 %v3173_v32 }
 0xa9e   : > { %6204 = vpow2.f32 %v3175_v58 }
 0xa9f   : > { %3195 = vadd.xlane.f32.xlu1 %v8025_v10  ;;  %6206 = vpow2.f32 %v3177_v2 }
 0xaa3   : > { %3201 = vadd.xlane.f32.xlu1 %v8028_v17  ;;  %3197 = vadd.xlane.f32.xlu0 %v8030_v26 }
 0xaa7   : > { %3199 = vadd.xlane.f32.xlu0 %v8034_v14 }
 0xaaa   : > { %v8039_v55 = vpop.eup %6202 }
 0xaab   : > { %3203 = vadd.xlane.f32.xlu0 %v8037_v34  ;;  %3205 = vadd.xlane.f32.xlu1 %v8039_v55  ;;  %v8043_v3 = vpop.eup %6204 }
 0xaac   : > { %v8045_v25 = vpop.eup %6206 }
 0xaaf   : > { %3207 = vadd.xlane.f32.xlu0 %v8043_v3  ;;  %3209 = vadd.xlane.f32.xlu1 %v8045_v25 }
 0xac0   : > { %2311 = vrot.lane.b32.xlu1 %v7697_v46, %s6678_s19 }
 0xac4   : > { %2313 = vrot.lane.b32.xlu1 %v7691_v6, %s6678_s19 }
 0xac5   : > { %2309 = vrot.lane.b32.xlu0 %v7693_v54, %s6678_s19 }
 0xac8   : > { %2315 = vrot.lane.b32.xlu1 %v7695_v29, %s6678_s19 }
 0xac9   : > { %2857 = vrot.lane.b32.xlu0 %v7931_v15, %s6677_s8 }
 0xacc   : > { %2859 = vrot.lane.b32.xlu1 %v7935_v41, %s6677_s8 }
 0xacd   : > { %2861 = vrot.lane.b32.xlu0 %v7929_v59, %s6677_s8 }
 0xad0   : > { %2863 = vrot.lane.b32.xlu1 %v7933_v36, %s6677_s8 }
 0xad1   : > { %2317 = vrot.lane.b32.xlu0 %v7701_v47, %s6678_s19 }
 0xad4   : > { %2319 = vrot.lane.b32.xlu1 %v7705_v7, %s6678_s19 }
 0xad5   : > { %2321 = vrot.lane.b32.xlu0 %v7699_v57, %s6678_s19 }
 0xad8   : > { %2323 = vrot.lane.b32.xlu1 %v7703_v30, %s6678_s19 }
 0xad9   : > { %2865 = vrot.lane.b32.xlu0 %v7939_v0, %s6677_s8 }
 0xadc   : > { %2867 = vrot.lane.b32.xlu1 %v7943_v21, %s6677_s8 }
 0xadd   : > { %2869 = vrot.lane.b32.xlu0 %v7937_v56, %s6677_s8 }
 0xae0   : > { %2871 = vrot.lane.b32.xlu1 %v7941_v45, %s6677_s8 }
 0xae1   : > { %2325 = vrot.lane.b32.xlu0 %v7709_v51, %s6678_s19 }
 0xae3   : > { %v3184_v6 = vpop.xlane.xlu1 %3183 }
 0xae4   : > { %6208 = vrcp.f32 %v3184_v6  ;;  %2327 = vrot.lane.b32.xlu1 %v7713_v31, %s6678_s19 }
 0xae7   : > { %v3180_v54 = vpop.xlane.xlu1 %3179 }
 0xae8   : > { %6210 = vrcp.f32 %v3180_v54 }
 0xaeb   : > { %v3186_v29 = vpop.xlane.xlu1 %3185 }
 0xaec   : > { %6212 = vrcp.f32 %v3186_v29 }
 0xaef   : > { %v3192_v46 = vpop.xlane.xlu0 %3191  ;;  %v3182_v57 = vpop.xlane.xlu1 %3181 }
 0xaf0   : > { %6214 = vrcp.f32 %v3192_v46 }
 0xaf1   : > { %v6209_v47 = vpop.eup %6208  ;;  %6216 = vrcp.f32 %v3182_v57 }
 0xaf2   : > { %v3229_v30 = vmul.f32 %v6209_v47, %v7989_v61 }
 0xaf3   : > { %v3194_v7 = vpop.xlane.xlu0 %3193  ;;  %v3188_v51 = vpop.xlane.xlu1 %3187 }
 0xaf4   : > { %6218 = vrcp.f32 %v3194_v7  ;;  %5025 = vst [vmem:[%s7402_s15 + $0x190] sm:$0xff] %v3229_v30 }
 0xaf5   : > { %v6211_v59 = vpop.eup %6210  ;;  %6220 = vrcp.f32 %v3188_v51 }
 0xaf6   : > { %v3227_v31 = vmul.f32 %v6211_v59, %v7992_v24 }
 0xaf7   : > { %v3190_v15 = vpop.xlane.xlu0 %3189  ;;  %v3269_v45 = vpop.permute.xlu1 %3268 }
 0xaf8   : > { %6222 = vrcp.f32 %v3190_v15  ;;  %5023 = vst [vmem:[%s7402_s15 + $0x180] sm:$0xff] %v3227_v31 }
 0xaf9   : > { %v6213_v36 = vpop.eup %6212 }
 0xafa   : > { %v3230_v41 = vmul.f32 %v6213_v36, %v7995_v1 }
 0xafb   : > { %v3271_v56 = vpop.permute.xlu0 %3270 }
 0xafc   : > { %5685 = vmatprep.subr.bf16.mxu1 %v3271_v56  ;;  %5026 = vst [vmem:[%s7402_s15 + $0x198] sm:$0xff] %v3230_v41  ;;  %v3261_v39 = vpack.c.bf16 %v3230_v41, %v3229_v30 }
 0xafd   : > { %v6215_v0 = vpop.eup %6214  ;;  %5686 = vmatpush3.bf16.msra.mxu1 %v3271_v56 }
 0xafe   : > { %v6217_v21 = vpop.eup %6216  ;;  %5687 = vmatprep.subr.bf16.mxu1 %v3269_v45  ;;  %v3233_v61 = vmul.f32 %v6215_v0, %v8000_v18 }
 0xaff   : > { %v3228_v24 = vmul.f32 %v6217_v21, %v7998_v62 }
 0xb00   : > { %5029 = vst [vmem:[%s7402_s15 + $0x1b0] sm:$0xff] %v3233_v61 }
 0xb01   : > { %v6219_v16 = vpop.eup %6218  ;;  %5688 = vmatpush3.bf16.msra.mxu1 %v3269_v45  ;;  %5024 = vst [vmem:[%s7402_s15 + $0x188] sm:$0xff] %v3228_v24  ;;  %v3260_v1 = vpack.c.bf16 %v3228_v24, %v3227_v31 }
 0xb02   : > { %v6221_v53 = vpop.eup %6220  ;;  %v3234_v35 = vmul.f32 %v6219_v16, %v8004_v11 }
 0xb03   : > { %5689 = vmatprep.mubr.bf16.mxu1 %v3260_v1  ;;  %v3231_v9 = vmul.f32 %v6221_v53, %v8006_v40 }
 0xb04   : > { %5690 = vmatmul.mubr.bf16.vlgmr.msra.gmra.mxu1 %v3261_v39  ;;  %5030 = vst [vmem:[%s7402_s15 + $0x1b8] sm:$0xff] %v3234_v35  ;;  %v3263_v63 = vpack.c.bf16 %v3234_v35, %v3233_v61  ;;  %v5936_v39 = vld [vmem:[#allocation12 + $0x38] sm:$0xff]   ;;  %v5937_v35 = vld [vmem:[#allocation12 + $0x30] sm:$0xff]  }
 0xb05   : > { %v6223_v12 = vpop.eup %6222  ;;  %5027 = vst [vmem:[%s7402_s15 + $0x1a0] sm:$0xff] %v3231_v9  ;;  %5705 = vmatprep.subr.bf16.mxu1 %v5936_v39 }
 0xb06   : > { %v3232_v18 = vmul.f32 %v6223_v12, %v8010_v49  ;;  %5706 = vmatpush3.bf16.msra.mxu1 %v5936_v39  ;;  %v5939_v12 = vld [vmem:[#allocation12 + $0x20] sm:$0xff]  }
 0xb07   : > { %5707 = vmatprep.subr.bf16.mxu1 %v5937_v35 }
 0xb08   : > { %5028 = vst [vmem:[%s7402_s15 + $0x1a8] sm:$0xff] %v3232_v18  ;;  %v3262_v62 = vpack.c.bf16 %v3232_v18, %v3231_v9  ;;  %v5938_v9 = vld [vmem:[#allocation12 + $0x28] sm:$0xff]   ;;  %v5940_v18 = vld [vmem:[#allocation12 + $0x18] sm:$0xff]  }
 0xb0a   : > { %5693 = vmatprep.mubr.bf16.mxu1 %v3262_v62  ;;  %5708 = vmatpush3.bf16.msra.mxu1 %v5937_v35  ;;  %v5941_v62 = vld [vmem:[#allocation12 + $0x10] sm:$0xff]  }
 0xb0b   : > { %5709 = vmatprep.subr.bf16.mxu1 %v5938_v9 }
 0xb0c   : > { %5694 = vmatmul.mubr.bf16.gmra.mxu1 %v3263_v63  ;;  %v5942_v63 = vld [vmem:[#allocation12 + $0x8] sm:$0xff]  }
 0xb0e   : > { %5710 = vmatpush3.bf16.msra.mxu1 %v5938_v9 }
 0xb0f   : > { %5711 = vmatprep.subr.bf16.mxu1 %v5939_v12 }
 0xb12   : > { %5712 = vmatpush3.bf16.msra.mxu1 %v5939_v12 }
 0xb13   : > { %5713 = vmatprep.subr.bf16.mxu1 %v5940_v18 }
 0xb16   : > { %5714 = vmatpush3.bf16.msra.mxu1 %v5940_v18 }
 0xb17   : > { %5715 = vmatprep.subr.bf16.mxu1 %v5941_v62 }
 0xb1a   : > { %5716 = vmatpush3.bf16.msra.mxu1 %v5941_v62 }
 0xb1b   : > { %5717 = vmatprep.subr.bf16.mxu1 %v5942_v63 }
 0xb1e   : > { %5718 = vmatpush3.bf16.msra.mxu1 %v5942_v63 }
 0xb28   : > { %v3196_v38 = vpop.xlane.xlu1 %3195 }
 0xb29   : > { %6224 = vrcp.f32 %v3196_v38 }
 0xb2c   : > { %v3198_v20 = vpop.xlane.xlu0 %3197  ;;  %v3202_v43 = vpop.xlane.xlu1 %3201 }
 0xb2d   : > { %6226 = vrcp.f32 %v3198_v20  ;;  %v5943_v20 = vld [vmem:[#allocation12] sm:$0xff]  }
 0xb2e   : > { %6228 = vrcp.f32 %v3202_v43  ;;  %5719 = vmatprep.subr.bf16.mxu1 %v5943_v20 }
 0xb2f   : > { %5720 = vmatpush3.bf16.msra.mxu1 %v5943_v20 }
 0xb30   : > { %v3200_v11 = vpop.xlane.xlu0 %3199 }
 0xb31   : > { %6230 = vrcp.f32 %v3200_v11 }
 0xb34   : > { %v3204_v40 = vpop.xlane.xlu0 %3203  ;;  %v3206_v42 = vpop.xlane.xlu1 %3205 }
 0xb35   : > { %6232 = vrcp.f32 %v3204_v40 }
 0xb36   : > { %v6225_v52 = vpop.eup %6224  ;;  %6234 = vrcp.f32 %v3206_v42 }
 0xb37   : > { %v3235_v49 = vmul.f32 %v6225_v52, %v8025_v10 }
 0xb38   : > { %v3208_v19 = vpop.xlane.xlu0 %3207  ;;  %v3210_v13 = vpop.xlane.xlu1 %3209 }
 0xb39   : > { %6236 = vrcp.f32 %v3208_v19  ;;  %5031 = vst [vmem:[%s7402_s15 + $0x1c0] sm:$0xff] %v3235_v49 }
 0xb3a   : > { %v6227_v50 = vpop.eup %6226  ;;  %6238 = vrcp.f32 %v3210_v13  ;;  %v8930_v13 = vld [vmem:[#allocation32_spill] sm:$0xff] }
 0xb3b   : > { %v6229_v5 = vpop.eup %6228  ;;  %v3236_v32 = vmul.f32 %v6227_v50, %v8030_v26 }
 0xb3c   : > { %v2310_v58 = vpop.permute.xlu0 %2309  ;;  %v2312_v2 = vpop.permute.xlu1 %2311  ;;  %v3238_v6 = vmul.f32 %v6229_v5, %v8028_v17 }
 0xb3d   : > { %2358 = vst.msk [vmem:[#allocation2] sm:$0xff] %vm2357_vm1, %v2310_v58  ;;  %2359 = vst.msk [vmem:[#allocation2 + $0x8] sm:$0xff] %vm2357_vm1, %v2312_v2  ;;  %v3264_v10 = vpack.c.bf16 %v3236_v32, %v3235_v49 }
 0xb3e   : > { %5032 = vst [vmem:[%s7402_s15 + $0x1c8] sm:$0xff] %v3236_v32  ;;  %v6231_v54 = vpop.eup %6230  ;;  %5034 = vst [vmem:[%s7402_s15 + $0x1d8] sm:$0xff] %v3238_v6 }
 0xb3f   : > { %5697 = vmatprep.mubr.bf16.mxu1 %v3264_v10  ;;  %v3237_v29 = vmul.f32 %v6231_v54, %v8034_v14 }
 0xb40   : > { %v2858_v46 = vpop.permute.xlu0 %2857  ;;  %v2314_v26 = vpop.permute.xlu1 %2313 }
 0xb41   : > { %2906 = vst.msk [vmem:[#allocation2] sm:$0xff] %vm2905_vm2, %v2858_v46  ;;  %5033 = vst [vmem:[%s7402_s15 + $0x1d0] sm:$0xff] %v3237_v29  ;;  %v3265_v17 = vpack.c.bf16 %v3238_v6, %v3237_v29 }
 0xb42   : > { %2360 = vst.msk [vmem:[#allocation2 + $0x10] sm:$0xff] %vm2357_vm1, %v2314_v26  ;;  %v6233_v57 = vpop.eup %6232 }
 0xb43   : > { %v6235_v47 = vpop.eup %6234  ;;  %5698 = vmatmul.mubr.bf16.gmra.mxu1 %v3265_v17  ;;  %v3239_v30 = vmul.f32 %v6233_v57, %v8037_v34 }
 0xb44   : > { %v2862_v7 = vpop.permute.xlu0 %2861  ;;  %v2316_v51 = vpop.permute.xlu1 %2315  ;;  %v3240_v14 = vmul.f32 %v6235_v47, %v8039_v55 }
 0xb45   : > { %2908 = vst.msk [vmem:[#allocation2 + $0x10] sm:$0xff] %vm2905_vm2, %v2862_v7  ;;  %5035 = vst [vmem:[%s7402_s15 + $0x1e0] sm:$0xff] %v3239_v30 }
 0xb46   : > { %2361 = vst.msk [vmem:[#allocation2 + $0x18] sm:$0xff] %vm2357_vm1, %v2316_v51  ;;  %v6237_v59 = vpop.eup %6236  ;;  %5036 = vst [vmem:[%s7402_s15 + $0x1e8] sm:$0xff] %v3240_v14  ;;  %v3266_v31 = vpack.c.bf16 %v3240_v14, %v3239_v30 }
 0xb47   : > { %v6239_v15 = vpop.eup %6238  ;;  %v3241_v36 = vmul.f32 %v6237_v59, %v8043_v3 }
 0xb48   : > { %5701 = vmatprep.mubr.bf16.mxu1 %v3266_v31  ;;  %v2318_v41 = vpop.permute.xlu0 %2317  ;;  %v2860_v34 = vpop.permute.xlu1 %2859  ;;  %v3242_v56 = vmul.f32 %v6239_v15, %v8045_v25 }
 0xb49   : > { %2362 = vst.msk [vmem:[#allocation2 + $0x20] sm:$0xff] %vm2357_vm1, %v2318_v41  ;;  %5037 = vst [vmem:[%s7402_s15 + $0x1f0] sm:$0xff] %v3241_v36 }
 0xb4a   : > { %2907 = vst.msk [vmem:[#allocation2 + $0x8] sm:$0xff] %vm2905_vm2, %v2860_v34  ;;  %5038 = vst [vmem:[%s7402_s15 + $0x1f8] sm:$0xff] %v3242_v56  ;;  %v3267_v55 = vpack.c.bf16 %v3242_v56, %v3241_v36  ;;  %s6538_s15 = scalar_lea.vmem %s6537_s28, 16384 }
 0xb4b   : > { %p6540_p2 = scmp.lt.s32.totalorder %s6538_s15, %s6532_s29 }
 0xb4c   : > { %5702 = vmatmul.mubr.bf16.gmra.mxu1 %v3267_v55  ;;  %v2322_v0 = vpop.permute.xlu0 %2321  ;;  %v2864_v45 = vpop.permute.xlu1 %2863 }
 0xb4d   : > { %2364 = vst.msk [vmem:[#allocation2 + $0x30] sm:$0xff] %vm2357_vm1, %v2322_v0  ;;  %p6541_p9 = por %p6540_p2, %p6539_p13 }
 0xb4e   : > { %2909 = vst.msk [vmem:[#allocation2 + $0x18] sm:$0xff] %vm2905_vm2, %v2864_v45 }
 0xb4f   : > { %p6542_p6 = pnand %p6541_p9, %p6535_p10 }
 0xb50   : > { %v2866_v3 = vpop.permute.xlu0 %2865  ;;  %v2320_v21 = vpop.permute.xlu1 %2319 }
 0xb51   : > { %2910 = vst.msk [vmem:[#allocation2 + $0x20] sm:$0xff] %vm2905_vm2, %v2866_v3 }
 0xb52   : > { %2363 = vst.msk [vmem:[#allocation2 + $0x28] sm:$0xff] %vm2357_vm1, %v2320_v21 }
 0xb54   : > { %v2870_v25 = vpop.permute.xlu0 %2869  ;;  %v2324_v61 = vpop.permute.xlu1 %2323 }
 0xb55   : > { %2912 = vst.msk [vmem:[#allocation2 + $0x30] sm:$0xff] %vm2905_vm2, %v2870_v25 }
 0xb56   : > { %2365 = vst.msk [vmem:[#allocation2 + $0x38] sm:$0xff] %vm2357_vm1, %v2324_v61 }
 0xb58   : > { %v2326_v24 = vpop.permute.xlu0 %2325  ;;  %v2868_v16 = vpop.permute.xlu1 %2867 }
 0xb59   : > { %2366 = vst.msk [vmem:[#allocation2 + $0x40] sm:$0xff] %vm2357_vm1, %v2326_v24 }
 0xb5a   : > { %2911 = vst.msk [vmem:[#allocation2 + $0x28] sm:$0xff] %vm2905_vm2, %v2868_v16 }
 0xb5c   : > { %v2872_v1 = vpop.permute.xlu1 %2871 }
 0xb5d   : > { %2913 = vst.msk [vmem:[#allocation2 + $0x38] sm:$0xff] %vm2905_vm2, %v2872_v1 }
 0xb60   : > { %v2328_v53 = vpop.permute.xlu1 %2327 }
 0xb61   : > { %2367 = vst.msk [vmem:[#allocation2 + $0x48] sm:$0xff] %vm2357_vm1, %v2328_v53 }
 0xbc4   : > { %v5691_v38 = vpop.f32.mrf.mxu1 }
 0xbc5   : > { %3409 = vrot.lane.b32.xlu0 %v5691_v38, %s6676_s27 }
 0xbc6   : > { %v3326_v43 = vpop.f32.mrf.mxu1 }
 0xbc8   : > { %v5692_v11 = vpop.f32.mrf.mxu1 }
 0xbc9   : > { %3405 = vrot.lane.b32.xlu0 %v3326_v43, %s6676_s27  ;;  %3411 = vrot.lane.b32.xlu1 %v5692_v11, %s6676_s27 }
 0xbca   : > { %v3329_v40 = vpop.f32.mrf.mxu1 }
 0xbcc   : > { %v5695_v42 = vpop.f32.mrf.mxu1 }
 0xbcd   : > { %2329 = vrot.lane.b32.xlu0 %v7707_v22, %s6678_s19  ;;  %3407 = vrot.lane.b32.xlu1 %v3329_v40, %s6676_s27 }
 0xbce   : > { %v3342_v52 = vpop.f32.mrf.mxu1 }
 0xbd0   : > { %v5696_v49 = vpop.f32.mrf.mxu1 }
 0xbd1   : > { %2873 = vrot.lane.b32.xlu0 %v7947_v44, %s6677_s8  ;;  %2331 = vrot.lane.b32.xlu1 %v7711_v60, %s6678_s19  ;;  %v8929_v60 = vld [vmem:[#allocation34_spill] sm:$0xff] }
 0xbd2   : > { %v3345_v22 = vpop.f32.mrf.mxu1 }
 0xbd5   : > { %2875 = vrot.lane.b32.xlu1 %v7951_v37, %s6677_s8  ;;  %3417 = vrot.lane.b32.xlu0 %v5695_v42, %s6676_s27 }
 0xbd9   : > { %3413 = vrot.lane.b32.xlu0 %v3342_v52, %s6676_s27  ;;  %3419 = vrot.lane.b32.xlu1 %v5696_v49, %s6676_s27 }
 0xbdd   : > { %2877 = vrot.lane.b32.xlu0 %v7945_v28, %s6677_s8  ;;  %3415 = vrot.lane.b32.xlu1 %v3345_v22, %s6676_s27 }
 0xbe1   : > { %2333 = vrot.lane.b32.xlu0 %v7717_v8, %s6678_s19  ;;  %2879 = vrot.lane.b32.xlu1 %v7949_v48, %s6677_s8  ;;  %v8931_v48 = vld [vmem:[#allocation33_spill] sm:$0xff] }
 0xbe5   : > { %2335 = vrot.lane.b32.xlu1 %v8929_v60, %s6678_s19 }
 0xc03   : > { %v5699_v44 = vpop.f32.mrf.mxu1 }
 0xc04   : > { %3425 = vrot.lane.b32.xlu0 %v5699_v44, %s6676_s27 }
 0xc05   : > { %v3358_v37 = vpop.f32.mrf.mxu1 }
 0xc07   : > { %v5700_v19 = vpop.f32.mrf.mxu1 }
 0xc08   : > { %3421 = vrot.lane.b32.xlu0 %v3358_v37, %s6676_s27  ;;  %3427 = vrot.lane.b32.xlu1 %v5700_v19, %s6676_s27  ;;  %v8212_v37 = vld [vmem:[%s8869_s9] ss:$0 sm:$0xff] }
 0xc09   : > { %v3361_v28 = vpop.f32.mrf.mxu1 }
 0xc0c   : > { %2337 = vrot.lane.b32.xlu0 %v8930_v13, %s6678_s19  ;;  %3423 = vrot.lane.b32.xlu1 %v3361_v28, %s6676_s27  ;;  %v5703_v8 = vpop.f32.mrf.mxu1 }
 0xc0e   : > { %v3374_v50 = vpop.f32.mrf.mxu1 }
 0xc10   : > { %2881 = vrot.lane.b32.xlu0 %v7955_v4, %s6677_s8  ;;  %2339 = vrot.lane.b32.xlu1 %v8931_v48, %s6678_s19  ;;  %v5704_v5 = vpop.f32.mrf.mxu1  ;;  %v6304_v48 = vld [vmem:[%s6980_s26] sm:$0xff] }
 0xc12   : > { %v3377_v32 = vpop.f32.mrf.mxu1 }
 0xc14   : > { %2885 = vrot.lane.b32.xlu0 %v7953_v23, %s6677_s8  ;;  %2883 = vrot.lane.b32.xlu1 %v7959_v33, %s6677_s8 }
 0xc18   : > { %2887 = vrot.lane.b32.xlu1 %v7957_v27, %s6677_s8  ;;  %3429 = vrot.lane.b32.xlu0 %v3374_v50, %s6676_s27 }
 0xc1c   : > { %3433 = vrot.lane.b32.xlu0 %v5703_v8, %s6676_s27  ;;  %3431 = vrot.lane.b32.xlu1 %v3377_v32, %s6676_s27 }
 0xc20   : > { %3435 = vrot.lane.b32.xlu1 %v5704_v5, %s6676_s27  ;;  %s8932_s27 = sld [smem:[#allocation44_spill]] }
 0xc37   : > { %v3410_v4 = vpop.permute.xlu0 %3409 }
 0xc38   : > { %3456 = vst.msk [vmem:[#allocation2 + $0x10] sm:$0xff] %vm3453_vm3, %v3410_v4  ;;  %v6305_v4 = vld [vmem:[%s6980_s26 + $0x10] sm:$0xff] }
 0xc3b   : > { %v3406_v23 = vpop.permute.xlu0 %3405  ;;  %v3412_v58 = vpop.permute.xlu1 %3411 }
 0xc3c   : > { %3454 = vst.msk [vmem:[#allocation2] sm:$0xff] %vm3453_vm3, %v3406_v23  ;;  %3457 = vst.msk [vmem:[#allocation2 + $0x18] sm:$0xff] %vm3453_vm3, %v3412_v58 }
 0xc3f   : > { %v2330_v27 = vpop.permute.xlu0 %2329  ;;  %v3408_v33 = vpop.permute.xlu1 %3407  ;;  %v3472_v57 = vld [vmem:[#allocation2 + $0x10] sm:$0xff] }
 0xc40   : > { %2368 = vst.msk [vmem:[#allocation2 + $0x50] sm:$0xff] %vm2357_vm1, %v2330_v27  ;;  %v6306_v27 = vld [vmem:[%s6980_s26 + $0x8] sm:$0xff] }
 0xc41   : > { %3455 = vst.msk [vmem:[#allocation2 + $0x8] sm:$0xff] %vm3453_vm3, %v3408_v33 }
 0xc43   : > { %v2874_v2 = vpop.permute.xlu0 %2873  ;;  %v2332_v6 = vpop.permute.xlu1 %2331  ;;  %v3473_v10 = vld [vmem:[#allocation2 + $0x18] sm:$0xff]  ;;  %v3470_v46 = vld [vmem:[#allocation2] sm:$0xff] }
 0xc44   : > { %2914 = vst.msk [vmem:[#allocation2 + $0x40] sm:$0xff] %vm2905_vm2, %v2874_v2  ;;  %v3487_v47 = vpack.c.bf16 %v3473_v10, %v3472_v57  ;;  %v6307_v2 = vld [vmem:[%s6980_s26 + $0x18] sm:$0xff] }
 0xc45   : > { %2369 = vst.msk [vmem:[#allocation2 + $0x58] sm:$0xff] %vm2357_vm1, %v2332_v6 }
 0xc47   : > { %v3418_v54 = vpop.permute.xlu0 %3417  ;;  %v2876_v29 = vpop.permute.xlu1 %2875 }
 0xc48   : > { %v3471_v26 = vld [vmem:[#allocation2 + $0x8] sm:$0xff]  ;;  %3460 = vst.msk [vmem:[#allocation2 + $0x30] sm:$0xff] %vm3453_vm3, %v3418_v54 }
 0xc49   : > { %2915 = vst.msk [vmem:[#allocation2 + $0x48] sm:$0xff] %vm2905_vm2, %v2876_v29  ;;  %v3486_v17 = vpack.c.bf16 %v3471_v26, %v3470_v46 }
 0xc4b   : > { %5721 = vmatprep.mubr.bf16.mxu1 %v3486_v17  ;;  %v3414_v30 = vpop.permute.xlu0 %3413  ;;  %v3420_v7 = vpop.permute.xlu1 %3419  ;;  %v6308_v17 = vld [vmem:[%s6980_s26 + $0x20] sm:$0xff] }
 0xc4c   : > { %5722 = vmatmul.mubr.bf16.vlgmr.msra.gmra.mxu1 %v3487_v47  ;;  %3458 = vst.msk [vmem:[#allocation2 + $0x20] sm:$0xff] %vm3453_vm3, %v3414_v30  ;;  %3461 = vst.msk [vmem:[#allocation2 + $0x38] sm:$0xff] %vm3453_vm3, %v3420_v7  ;;  %v6309_v7 = vld [vmem:[%s6980_s26 + $0x30] sm:$0xff] }
 0xc4f   : > { %v2878_v51 = vpop.permute.xlu0 %2877  ;;  %v3416_v14 = vpop.permute.xlu1 %3415  ;;  %v3476_v55 = vld [vmem:[#allocation2 + $0x30] sm:$0xff] }
 0xc50   : > { %2916 = vst.msk [vmem:[#allocation2 + $0x50] sm:$0xff] %vm2905_vm2, %v2878_v51 }
 0xc51   : > { %3459 = vst.msk [vmem:[#allocation2 + $0x28] sm:$0xff] %vm3453_vm3, %v3416_v14 }
 0xc53   : > { %v2334_v59 = vpop.permute.xlu0 %2333  ;;  %v2880_v31 = vpop.permute.xlu1 %2879  ;;  %v3477_v15 = vld [vmem:[#allocation2 + $0x38] sm:$0xff]  ;;  %v3474_v41 = vld [vmem:[#allocation2 + $0x20] sm:$0xff] }
 0xc54   : > { %2370 = vst.msk [vmem:[#allocation2 + $0x60] sm:$0xff] %vm2357_vm1, %v2334_v59  ;;  %v3489_v0 = vpack.c.bf16 %v3477_v15, %v3476_v55  ;;  %v6310_v59 = vld [vmem:[%s6980_s26 + $0x28] sm:$0xff]  ;;  %v6311_v15 = vld [vmem:[%s6980_s26 + $0x38] sm:$0xff] }
 0xc55   : > { %2917 = vst.msk [vmem:[#allocation2 + $0x58] sm:$0xff] %vm2905_vm2, %v2880_v31 }
 0xc57   : > { %v2336_v36 = vpop.permute.xlu1 %2335 }
 0xc58   : > { %v3475_v34 = vld [vmem:[#allocation2 + $0x28] sm:$0xff]  ;;  %2371 = vst.msk [vmem:[#allocation2 + $0x68] sm:$0xff] %vm2357_vm1, %v2336_v36 }
 0xc59   : > { %v3488_v56 = vpack.c.bf16 %v3475_v34, %v3474_v41 }
 0xc5b   : > { %5725 = vmatprep.mubr.bf16.mxu1 %v3488_v56 }
 0xc5c   : > { %5726 = vmatmul.mubr.bf16.gmra.mxu1 %v3489_v0 }
 0xc76   : > { %v3426_v45 = vpop.permute.xlu0 %3425 }
 0xc77   : > { %3464 = vst.msk [vmem:[#allocation2 + $0x50] sm:$0xff] %vm3453_vm3, %v3426_v45  ;;  %v6312_v45 = vld [vmem:[%s6980_s26 + $0x40] sm:$0xff] }
 0xc7a   : > { %v3422_v3 = vpop.permute.xlu0 %3421  ;;  %v3428_v21 = vpop.permute.xlu1 %3427 }
 0xc7b   : > { %3462 = vst.msk [vmem:[#allocation2 + $0x40] sm:$0xff] %vm3453_vm3, %v3422_v3  ;;  %3465 = vst.msk [vmem:[#allocation2 + $0x58] sm:$0xff] %vm3453_vm3, %v3428_v21 }
 0xc7e   : > { %v2338_v25 = vpop.permute.xlu0 %2337  ;;  %v3424_v61 = vpop.permute.xlu1 %3423  ;;  %v3480_v18 = vld [vmem:[#allocation2 + $0x50] sm:$0xff] }
 0xc7f   : > { %2372 = vst.msk [vmem:[#allocation2 + $0x70] sm:$0xff] %vm2357_vm1, %v2338_v25 }
 0xc80   : > { %3463 = vst.msk [vmem:[#allocation2 + $0x48] sm:$0xff] %vm3453_vm3, %v3424_v61  ;;  %v6313_v61 = vld [vmem:[%s6980_s26 + $0x50] sm:$0xff] }
 0xc82   : > { %v2882_v24 = vpop.permute.xlu0 %2881  ;;  %v2340_v16 = vpop.permute.xlu1 %2339  ;;  %v3481_v1 = vld [vmem:[#allocation2 + $0x58] sm:$0xff]  ;;  %v3478_v35 = vld [vmem:[#allocation2 + $0x40] sm:$0xff] }
 0xc83   : > { %2918 = vst.msk [vmem:[#allocation2 + $0x60] sm:$0xff] %vm2905_vm2, %v2882_v24  ;;  %v3491_v62 = vpack.c.bf16 %v3481_v1, %v3480_v18  ;;  %v6314_v1 = vld [vmem:[%s6980_s26 + $0x48] sm:$0xff] }
 0xc84   : > { %2373 = vst.msk [vmem:[#allocation2 + $0x78] sm:$0xff] %vm2357_vm1, %v2340_v16 }
 0xc86   : > { %v2886_v53 = vpop.permute.xlu0 %2885  ;;  %v2884_v39 = vpop.permute.xlu1 %2883 }
 0xc87   : > { %v3479_v9 = vld [vmem:[#allocation2 + $0x48] sm:$0xff]  ;;  %2920 = vst.msk [vmem:[#allocation2 + $0x70] sm:$0xff] %vm2905_vm2, %v2886_v53  ;;  %2919 = vst.msk [vmem:[#allocation2 + $0x68] sm:$0xff] %vm2905_vm2, %v2884_v39  ;;  %v6315_v39 = vld [vmem:[%s6980_s26 + $0x58] sm:$0xff] }
 0xc88   : > { %v3490_v12 = vpack.c.bf16 %v3479_v9, %v3478_v35 }
 0xc8a   : > { %5729 = vmatprep.mubr.bf16.mxu1 %v3490_v12  ;;  %v3430_v63 = vpop.permute.xlu0 %3429  ;;  %v2888_v38 = vpop.permute.xlu1 %2887 }
 0xc8b   : > { %5730 = vmatmul.mubr.bf16.gmra.mxu1 %v3491_v62  ;;  %3466 = vst.msk [vmem:[#allocation2 + $0x60] sm:$0xff] %vm3453_vm3, %v3430_v63 }
 0xc8c   : > { %2921 = vst.msk [vmem:[#allocation2 + $0x78] sm:$0xff] %vm2905_vm2, %v2888_v38  ;;  %v6316_v38 = vld [vmem:[%s6980_s26 + $0x60] sm:$0xff] }
 0xc8e   : > { %v3434_v20 = vpop.permute.xlu0 %3433  ;;  %v3432_v43 = vpop.permute.xlu1 %3431 }
 0xc8f   : > { %3468 = vst.msk [vmem:[#allocation2 + $0x70] sm:$0xff] %vm3453_vm3, %v3434_v20  ;;  %3467 = vst.msk [vmem:[#allocation2 + $0x68] sm:$0xff] %vm3453_vm3, %v3432_v43 }
 0xc92   : > { %v3436_v11 = vpop.permute.xlu1 %3435  ;;  %v3482_v40 = vld [vmem:[#allocation2 + $0x60] sm:$0xff] }
 0xc93   : > { %3469 = vst.msk [vmem:[#allocation2 + $0x78] sm:$0xff] %vm3453_vm3, %v3436_v11 }
 0xc96   : > { %v3483_v42 = vld [vmem:[#allocation2 + $0x68] sm:$0xff]  ;;  %v3484_v49 = vld [vmem:[#allocation2 + $0x70] sm:$0xff] }
 0xc97   : > { %v3492_v52 = vpack.c.bf16 %v3483_v42, %v3482_v40  ;;  %v6317_v40 = vld [vmem:[%s6980_s26 + $0x70] sm:$0xff] }
 0xc99   : > { %5733 = vmatprep.mubr.bf16.mxu1 %v3492_v52 }
 0xc9a   : > { %v3485_v22 = vld [vmem:[#allocation2 + $0x78] sm:$0xff] }
 0xc9b   : > { %v3493_v60 = vpack.c.bf16 %v3485_v22, %v3484_v49  ;;  %v6318_v49 = vld [vmem:[%s6980_s26 + $0x68] sm:$0xff] }
 0xc9d   : > { %5734 = vmatmul.mubr.bf16.gmra.mxu1 %v3493_v60  ;;  %v6319_v60 = vld [vmem:[%s6980_s26 + $0x78] sm:$0xff]  ;;  %s8697_s26 = scalar_lea.hbm %s8934_s1, %s5096_s21 }
 0xd0c   : > { %v5723_v44 = vpop.f32.mrf.mxu1 }
 0xd0d   : > { %v3608_v8 = vadd.f32 %v5723_v44, %v8212_v37 }
 0xd0e   : > { %v3599_v19 = vpop.f32.mrf.mxu1 }
 0xd0f   : > { %v3600_v28 = vadd.f32 %v8212_v37, %v3599_v19  ;;  %v8222_v23 = vadd.f32 %v6305_v4, %v3608_v8  ;;  %v5944_v19 = vld [vmem:[#allocation14 + $0x70] ss:$8 sps:$4 sm:$0xff]  }
 0xd10   : > { %v5724_v13 = vpop.f32.mrf.mxu1 }
 0xd11   : > { %v8217_v50 = vadd.f32 %v6304_v48, %v3600_v28  ;;  %v3611_v58 = vadd.f32 %v5724_v13, %v8212_v37  ;;  %v5946_v28 = vld [vmem:[#allocation14 + $0x74] ss:$8 sps:$4 sm:$0xff]  }
 0xd12   : > { %v3602_v5 = vpop.f32.mrf.mxu1  ;;  %4017 = vmatprep.subr.bf16.mxu0 %v5946_v28 }
 0xd13   : > { %v3603_v32 = vadd.f32 %v8212_v37, %v3602_v5  ;;  %3680 = vadd.xlane.f32.xlu0 %v8217_v50  ;;  %v8231_v6 = vadd.f32 %v6307_v2, %v3611_v58  ;;  %4018 = vmatpush1.bf16.msra.mxu0 %v5944_v19 }
 0xd15   : > { %v8226_v33 = vadd.f32 %v6306_v27, %v3603_v32 }
 0xd17   : > { %3682 = vadd.xlane.f32.xlu1 %v8226_v33  ;;  %3684 = vadd.xlane.f32.xlu0 %v8222_v23 }
 0xd1b   : > { %3686 = vadd.xlane.f32.xlu0 %v8231_v6 }
 0xd1c   : > { %v5727_v10 = vpop.f32.mrf.mxu1 }
 0xd1d   : > { %v3624_v26 = vadd.f32 %v5727_v10, %v8212_v37 }
 0xd1e   : > { %v3615_v54 = vpop.f32.mrf.mxu1 }
 0xd1f   : > { %v3616_v29 = vadd.f32 %v8212_v37, %v3615_v54  ;;  %v8242_v51 = vadd.f32 %v6309_v7, %v3624_v26 }
 0xd20   : > { %v5728_v46 = vpop.f32.mrf.mxu1 }
 0xd21   : > { %v8237_v57 = vadd.f32 %v6308_v17, %v3616_v29  ;;  %v3627_v14 = vadd.f32 %v5728_v46, %v8212_v37  ;;  %v5949_v17 = vld [vmem:[#allocation14 + $0x64] ss:$8 sps:$4 sm:$0xff]  }
 0xd22   : > { %v3618_v47 = vpop.f32.mrf.mxu1  ;;  %4019 = vmatprep.subr.bf16.mxu0 %v5949_v17 }
 0xd23   : > { %v3619_v30 = vadd.f32 %v8212_v37, %v3618_v47  ;;  %3688 = vadd.xlane.f32.xlu0 %v8237_v57  ;;  %v8251_v36 = vadd.f32 %v6311_v15, %v3627_v14 }
 0xd25   : > { %v8246_v31 = vadd.f32 %v6310_v59, %v3619_v30  ;;  %v5947_v30 = vld [vmem:[#allocation14 + $0x60] ss:$8 sps:$4 sm:$0xff]  }
 0xd26   : > { %4020 = vmatpush1.bf16.msra.mxu0 %v5947_v30 }
 0xd27   : > { %3690 = vadd.xlane.f32.xlu1 %v8246_v31  ;;  %3692 = vadd.xlane.f32.xlu0 %v8242_v51 }
 0xd2b   : > { %3694 = vadd.xlane.f32.xlu1 %v8251_v36 }
 0xd4b   : > { %v5731_v41 = vpop.f32.mrf.mxu1 }
 0xd4c   : > { %v3640_v0 = vadd.f32 %v5731_v41, %v8212_v37  ;;  %v5952_v41 = vld [vmem:[#allocation14 + $0x54] ss:$8 sps:$4 sm:$0xff]  }
 0xd4d   : > { %v3631_v34 = vpop.f32.mrf.mxu1  ;;  %4021 = vmatprep.subr.bf16.mxu0 %v5952_v41 }
 0xd4e   : > { %v3632_v56 = vadd.f32 %v8212_v37, %v3631_v34  ;;  %v8262_v24 = vadd.f32 %v6313_v61, %v3640_v0 }
 0xd4f   : > { %v5732_v55 = vpop.f32.mrf.mxu1 }
 0xd50   : > { %v8257_v3 = vadd.f32 %v6312_v45, %v3632_v56  ;;  %v3643_v16 = vadd.f32 %v5732_v55, %v8212_v37 }
 0xd51   : > { %v3634_v21 = vpop.f32.mrf.mxu1 }
 0xd52   : > { %v3635_v25 = vadd.f32 %v8212_v37, %v3634_v21  ;;  %3696 = vadd.xlane.f32.xlu0 %v8257_v3  ;;  %v8271_v35 = vadd.f32 %v6315_v39, %v3643_v16  ;;  %v5958_v16 = vld [vmem:[#allocation14 + $0x34] ss:$8 sps:$4 sm:$0xff]   ;;  %v5961_v39 = vld [vmem:[#allocation14 + $0x24] ss:$8 sps:$4 sm:$0xff]  }
 0xd54   : > { %v8266_v53 = vadd.f32 %v6314_v1, %v3635_v25  ;;  %v5955_v25 = vld [vmem:[#allocation14 + $0x44] ss:$8 sps:$4 sm:$0xff]   ;;  %v5956_v1 = vld [vmem:[#allocation14 + $0x30] ss:$8 sps:$4 sm:$0xff]  }
 0xd56   : > { %3698 = vadd.xlane.f32.xlu1 %v8266_v53  ;;  %3700 = vadd.xlane.f32.xlu0 %v8262_v24 }
 0xd5a   : > { %3702 = vadd.xlane.f32.xlu1 %v8271_v35 }
 0xd5d   : > { %v5735_v9 = vpop.f32.mrf.mxu1 }
 0xd5e   : > { %v3656_v63 = vadd.f32 %v5735_v9, %v8212_v37  ;;  %v5959_v9 = vld [vmem:[#allocation14 + $0x20] ss:$8 sps:$4 sm:$0xff]  }
 0xd5f   : > { %v3647_v12 = vpop.f32.mrf.mxu1 }
 0xd60   : > { %v3648_v18 = vadd.f32 %v8212_v37, %v3647_v12  ;;  %v8282_v42 = vadd.f32 %v6317_v40, %v3656_v63  ;;  %v5964_v12 = vld [vmem:[#allocation14 + $0x14] ss:$8 sps:$4 sm:$0xff]   ;;  %v6679_v63 = vmov 0  }
 0xd61   : > { %v5736_v62 = vpop.f32.mrf.mxu1  ;;  %4049 = vmatprep.mubr.bf16.mxu0 %v6679_v63 }
 0xd62   : > { %v8277_v20 = vadd.f32 %v6316_v38, %v3648_v18  ;;  %v3659_v52 = vadd.f32 %v5736_v62, %v8212_v37  ;;  %v5967_v18 = vld [vmem:[#allocation14 + $0x4] ss:$8 sps:$4 sm:$0xff]   ;;  %v5965_v62 = vld [vmem:[#allocation14] ss:$8 sps:$4 sm:$0xff]  }
 0xd63   : > { %v3650_v43 = vpop.f32.mrf.mxu1 }
 0xd64   : > { %v3651_v11 = vadd.f32 %v8212_v37, %v3650_v43  ;;  %3704 = vadd.xlane.f32.xlu0 %v8277_v20  ;;  %v8291_v44 = vadd.f32 %v6319_v60, %v3659_v52 }
 0xd66   : > { %v8286_v22 = vadd.f32 %v6318_v49, %v3651_v11 }
 0xd68   : > { %3706 = vadd.xlane.f32.xlu1 %v8286_v22  ;;  %3708 = vadd.xlane.f32.xlu0 %v8282_v42 }
 0xd6c   : > { %3710 = vadd.xlane.f32.xlu1 %v8291_v44 }
 0xd9c   : > { %v3681_v13 = vpop.xlane.xlu0 %3680 }
 0xd9d   : > { %v3713_v8 = vmul.f32 0.0078125, %v3681_v13 }
 0xd9f   : > { %v8295_v37 = vsub.f32 %v8217_v50, %v3713_v8 }
 0xda0   : > { %v3685_v48 = vpop.xlane.xlu0 %3684  ;;  %v3683_v5 = vpop.xlane.xlu1 %3682 }
 0xda1   : > { %v3715_v32 = vmul.f32 0.0078125, %v3685_v48  ;;  %v3714_v4 = vmul.f32 0.0078125, %v3683_v5  ;;  %v3745_v58 = vmul.f32 %v8295_v37, %v8295_v37 }
 0xda3   : > { %v8300_v27 = vsub.f32 %v8222_v23, %v3715_v32  ;;  %v8303_v2 = vsub.f32 %v8226_v33, %v3714_v4  ;;  %3761 = vadd.xlane.f32.xlu0 %v3745_v58 }
 0xda4   : > { %v3687_v10 = vpop.xlane.xlu0 %3686 }
 0xda5   : > { %v3716_v54 = vmul.f32 0.0078125, %v3687_v10  ;;  %v3747_v50 = vmul.f32 %v8300_v27, %v8300_v27  ;;  %v3746_v29 = vmul.f32 %v8303_v2, %v8303_v2 }
 0xda7   : > { %v8310_v46 = vsub.f32 %v8231_v6, %v3716_v54  ;;  %3765 = vadd.xlane.f32.xlu0 %v3747_v50  ;;  %3763 = vadd.xlane.f32.xlu1 %v3746_v29 }
 0xda9   : > { %v3748_v23 = vmul.f32 %v8310_v46, %v8310_v46 }
 0xdab   : > { %3767 = vadd.xlane.f32.xlu1 %v3748_v23 }
 0xdac   : > { %v3689_v33 = vpop.xlane.xlu0 %3688 }
 0xdad   : > { %v3717_v26 = vmul.f32 0.0078125, %v3689_v33 }
 0xdaf   : > { %v8315_v47 = vsub.f32 %v8237_v57, %v3717_v26  ;;  %v5950_v57 = vld [vmem:[#allocation14 + $0x50] ss:$8 sps:$4 sm:$0xff]  }
 0xdb0   : > { %v3693_v7 = vpop.xlane.xlu0 %3692  ;;  %v3691_v14 = vpop.xlane.xlu1 %3690  ;;  %4022 = vmatpush1.bf16.msra.mxu0 %v5950_v57 }
 0xdb1   : > { %v3719_v59 = vmul.f32 0.0078125, %v3693_v7  ;;  %v3718_v15 = vmul.f32 0.0078125, %v3691_v14  ;;  %v3749_v6 = vmul.f32 %v8315_v47, %v8315_v47  ;;  %4023 = vmatprep.subr.bf16.mxu0 %v5955_v25  ;;  %v5969_v14 = vld [vmem:[#allocation15 + $0x38] sm:$0xff]  }
 0xdb3   : > { %v8320_v34 = vsub.f32 %v8242_v51, %v3719_v59  ;;  %v8323_v56 = vsub.f32 %v8246_v31, %v3718_v15  ;;  %3769 = vadd.xlane.f32.xlu0 %v3749_v6  ;;  %v5953_v51 = vld [vmem:[#allocation14 + $0x40] ss:$8 sps:$4 sm:$0xff]   ;;  %v5970_v59 = vld [vmem:[#allocation15 + $0x70] sm:$0xff]  }
 0xdb4   : > { %v3695_v55 = vpop.xlane.xlu1 %3694  ;;  %4024 = vmatpush1.bf16.msra.mxu0 %v5953_v51  ;;  %v5971_v15 = vld [vmem:[#allocation15 + $0x30] sm:$0xff]   ;;  %v5972_v6 = vld [vmem:[#allocation15 + $0x68] sm:$0xff]  }
 0xdb5   : > { %v3720_v0 = vmul.f32 0.0078125, %v3695_v55  ;;  %v3751_v45 = vmul.f32 %v8320_v34, %v8320_v34  ;;  %v3750_v21 = vmul.f32 %v8323_v56, %v8323_v56  ;;  %4025 = vmatprep.subr.bf16.mxu0 %v5958_v16  ;;  %v5973_v55 = vld [vmem:[#allocation15 + $0x28] sm:$0xff]   ;;  %v5976_v16 = vld [vmem:[#allocation15 + $0x58] sm:$0xff]  }
 0xdb7   : > { %v8330_v61 = vsub.f32 %v8251_v36, %v3720_v0  ;;  %3773 = vadd.xlane.f32.xlu0 %v3751_v45  ;;  %3771 = vadd.xlane.f32.xlu1 %v3750_v21  ;;  %v5962_v36 = vld [vmem:[#allocation14 + $0x10] ss:$8 sps:$4 sm:$0xff]  }
 0xdb8   : > { %4026 = vmatpush1.bf16.msra.mxu0 %v5956_v1 }
 0xdb9   : > { %v3752_v31 = vmul.f32 %v8330_v61, %v8330_v61  ;;  %4027 = vmatprep.subr.bf16.mxu0 %v5961_v39 }
 0xdbb   : > { %3775 = vadd.xlane.f32.xlu1 %v3752_v31  ;;  %v5975_v31 = vld [vmem:[#allocation15 + $0x20] sm:$0xff]  }
 0xdbc   : > { %4028 = vmatpush1.bf16.msra.mxu0 %v5959_v9 }
 0xdbd   : > { %4029 = vmatprep.subr.bf16.mxu0 %v5964_v12 }
 0xdc0   : > { %4030 = vmatpush1.bf16.msra.mxu0 %v5962_v36  ;;  %v5977_v36 = vld [vmem:[#allocation15 + $0x18] sm:$0xff]  }
 0xdc1   : > { %4031 = vmatprep.subr.bf16.mxu0 %v5967_v18 }
 0xdc4   : > { %4032 = vmatpush1.bf16.msra.mxu0 %v5965_v62 }
 0xddb   : > { %v3697_v38 = vpop.xlane.xlu0 %3696 }
 0xddc   : > { %v3721_v43 = vmul.f32 0.0078125, %v3697_v38 }
 0xdde   : > { %v8336_v11 = vsub.f32 %v8257_v3, %v3721_v43 }
 0xddf   : > { %v3701_v40 = vpop.xlane.xlu0 %3700  ;;  %v3699_v52 = vpop.xlane.xlu1 %3698 }
 0xde0   : > { %v3723_v49 = vmul.f32 0.0078125, %v3701_v40  ;;  %v3722_v60 = vmul.f32 0.0078125, %v3699_v52  ;;  %v3753_v19 = vmul.f32 %v8336_v11, %v8336_v11 }
 0xde2   : > { %v8341_v28 = vsub.f32 %v8262_v24, %v3723_v49  ;;  %v8344_v13 = vsub.f32 %v8266_v53, %v3722_v60  ;;  %3777 = vadd.xlane.f32.xlu0 %v3753_v19 }
 0xde3   : > { %v3703_v8 = vpop.xlane.xlu1 %3702 }
 0xde4   : > { %v3724_v48 = vmul.f32 0.0078125, %v3703_v8  ;;  %v3755_v3 = vmul.f32 %v8341_v28, %v8341_v28  ;;  %v3754_v5 = vmul.f32 %v8344_v13, %v8344_v13 }
 0xde6   : > { %v8351_v32 = vsub.f32 %v8271_v35, %v3724_v48  ;;  %3781 = vadd.xlane.f32.xlu0 %v3755_v3  ;;  %3779 = vadd.xlane.f32.xlu1 %v3754_v5  ;;  %v8379_v48 = vld [vmem:[%s8870_s10] ss:$0 sm:$0xff] }
 0xde8   : > { %v3756_v24 = vmul.f32 %v8351_v32, %v8351_v32 }
 0xdea   : > { %3783 = vadd.xlane.f32.xlu1 %v3756_v24 }
 0xded   : > { %v3705_v53 = vpop.xlane.xlu0 %3704 }
 0xdee   : > { %v3725_v4 = vmul.f32 0.0078125, %v3705_v53 }
 0xdf0   : > { %v8356_v58 = vsub.f32 %v8277_v20, %v3725_v4 }
 0xdf1   : > { %v3709_v10 = vpop.xlane.xlu0 %3708  ;;  %v3707_v54 = vpop.xlane.xlu1 %3706 }
 0xdf2   : > { %v3727_v50 = vmul.f32 0.0078125, %v3709_v10  ;;  %v3726_v29 = vmul.f32 0.0078125, %v3707_v54  ;;  %v3757_v23 = vmul.f32 %v8356_v58, %v8356_v58 }
 0xdf4   : > { %v8361_v35 = vsub.f32 %v8282_v42, %v3727_v50  ;;  %v8364_v33 = vsub.f32 %v8286_v22, %v3726_v29  ;;  %3785 = vadd.xlane.f32.xlu0 %v3757_v23  ;;  %v5968_v22 = vld [vmem:[#allocation15 + $0x78] sm:$0xff]   ;;  %v8386_v50 = vld [vmem:[%s8871_s11] ss:$0 sm:$0xff] }
 0xdf5   : > { %v3711_v26 = vpop.xlane.xlu1 %3710  ;;  %5289 = vmatprep.subr.bf16.mxu1 %v5968_v22 }
 0xdf6   : > { %v3728_v17 = vmul.f32 0.0078125, %v3711_v26  ;;  %v3759_v20 = vmul.f32 %v8361_v35, %v8361_v35  ;;  %v3758_v30 = vmul.f32 %v8364_v33, %v8364_v33  ;;  %5290 = vmatpush3.bf16.msra.mxu1 %v5969_v14 }
 0xdf7   : > { %5291 = vmatprep.subr.bf16.mxu1 %v5970_v59 }
 0xdf8   : > { %v8371_v7 = vsub.f32 %v8291_v44, %v3728_v17  ;;  %3789 = vadd.xlane.f32.xlu0 %v3759_v20  ;;  %3787 = vadd.xlane.f32.xlu1 %v3758_v30  ;;  %v5974_v44 = vld [vmem:[#allocation15 + $0x60] sm:$0xff]  }
 0xdfa   : > { %v3760_v42 = vmul.f32 %v8371_v7, %v8371_v7  ;;  %5292 = vmatpush3.bf16.msra.mxu1 %v5971_v15 }
 0xdfb   : > { %5293 = vmatprep.subr.bf16.mxu1 %v5972_v6 }
 0xdfc   : > { %3791 = vadd.xlane.f32.xlu1 %v3760_v42 }
 0xdfe   : > { %5294 = vmatpush3.bf16.msra.mxu1 %v5973_v55 }
 0xdff   : > { %5295 = vmatprep.subr.bf16.mxu1 %v5974_v44 }
 0xe02   : > { %5296 = vmatpush3.bf16.msra.mxu1 %v5975_v31 }
 0xe03   : > { %5297 = vmatprep.subr.bf16.mxu1 %v5976_v16 }
 0xe06   : > { %5298 = vmatpush3.bf16.msra.mxu1 %v5977_v36 }
 0xe2c   : > { %v3762_v41 = vpop.xlane.xlu0 %3761 }
 0xe2d   : > { %v3793_v57 = vmul.f32 0.0078125, %v3762_v41 }
 0xe2f   : > { %v3809_v0 = vadd.f32 1e-05, %v3793_v57 }
 0xe30   : > { %v3766_v45 = vpop.xlane.xlu0 %3765  ;;  %v3764_v21 = vpop.xlane.xlu1 %3763 }
 0xe31   : > { %6240 = vrsqrt.f32 %v3809_v0  ;;  %v3795_v25 = vmul.f32 0.0078125, %v3766_v45  ;;  %v3794_v51 = vmul.f32 0.0078125, %v3764_v21 }
 0xe33   : > { %v3810_v1 = vadd.f32 1e-05, %v3794_v51  ;;  %v3811_v39 = vadd.f32 1e-05, %v3795_v25 }
 0xe34   : > { %v3768_v9 = vpop.xlane.xlu1 %3767 }
 0xe35   : > { %v3796_v12 = vmul.f32 0.0078125, %v3768_v9  ;;  %6242 = vrsqrt.f32 %v3810_v1 }
 0xe36   : > { %6244 = vrsqrt.f32 %v3811_v39 }
 0xe37   : > { %v3812_v18 = vadd.f32 1e-05, %v3796_v12 }
 0xe39   : > { %6246 = vrsqrt.f32 %v3812_v18 }
 0xe3c   : > { %v3770_v62 = vpop.xlane.xlu0 %3769 }
 0xe3d   : > { %v3797_v38 = vmul.f32 0.0078125, %v3770_v62 }
 0xe3e   : > { %v6241_v43 = vpop.eup %6240 }
 0xe3f   : > { %v3813_v40 = vadd.f32 1e-05, %v3797_v38  ;;  %v3841_v52 = vmul.f32 %v6241_v43, %v8295_v37 }
 0xe40   : > { %v3774_v49 = vpop.xlane.xlu0 %3773  ;;  %v3772_v60 = vpop.xlane.xlu1 %3771 }
 0xe41   : > { %6248 = vrsqrt.f32 %v3813_v40  ;;  %v3799_v19 = vmul.f32 0.0078125, %v3774_v49  ;;  %v3798_v8 = vmul.f32 0.0078125, %v3772_v60  ;;  %v3863_v10 = vmul.f32 %v8379_v48, %v3841_v52 }
 0xe42   : > { %v6243_v3 = vpop.eup %6242 }
 0xe43   : > { %v3814_v5 = vadd.f32 1e-05, %v3798_v8  ;;  %v3842_v24 = vmul.f32 %v6243_v3, %v8303_v2  ;;  %v3815_v53 = vadd.f32 1e-05, %v3799_v19  ;;  %v6245_v54 = vpop.eup %6244  ;;  %v8391_v2 = vadd.f32 %v8386_v50, %v3863_v10 }
 0xe44   : > { %v3776_v4 = vpop.xlane.xlu1 %3775  ;;  %v3843_v30 = vmul.f32 %v6245_v54, %v8300_v27 }
 0xe45   : > { %v3800_v37 = vmul.f32 0.0078125, %v3776_v4  ;;  %6250 = vrsqrt.f32 %v3814_v5  ;;  %v3864_v23 = vmul.f32 %v8379_v48, %v3842_v24 }
 0xe46   : > { %v6247_v29 = vpop.eup %6246  ;;  %6252 = vrsqrt.f32 %v3815_v53  ;;  %v3865_v14 = vmul.f32 %v8379_v48, %v3843_v30 }
 0xe47   : > { %v3816_v26 = vadd.f32 1e-05, %v3800_v37  ;;  %v3844_v17 = vmul.f32 %v6247_v29, %v8310_v46  ;;  %v8394_v20 = vadd.f32 %v8386_v50, %v3864_v23 }
 0xe48   : > { %v8406_v15 = vadd.f32 %v8386_v50, %v3865_v14 }
 0xe49   : > { %6254 = vrsqrt.f32 %v3816_v26  ;;  %v3901_v42 = vpack.c.bf16 %v8394_v20, %v8391_v2  ;;  %v3866_v22 = vmul.f32 %v8379_v48, %v3844_v17 }
 0xe4b   : > { %4050 = vmatmul.mubr.bf16.vlgmr.msra.gmra.mxu0 %v3901_v42  ;;  %v8403_v59 = vadd.f32 %v8386_v50, %v3866_v22 }
 0xe4c   : > { %4059 = vmatprep.mubr.bf16.mxu0 %v6679_v63 }
 0xe4d   : > { %v3902_v6 = vpack.c.bf16 %v8403_v59, %v8406_v15 }
 0xe4e   : > { %v6249_v46 = vpop.eup %6248 }
 0xe4f   : > { %v3845_v27 = vmul.f32 %v6249_v46, %v8315_v47 }
 0xe51   : > { %v3867_v55 = vmul.f32 %v8379_v48, %v3845_v27 }
 0xe52   : > { %v6251_v41 = vpop.eup %6250 }
 0xe53   : > { %4060 = vmatmul.mubr.bf16.gmra.mxu0 %v3902_v6  ;;  %v3846_v57 = vmul.f32 %v6251_v41, %v8323_v56  ;;  %v6253_v44 = vpop.eup %6252  ;;  %v8417_v25 = vadd.f32 %v8386_v50, %v3867_v55 }
 0xe54   : > { %4069 = vmatprep.mubr.bf16.mxu0 %v6679_v63  ;;  %v3847_v51 = vmul.f32 %v6253_v44, %v8320_v34  ;;  %v5978_v44 = vld [vmem:[#allocation15 + $0x50] sm:$0xff]  }
 0xe55   : > { %v3868_v45 = vmul.f32 %v8379_v48, %v3846_v57  ;;  %5299 = vmatprep.subr.bf16.mxu1 %v5978_v44 }
 0xe56   : > { %v6255_v0 = vpop.eup %6254  ;;  %v3869_v16 = vmul.f32 %v8379_v48, %v3847_v51  ;;  %v5980_v51 = vld [vmem:[#allocation15 + $0x48] sm:$0xff]  }
 0xe57   : > { %v3848_v21 = vmul.f32 %v6255_v0, %v8330_v61  ;;  %v8420_v47 = vadd.f32 %v8386_v50, %v3868_v45  ;;  %v5979_v45 = vld [vmem:[#allocation15 + $0x10] sm:$0xff]  }
 0xe58   : > { %v8432_v1 = vadd.f32 %v8386_v50, %v3869_v16  ;;  %5300 = vmatpush3.bf16.msra.mxu1 %v5979_v45 }
 0xe59   : > { %v3903_v56 = vpack.c.bf16 %v8420_v47, %v8417_v25  ;;  %v3870_v31 = vmul.f32 %v8379_v48, %v3848_v21  ;;  %5301 = vmatprep.subr.bf16.mxu1 %v5980_v51 }
 0xe5b   : > { %4070 = vmatmul.mubr.bf16.gmra.mxu0 %v3903_v56  ;;  %v8429_v61 = vadd.f32 %v8386_v50, %v3870_v31  ;;  %v5981_v31 = vld [vmem:[#allocation15 + $0x8] sm:$0xff]  }
 0xe5c   : > { %4079 = vmatprep.mubr.bf16.mxu0 %v6679_v63  ;;  %5302 = vmatpush3.bf16.msra.mxu1 %v5981_v31 }
 0xe5d   : > { %v3904_v39 = vpack.c.bf16 %v8429_v61, %v8432_v1 }
 0xe63   : > { %4080 = vmatmul.mubr.bf16.gmra.mxu0 %v3904_v39  ;;  %v5982_v39 = vld [vmem:[#allocation15 + $0x40] sm:$0xff]  }
 0xe64   : > { %4089 = vmatprep.mubr.bf16.mxu0 %v6679_v63  ;;  %5303 = vmatprep.subr.bf16.mxu1 %v5982_v39 }
 0xe6b   : > { %v3778_v34 = vpop.xlane.xlu0 %3777 }
 0xe6c   : > { %v3801_v9 = vmul.f32 0.0078125, %v3778_v34 }
 0xe6e   : > { %v3817_v12 = vadd.f32 1e-05, %v3801_v9  ;;  %v5983_v9 = vld [vmem:[#allocation15] sm:$0xff]  }
 0xe6f   : > { %v3782_v36 = vpop.xlane.xlu0 %3781  ;;  %v3780_v18 = vpop.xlane.xlu1 %3779  ;;  %5304 = vmatpush3.bf16.msra.mxu1 %v5983_v9 }
 0xe70   : > { %6256 = vrsqrt.f32 %v3817_v12  ;;  %v3803_v62 = vmul.f32 0.0078125, %v3782_v36  ;;  %v3802_v38 = vmul.f32 0.0078125, %v3780_v18 }
 0xe72   : > { %v3818_v43 = vadd.f32 1e-05, %v3802_v38  ;;  %v3819_v40 = vadd.f32 1e-05, %v3803_v62 }
 0xe73   : > { %v3784_v52 = vpop.xlane.xlu1 %3783 }
 0xe74   : > { %v3804_v49 = vmul.f32 0.0078125, %v3784_v52  ;;  %6258 = vrsqrt.f32 %v3818_v43 }
 0xe75   : > { %6260 = vrsqrt.f32 %v3819_v40 }
 0xe76   : > { %v3820_v60 = vadd.f32 1e-05, %v3804_v49 }
 0xe78   : > { %6262 = vrsqrt.f32 %v3820_v60 }
 0xe7d   : > { %v6257_v19 = vpop.eup %6256  ;;  %v3786_v8 = vpop.xlane.xlu0 %3785 }
 0xe7e   : > { %v3849_v3 = vmul.f32 %v6257_v19, %v8336_v11  ;;  %v3805_v5 = vmul.f32 0.0078125, %v3786_v8 }
 0xe80   : > { %v3821_v24 = vadd.f32 1e-05, %v3805_v5  ;;  %v3871_v54 = vmul.f32 %v8379_v48, %v3849_v3 }
 0xe81   : > { %v6259_v53 = vpop.eup %6258  ;;  %v3790_v4 = vpop.xlane.xlu0 %3789 }
 0xe82   : > { %v3788_v10 = vpop.xlane.xlu1 %3787  ;;  %6264 = vrsqrt.f32 %v3821_v24  ;;  %v3807_v37 = vmul.f32 0.0078125, %v3790_v4  ;;  %v3850_v23 = vmul.f32 %v6259_v53, %v8344_v13  ;;  %v6261_v26 = vpop.eup %6260  ;;  %v8443_v27 = vadd.f32 %v8386_v50, %v3871_v54 }
 0xe83   : > { %v3806_v29 = vmul.f32 0.0078125, %v3788_v10  ;;  %v3851_v41 = vmul.f32 %v6261_v26, %v8341_v28 }
 0xe84   : > { %v3872_v42 = vmul.f32 %v8379_v48, %v3850_v23  ;;  %v3823_v22 = vadd.f32 1e-05, %v3807_v37 }
 0xe85   : > { %v6263_v17 = vpop.eup %6262  ;;  %v3822_v30 = vadd.f32 1e-05, %v3806_v29 }
 0xe86   : > { %v3792_v14 = vpop.xlane.xlu1 %3791  ;;  %v3852_v11 = vmul.f32 %v6263_v17, %v8351_v32  ;;  %v8446_v6 = vadd.f32 %v8386_v50, %v3872_v42  ;;  %v3873_v32 = vmul.f32 %v8379_v48, %v3851_v41 }
 0xe87   : > { %v3808_v46 = vmul.f32 0.0078125, %v3792_v14  ;;  %6266 = vrsqrt.f32 %v3822_v30 }
 0xe88   : > { %v3905_v57 = vpack.c.bf16 %v8446_v6, %v8443_v27  ;;  %v3874_v55 = vmul.f32 %v8379_v48, %v3852_v11  ;;  %6268 = vrsqrt.f32 %v3823_v22  ;;  %v8458_v28 = vadd.f32 %v8386_v50, %v3873_v32 }
 0xe89   : > { %v3824_v13 = vadd.f32 1e-05, %v3808_v46 }
 0xe8a   : > { %4090 = vmatmul.mubr.bf16.gmra.mxu0 %v3905_v57  ;;  %v8455_v0 = vadd.f32 %v8386_v50, %v3874_v55 }
 0xe8b   : > { %6270 = vrsqrt.f32 %v3824_v13  ;;  %4099 = vmatprep.mubr.bf16.mxu0 %v6679_v63 }
 0xe8c   : > { %v3906_v56 = vpack.c.bf16 %v8455_v0, %v8458_v28 }
 0xe8f   : > { %v6265_v21 = vpop.eup %6264 }
 0xe90   : > { %v3853_v16 = vmul.f32 %v6265_v21, %v8356_v58 }
 0xe92   : > { %4100 = vmatmul.mubr.bf16.gmra.mxu0 %v3906_v56  ;;  %v3875_v36 = vmul.f32 %v8379_v48, %v3853_v16 }
 0xe93   : > { %4109 = vmatprep.mubr.bf16.mxu0 %v6679_v63 }
 0xe94   : > { %v6267_v34 = vpop.eup %6266  ;;  %v8469_v43 = vadd.f32 %v8386_v50, %v3875_v36 }
 0xe95   : > { %v3854_v12 = vmul.f32 %v6267_v34, %v8364_v33  ;;  %v6269_v18 = vpop.eup %6268 }
 0xe96   : > { %v3855_v52 = vmul.f32 %v6269_v18, %v8361_v35  ;;  %v3927_v35 = vlaneseq }
 0xe97   : > { %v3876_v38 = vmul.f32 %v8379_v48, %v3854_v12 }
 0xe98   : > { %v6271_v62 = vpop.eup %6270  ;;  %v3877_v60 = vmul.f32 %v8379_v48, %v3855_v52  ;;  %v3928_v3 = vshrl.u32 %v3927_v35, 7 }
 0xe99   : > { %v3856_v58 = vmul.f32 %v6271_v62, %v8371_v7  ;;  %v8472_v40 = vadd.f32 %v8386_v50, %v3876_v38 }
 0xe9a   : > { %v8484_v19 = vadd.f32 %v8386_v50, %v3877_v60  ;;  %v3933_v5 = vsub.s32 1, %v3928_v3  ;;  %v3929_v24 = vsub.s32 0, %v3928_v3 }
 0xe9b   : > { %v3907_v33 = vpack.c.bf16 %v8472_v40, %v8469_v43  ;;  %v3878_v49 = vmul.f32 %v8379_v48, %v3856_v58  ;;  %v3925_v48 = vld [vmem:[%s8873_s13] sm:$0x3] }
 0xe9c   : > { %v8493_v4 = vrot.slane %v3925_v48, %v3929_v24 }
 0xe9d   : > { %4110 = vmatmul.mubr.bf16.gmra.mxu0 %v3907_v33  ;;  %v8481_v7 = vadd.f32 %v8386_v50, %v3878_v49 }
 0xe9e   : > { %4119 = vmatprep.mubr.bf16.mxu0 %v6679_v63  ;;  %v8491_v63 = vrot.slane %v3925_v48, %v3933_v5 }
 0xe9f   : > { %v3908_v8 = vpack.c.bf16 %v8481_v7, %v8484_v19 }
 0xea5   : > { %4120 = vmatmul.mubr.bf16.gmra.mxu0 %v3908_v8 }
 0xf0b   : > { %v4051_v53 = vpop.f32.mrf.mxu0 }
 0xf0c   : > { %v4052_v29 = vadd.f32 %v4051_v53, %v8493_v4 }
 0xf0d   : > { %v4053_v10 = vpop.f32.mrf.mxu0 }
 0xf0e   : > { %v4054_v54 = vadd.f32 %v4053_v10, %v8491_v63  ;;  %v4130_v14 = vmax.f32 %v4052_v29, 0.0 }
 0xf0f   : > { %v4055_v50 = vpop.f32.mrf.mxu0 }
 0xf10   : > { %v4056_v37 = vadd.f32 %v4055_v50, %v8493_v4  ;;  %v4131_v42 = vmax.f32 %v4054_v54, 0.0 }
 0xf11   : > { %v4057_v23 = vpop.f32.mrf.mxu0 }
 0xf12   : > { %v4058_v26 = vadd.f32 %v4057_v23, %v8491_v63  ;;  %v4132_v17 = vmax.f32 %v4056_v37, 0.0 }
 0xf13   : > { %v4061_v30 = vpop.f32.mrf.mxu0 }
 0xf14   : > { %v4133_v22 = vmax.f32 %v4058_v26, 0.0  ;;  %v4162_v41 = vpack.c.bf16 %v4132_v17, %v4130_v14  ;;  %v4062_v32 = vadd.f32 %v4061_v30, %v8493_v4 }
 0xf15   : > { %v4063_v11 = vpop.f32.mrf.mxu0 }
 0xf16   : > { %v4163_v46 = vpack.c.bf16 %v4133_v22, %v4131_v42  ;;  %v4064_v57 = vadd.f32 %v4063_v11, %v8491_v63  ;;  %v4134_v16 = vmax.f32 %v4062_v32, 0.0 }
 0xf17   : > { %v4065_v13 = vpop.f32.mrf.mxu0 }
 0xf18   : > { %v4066_v55 = vadd.f32 %v4065_v13, %v8493_v4  ;;  %4345 = vmatprep.mubr.bf16.mxu1 %v4163_v46  ;;  %v4135_v56 = vmax.f32 %v4064_v57, 0.0 }
 0xf19   : > { %v4067_v44 = vpop.f32.mrf.mxu0  ;;  %4346 = vmatmul.mubr.bf16.vlgmr.msra.gmra.mxu1 %v4162_v41 }
 0xf1a   : > { %v4068_v45 = vadd.f32 %v4067_v44, %v8491_v63  ;;  %v4136_v21 = vmax.f32 %v4066_v55, 0.0 }
 0xf1b   : > { %v4071_v51 = vpop.f32.mrf.mxu0 }
 0xf1c   : > { %v4137_v31 = vmax.f32 %v4068_v45, 0.0  ;;  %v4164_v9 = vpack.c.bf16 %v4136_v21, %v4134_v16  ;;  %v4072_v62 = vadd.f32 %v4071_v51, %v8493_v4 }
 0xf1d   : > { %v4073_v39 = vpop.f32.mrf.mxu0 }
 0xf1e   : > { %v4165_v34 = vpack.c.bf16 %v4137_v31, %v4135_v56  ;;  %v4074_v36 = vadd.f32 %v4073_v39, %v8491_v63  ;;  %v4138_v8 = vmax.f32 %v4072_v62, 0.0 }
 0xf1f   : > { %v4075_v12 = vpop.f32.mrf.mxu0 }
 0xf20   : > { %v4076_v18 = vadd.f32 %v4075_v12, %v8493_v4  ;;  %4353 = vmatprep.mubr.bf16.mxu1 %v4165_v34  ;;  %v4139_v49 = vmax.f32 %v4074_v36, 0.0 }
 0xf21   : > { %v4077_v38 = vpop.f32.mrf.mxu0  ;;  %4354 = vmatmul.mubr.bf16.gmra.mxu1 %v4164_v9 }
 0xf22   : > { %v4078_v58 = vadd.f32 %v4077_v38, %v8491_v63  ;;  %v4140_v52 = vmax.f32 %v4076_v18, 0.0 }
 0xf23   : > { %v4081_v33 = vpop.f32.mrf.mxu0 }
 0xf24   : > { %v4141_v60 = vmax.f32 %v4078_v58, 0.0  ;;  %v4166_v5 = vpack.c.bf16 %v4140_v52, %v4138_v8  ;;  %v4082_v10 = vadd.f32 %v4081_v33, %v8493_v4 }
 0xf25   : > { %v4083_v35 = vpop.f32.mrf.mxu0 }
 0xf26   : > { %v4167_v3 = vpack.c.bf16 %v4141_v60, %v4139_v49  ;;  %v4084_v48 = vadd.f32 %v4083_v35, %v8491_v63  ;;  %v4142_v26 = vmax.f32 %v4082_v10, 0.0 }
 0xf27   : > { %v4085_v24 = vpop.f32.mrf.mxu0 }
 0xf28   : > { %v4086_v53 = vadd.f32 %v4085_v24, %v8493_v4  ;;  %4361 = vmatprep.mubr.bf16.mxu1 %v4167_v3  ;;  %v4143_v29 = vmax.f32 %v4084_v48, 0.0 }
 0xf29   : > { %v4087_v50 = vpop.f32.mrf.mxu0  ;;  %4362 = vmatmul.mubr.bf16.gmra.mxu1 %v4166_v5 }
 0xf2a   : > { %v4088_v54 = vadd.f32 %v4087_v50, %v8491_v63  ;;  %v4144_v37 = vmax.f32 %v4086_v53, 0.0 }
 0xf2c   : > { %v4145_v23 = vmax.f32 %v4088_v54, 0.0  ;;  %v4168_v30 = vpack.c.bf16 %v4144_v37, %v4142_v26 }
 0xf2e   : > { %v4169_v17 = vpack.c.bf16 %v4145_v23, %v4143_v29 }
 0xf30   : > { %4369 = vmatprep.mubr.bf16.mxu1 %v4169_v17 }
 0xf31   : > { %4370 = vmatmul.mubr.bf16.gmra.mxu1 %v4168_v30 }
 0xf4a   : > { %v4091_v42 = vpop.f32.mrf.mxu0 }
 0xf4b   : > { %v4092_v41 = vadd.f32 %v4091_v42, %v8493_v4 }
 0xf4c   : > { %v4093_v22 = vpop.f32.mrf.mxu0 }
 0xf4d   : > { %v4094_v11 = vadd.f32 %v4093_v22, %v8491_v63  ;;  %v4146_v21 = vmax.f32 %v4092_v41, 0.0 }
 0xf4e   : > { %v4095_v14 = vpop.f32.mrf.mxu0 }
 0xf4f   : > { %v4096_v46 = vadd.f32 %v4095_v14, %v8493_v4  ;;  %v4147_v44 = vmax.f32 %v4094_v11, 0.0 }
 0xf50   : > { %v4097_v13 = vpop.f32.mrf.mxu0 }
 0xf51   : > { %v4098_v57 = vadd.f32 %v4097_v13, %v8491_v63  ;;  %v4148_v55 = vmax.f32 %v4096_v46, 0.0 }
 0xf52   : > { %v4101_v32 = vpop.f32.mrf.mxu0 }
 0xf53   : > { %v4149_v45 = vmax.f32 %v4098_v57, 0.0  ;;  %v4170_v31 = vpack.c.bf16 %v4148_v55, %v4146_v21  ;;  %v4102_v9 = vadd.f32 %v4101_v32, %v8493_v4 }
 0xf54   : > { %v4103_v51 = vpop.f32.mrf.mxu0 }
 0xf55   : > { %v4171_v56 = vpack.c.bf16 %v4149_v45, %v4147_v44  ;;  %v4104_v39 = vadd.f32 %v4103_v51, %v8491_v63  ;;  %v4150_v58 = vmax.f32 %v4102_v9, 0.0  ;;  %v8530_v45 = vld [vmem:[%s8932_s27] ss:$0 sm:$0xff] }
 0xf56   : > { %v4105_v16 = vpop.f32.mrf.mxu0 }
 0xf57   : > { %v4106_v34 = vadd.f32 %v4105_v16, %v8493_v4  ;;  %4377 = vmatprep.mubr.bf16.mxu1 %v4171_v56  ;;  %v4151_v62 = vmax.f32 %v4104_v39, 0.0 }
 0xf58   : > { %v4107_v12 = vpop.f32.mrf.mxu0  ;;  %4378 = vmatmul.mubr.bf16.gmra.mxu1 %v4170_v31 }
 0xf59   : > { %v4108_v36 = vadd.f32 %v4107_v12, %v8491_v63  ;;  %v4152_v18 = vmax.f32 %v4106_v34, 0.0 }
 0xf5b   : > { %v4153_v38 = vmax.f32 %v4108_v36, 0.0  ;;  %v4172_v49 = vpack.c.bf16 %v4152_v18, %v4150_v58 }
 0xf5d   : > { %v4173_v52 = vpack.c.bf16 %v4153_v38, %v4151_v62  ;;  %v4111_v33 = vpop.f32.mrf.mxu0 }
 0xf5e   : > { %v4112_v5 = vadd.f32 %v4111_v33, %v8493_v4 }
 0xf5f   : > { %v4113_v60 = vpop.f32.mrf.mxu0  ;;  %4385 = vmatprep.mubr.bf16.mxu1 %v4173_v52 }
 0xf60   : > { %4386 = vmatmul.mubr.bf16.gmra.mxu1 %v4172_v49  ;;  %v4114_v35 = vadd.f32 %v4113_v60, %v8491_v63  ;;  %v4154_v37 = vmax.f32 %v4112_v5, 0.0 }
 0xf61   : > { %v4115_v8 = vpop.f32.mrf.mxu0 }
 0xf62   : > { %v4116_v3 = vadd.f32 %v4115_v8, %v8493_v4  ;;  %v4155_v50 = vmax.f32 %v4114_v35, 0.0 }
 0xf63   : > { %v4117_v24 = vpop.f32.mrf.mxu0 }
 0xf64   : > { %v4118_v48 = vadd.f32 %v4117_v24, %v8491_v63  ;;  %v4156_v53 = vmax.f32 %v4116_v3, 0.0 }
 0xf65   : > { %v4121_v10 = vpop.f32.mrf.mxu0 }
 0xf66   : > { %v4157_v54 = vmax.f32 %v4118_v48, 0.0  ;;  %v4174_v26 = vpack.c.bf16 %v4156_v53, %v4154_v37  ;;  %v4122_v22 = vadd.f32 %v4121_v10, %v8493_v4 }
 0xf67   : > { %v4123_v29 = vpop.f32.mrf.mxu0 }
 0xf68   : > { %v4175_v23 = vpack.c.bf16 %v4157_v54, %v4155_v50  ;;  %v4124_v30 = vadd.f32 %v4123_v29, %v8491_v63  ;;  %v4158_v57 = vmax.f32 %v4122_v22, 0.0 }
 0xf69   : > { %v4125_v17 = vpop.f32.mrf.mxu0 }
 0xf6a   : > { %v4126_v42 = vadd.f32 %v4125_v17, %v8493_v4  ;;  %4393 = vmatprep.mubr.bf16.mxu1 %v4175_v23  ;;  %v4159_v41 = vmax.f32 %v4124_v30, 0.0 }
 0xf6b   : > { %v4127_v14 = vpop.f32.mrf.mxu0  ;;  %4394 = vmatmul.mubr.bf16.gmra.mxu1 %v4174_v26 }
 0xf6c   : > { %v4128_v11 = vadd.f32 %v4127_v14, %v8491_v63  ;;  %v4160_v46 = vmax.f32 %v4126_v42, 0.0 }
 0xf6e   : > { %v4161_v13 = vmax.f32 %v4128_v11, 0.0  ;;  %v4176_v32 = vpack.c.bf16 %v4160_v46, %v4158_v57 }
 0xf70   : > { %v4177_v55 = vpack.c.bf16 %v4161_v13, %v4159_v41 }
 0xf72   : > { %4401 = vmatprep.mubr.bf16.mxu1 %v4177_v55 }
 0xf73   : > { %4402 = vmatmul.mubr.bf16.gmra.mxu1 %v4176_v32 }
 0xfd9   : > { %v5305_v44 = vpop.f32.mrf.mxu1 }
 0xfdb   : > { %v5306_v21 = vpop.f32.mrf.mxu1 }
 0xfdc   : > { %v5307_v4 = vadd.f32 %v5306_v21, %v5305_v44 }
 0xfdd   : > { %v5308_v51 = vpop.f32.mrf.mxu1 }
 0xfde   : > { %v4348_v56 = vadd.f32 %v5307_v4, %v8530_v45 }
 0xfdf   : > { %v5309_v63 = vpop.f32.mrf.mxu1 }
 0xfe0   : > { %v5310_v31 = vadd.f32 %v5309_v63, %v5308_v51  ;;  %v8534_v16 = vadd.f32 %v4348_v56, %v8391_v2 }
 0xfe1   : > { %v5311_v39 = vpop.f32.mrf.mxu1 }
 0xfe2   : > { %v4351_v34 = vadd.f32 %v5310_v31, %v8530_v45  ;;  %4428 = vadd.xlane.f32.xlu0 %v8534_v16 }
 0xfe3   : > { %v5312_v9 = vpop.f32.mrf.mxu1 }
 0xfe4   : > { %v5313_v12 = vadd.f32 %v5312_v9, %v5311_v39  ;;  %v8539_v36 = vadd.f32 %v4351_v34, %v8394_v20 }
 0xfe5   : > { %v5314_v18 = vpop.f32.mrf.mxu1 }
 0xfe6   : > { %v4356_v62 = vadd.f32 %v5313_v12, %v8530_v45  ;;  %4430 = vadd.xlane.f32.xlu1 %v8539_v36 }
 0xfe7   : > { %v5315_v38 = vpop.f32.mrf.mxu1 }
 0xfe8   : > { %v5316_v58 = vadd.f32 %v5315_v38, %v5314_v18  ;;  %v8544_v2 = vadd.f32 %v4356_v62, %v8406_v15 }
 0xfe9   : > { %v5317_v52 = vpop.f32.mrf.mxu1 }
 0xfea   : > { %v4359_v33 = vadd.f32 %v5316_v58, %v8530_v45  ;;  %4432 = vadd.xlane.f32.xlu0 %v8544_v2 }
 0xfeb   : > { %v5318_v49 = vpop.f32.mrf.mxu1 }
 0xfec   : > { %v5319_v60 = vadd.f32 %v5318_v49, %v5317_v52  ;;  %v8549_v20 = vadd.f32 %v4359_v33, %v8403_v59 }
 0xfed   : > { %v5320_v8 = vpop.f32.mrf.mxu1 }
 0xfee   : > { %v4364_v35 = vadd.f32 %v5319_v60, %v8530_v45  ;;  %4434 = vadd.xlane.f32.xlu1 %v8549_v20 }
 0xfef   : > { %v5321_v3 = vpop.f32.mrf.mxu1 }
 0xff0   : > { %v5322_v5 = vadd.f32 %v5321_v3, %v5320_v8  ;;  %v8554_v15 = vadd.f32 %v4364_v35, %v8417_v25 }
 0xff1   : > { %v5323_v24 = vpop.f32.mrf.mxu1 }
 0xff2   : > { %v4367_v48 = vadd.f32 %v5322_v5, %v8530_v45  ;;  %4436 = vadd.xlane.f32.xlu0 %v8554_v15 }
 0xff3   : > { %v5324_v53 = vpop.f32.mrf.mxu1 }
 0xff4   : > { %v5325_v10 = vadd.f32 %v5324_v53, %v5323_v24  ;;  %v8559_v59 = vadd.f32 %v4367_v48, %v8420_v47 }
 0xff5   : > { %v5326_v50 = vpop.f32.mrf.mxu1 }
 0xff6   : > { %v4372_v54 = vadd.f32 %v5325_v10, %v8530_v45  ;;  %4438 = vadd.xlane.f32.xlu1 %v8559_v59 }
 0xff7   : > { %v5327_v37 = vpop.f32.mrf.mxu1 }
 0xff8   : > { %v5328_v29 = vadd.f32 %v5327_v37, %v5326_v50  ;;  %v8564_v25 = vadd.f32 %v4372_v54, %v8432_v1 }
 0xffa   : > { %v4375_v23 = vadd.f32 %v5328_v29, %v8530_v45  ;;  %4440 = vadd.xlane.f32.xlu0 %v8564_v25 }
 0xffc   : > { %v8569_v26 = vadd.f32 %v4375_v23, %v8429_v61 }
 0xffe   : > { %4442 = vadd.xlane.f32.xlu1 %v8569_v26 }
0x1018   : > { %v5329_v47 = vpop.f32.mrf.mxu1 }
0x101a   : > { %v5330_v17 = vpop.f32.mrf.mxu1 }
0x101b   : > { %v5331_v30 = vadd.f32 %v5330_v17, %v5329_v47 }
0x101c   : > { %v5332_v42 = vpop.f32.mrf.mxu1 }
0x101d   : > { %v4380_v22 = vadd.f32 %v5331_v30, %v8530_v45 }
0x101e   : > { %v5333_v14 = vpop.f32.mrf.mxu1 }
0x101f   : > { %v5334_v11 = vadd.f32 %v5333_v14, %v5332_v42  ;;  %v8574_v1 = vadd.f32 %v4380_v22, %v8443_v27 }
0x1020   : > { %v5335_v46 = vpop.f32.mrf.mxu1 }
0x1021   : > { %v4383_v41 = vadd.f32 %v5334_v11, %v8530_v45  ;;  %4444 = vadd.xlane.f32.xlu0 %v8574_v1 }
0x1022   : > { %v5336_v61 = vpop.f32.mrf.mxu1 }
0x1023   : > { %v5337_v13 = vadd.f32 %v5336_v61, %v5335_v46  ;;  %v8579_v57 = vadd.f32 %v4383_v41, %v8446_v6 }
0x1024   : > { %v5338_v55 = vpop.f32.mrf.mxu1 }
0x1025   : > { %v4388_v32 = vadd.f32 %v5337_v13, %v8530_v45  ;;  %4446 = vadd.xlane.f32.xlu1 %v8579_v57 }
0x1026   : > { %v5339_v44 = vpop.f32.mrf.mxu1 }
0x1027   : > { %v5340_v21 = vadd.f32 %v5339_v44, %v5338_v55  ;;  %v8584_v27 = vadd.f32 %v4388_v32, %v8458_v28 }
0x1029   : > { %v4391_v4 = vadd.f32 %v5340_v21, %v8530_v45  ;;  %4448 = vadd.xlane.f32.xlu0 %v8584_v27 }
0x102b   : > { %v5341_v51 = vpop.f32.mrf.mxu1  ;;  %v8589_v56 = vadd.f32 %v4391_v4, %v8455_v0 }
0x102d   : > { %4450 = vadd.xlane.f32.xlu1 %v8589_v56  ;;  %v5342_v6 = vpop.f32.mrf.mxu1 }
0x102e   : > { %v5343_v63 = vadd.f32 %v5342_v6, %v5341_v51 }
0x102f   : > { %v5344_v31 = vpop.f32.mrf.mxu1 }
0x1030   : > { %v4396_v39 = vadd.f32 %v5343_v63, %v8530_v45 }
0x1031   : > { %v5345_v34 = vpop.f32.mrf.mxu1 }
0x1032   : > { %v5346_v9 = vadd.f32 %v5345_v34, %v5344_v31  ;;  %v8594_v28 = vadd.f32 %v4396_v39, %v8469_v43 }
0x1033   : > { %v5347_v12 = vpop.f32.mrf.mxu1 }
0x1034   : > { %v4399_v18 = vadd.f32 %v5346_v9, %v8530_v45  ;;  %4452 = vadd.xlane.f32.xlu0 %v8594_v28 }
0x1035   : > { %v5348_v62 = vpop.f32.mrf.mxu1 }
0x1036   : > { %v5349_v0 = vadd.f32 %v5348_v62, %v5347_v12  ;;  %v8599_v38 = vadd.f32 %v4399_v18, %v8472_v40 }
0x1037   : > { %v5350_v58 = vpop.f32.mrf.mxu1 }
0x1038   : > { %v4404_v52 = vadd.f32 %v5349_v0, %v8530_v45  ;;  %4454 = vadd.xlane.f32.xlu1 %v8599_v38 }
0x1039   : > { %v5351_v33 = vpop.f32.mrf.mxu1 }
0x103a   : > { %v5352_v49 = vadd.f32 %v5351_v33, %v5350_v58  ;;  %v8604_v43 = vadd.f32 %v4404_v52, %v8484_v19 }
0x103c   : > { %v4407_v60 = vadd.f32 %v5352_v49, %v8530_v45  ;;  %4456 = vadd.xlane.f32.xlu0 %v8604_v43 }
0x103e   : > { %v8609_v8 = vadd.f32 %v4407_v60, %v8481_v7 }
0x1040   : > { %4458 = vadd.xlane.f32.xlu1 %v8609_v8 }
0x106b   : > { %v4429_v40 = vpop.xlane.xlu0 %4428 }
0x106c   : > { %v4460_v35 = vmul.f32 0.0078125, %v4429_v40 }
0x106e   : > { %v8613_v3 = vsub.f32 %v8534_v16, %v4460_v35 }
0x106f   : > { %v4431_v5 = vpop.xlane.xlu1 %4430 }
0x1070   : > { %v4461_v24 = vmul.f32 0.0078125, %v4431_v5  ;;  %v4492_v19 = vmul.f32 %v8613_v3, %v8613_v3 }
0x1072   : > { %v8618_v48 = vsub.f32 %v8539_v36, %v4461_v24  ;;  %4508 = vadd.xlane.f32.xlu0 %v4492_v19 }
0x1073   : > { %v4433_v45 = vpop.xlane.xlu0 %4432 }
0x1074   : > { %v4462_v53 = vmul.f32 0.0078125, %v4433_v45  ;;  %v4493_v7 = vmul.f32 %v8618_v48, %v8618_v48 }
0x1076   : > { %v8623_v10 = vsub.f32 %v8544_v2, %v4462_v53  ;;  %4510 = vadd.xlane.f32.xlu1 %v4493_v7 }
0x1077   : > { %v4435_v16 = vpop.xlane.xlu1 %4434 }
0x1078   : > { %v4463_v50 = vmul.f32 0.0078125, %v4435_v16  ;;  %v4494_v54 = vmul.f32 %v8623_v10, %v8623_v10 }
0x107a   : > { %v8628_v37 = vsub.f32 %v8549_v20, %v4463_v50  ;;  %4512 = vadd.xlane.f32.xlu0 %v4494_v54 }
0x107b   : > { %v4437_v36 = vpop.xlane.xlu0 %4436 }
0x107c   : > { %v4464_v29 = vmul.f32 0.0078125, %v4437_v36  ;;  %v4495_v23 = vmul.f32 %v8628_v37, %v8628_v37 }
0x107e   : > { %v8633_v47 = vsub.f32 %v8554_v15, %v4464_v29  ;;  %4514 = vadd.xlane.f32.xlu1 %v4495_v23 }
0x107f   : > { %v4439_v2 = vpop.xlane.xlu1 %4438 }
0x1080   : > { %v4465_v17 = vmul.f32 0.0078125, %v4439_v2  ;;  %v4496_v30 = vmul.f32 %v8633_v47, %v8633_v47 }
0x1082   : > { %v8638_v42 = vsub.f32 %v8559_v59, %v4465_v17  ;;  %4516 = vadd.xlane.f32.xlu0 %v4496_v30 }
0x1083   : > { %v4441_v20 = vpop.xlane.xlu0 %4440 }
0x1084   : > { %v4466_v22 = vmul.f32 0.0078125, %v4441_v20  ;;  %v4497_v14 = vmul.f32 %v8638_v42, %v8638_v42 }
0x1086   : > { %v8643_v11 = vsub.f32 %v8564_v25, %v4466_v22  ;;  %4518 = vadd.xlane.f32.xlu1 %v4497_v14 }
0x1087   : > { %v4443_v15 = vpop.xlane.xlu1 %4442 }
0x1088   : > { %v4467_v46 = vmul.f32 0.0078125, %v4443_v15  ;;  %v4498_v41 = vmul.f32 %v8643_v11, %v8643_v11 }
0x108a   : > { %v8648_v61 = vsub.f32 %v8569_v26, %v4467_v46  ;;  %4520 = vadd.xlane.f32.xlu0 %v4498_v41 }
0x108c   : > { %v4499_v59 = vmul.f32 %v8648_v61, %v8648_v61 }
0x108e   : > { %4522 = vadd.xlane.f32.xlu1 %v4499_v59 }
0x10aa   : > { %v4445_v13 = vpop.xlane.xlu0 %4444 }
0x10ab   : > { %v4468_v55 = vmul.f32 0.0078125, %v4445_v13 }
0x10ad   : > { %v8653_v32 = vsub.f32 %v8574_v1, %v4468_v55 }
0x10ae   : > { %v4447_v25 = vpop.xlane.xlu1 %4446 }
0x10af   : > { %v4469_v44 = vmul.f32 0.0078125, %v4447_v25  ;;  %v4500_v21 = vmul.f32 %v8653_v32, %v8653_v32 }
0x10b1   : > { %v8658_v4 = vsub.f32 %v8579_v57, %v4469_v44  ;;  %4524 = vadd.xlane.f32.xlu0 %v4500_v21 }
0x10b2   : > { %v4449_v26 = vpop.xlane.xlu0 %4448 }
0x10b3   : > { %v4470_v51 = vmul.f32 0.0078125, %v4449_v26  ;;  %v4501_v6 = vmul.f32 %v8658_v4, %v8658_v4 }
0x10b5   : > { %v8663_v63 = vsub.f32 %v8584_v27, %v4470_v51  ;;  %4526 = vadd.xlane.f32.xlu1 %v4501_v6 }
0x10b6   : > { %v4451_v1 = vpop.xlane.xlu1 %4450 }
0x10b7   : > { %v4471_v31 = vmul.f32 0.0078125, %v4451_v1  ;;  %v4502_v39 = vmul.f32 %v8663_v63, %v8663_v63 }
0x10b9   : > { %v8668_v34 = vsub.f32 %v8589_v56, %v4471_v31  ;;  %4528 = vadd.xlane.f32.xlu0 %v4502_v39 }
0x10bb   : > { %v4503_v57 = vmul.f32 %v8668_v34, %v8668_v34 }
0x10bd   : > { %v4453_v9 = vpop.xlane.xlu0 %4452  ;;  %4530 = vadd.xlane.f32.xlu1 %v4503_v57 }
0x10be   : > { %v4472_v12 = vmul.f32 0.0078125, %v4453_v9 }
0x10c0   : > { %v8673_v18 = vsub.f32 %v8594_v28, %v4472_v12 }
0x10c1   : > { %v4455_v27 = vpop.xlane.xlu1 %4454 }
0x10c2   : > { %v4473_v62 = vmul.f32 0.0078125, %v4455_v27  ;;  %v4504_v0 = vmul.f32 %v8673_v18, %v8673_v18 }
0x10c4   : > { %v8678_v56 = vsub.f32 %v8599_v38, %v4473_v62  ;;  %4532 = vadd.xlane.f32.xlu0 %v4504_v0 }
0x10c5   : > { %v4457_v58 = vpop.xlane.xlu0 %4456 }
0x10c6   : > { %v4474_v52 = vmul.f32 0.0078125, %v4457_v58  ;;  %v4505_v33 = vmul.f32 %v8678_v56, %v8678_v56 }
0x10c8   : > { %v8683_v28 = vsub.f32 %v8604_v43, %v4474_v52  ;;  %4534 = vadd.xlane.f32.xlu1 %v4505_v33 }
0x10c9   : > { %v4459_v49 = vpop.xlane.xlu1 %4458 }
0x10ca   : > { %v4475_v60 = vmul.f32 0.0078125, %v4459_v49  ;;  %v4506_v40 = vmul.f32 %v8683_v28, %v8683_v28 }
0x10cc   : > { %v8688_v38 = vsub.f32 %v8609_v8, %v4475_v60  ;;  %4536 = vadd.xlane.f32.xlu0 %v4506_v40 }
0x10ce   : > { %v4507_v35 = vmul.f32 %v8688_v38, %v8688_v38 }
0x10d0   : > { %4538 = vadd.xlane.f32.xlu1 %v4507_v35 }
0x10d1   : > { %6545 = shalt.err (!%p6542_p6)
}
0x10d2   : > { %s6546_s3 = scalar_lea.hbm %s8697_s26, 8192  ;;  %s6550_s27 = scalar_lea.hbm %s8935_s14, 16384 }
0x10d3   : > { %p6547_p4 = scmp.ne.s32.totalorder %s8697_s26, %s6546_s3  ;;  %p6551_p12 = scmp.lt.s32.totalorder %s8697_s26, %s8935_s14 }
0x10d4   : > { %p6552_p7 = scmp.lt.s32.totalorder %s6550_s27, %s6546_s3 }
0x10d5   : > { %p6548_p5 = pnand %p6547_p4, %p6922_p11 }
0x10d6   : > { %p6553_p1 = por %p6552_p7, %p6551_p12 }
0x10d7   : > { %p6549_p8 = pneg %p6548_p5 }
0x10d9   : > { %p6554_p3 = pnand %p6553_p1, %p6549_p8 }
0x10db   : > { %6557 = shalt.err (!%p6554_p3)
}
0x10dc   : > { %s6681_s19 = smov 128   ;;  %s6682_s1 = smov 8  }
0x10dd   : > { %5798 = dma.vmem_to_hbm [thread:$0]  (%p6922_p11), %s8699_s4, 8192, %s8697_s26, %s4670_s23, %s6681_s19, %s6681_s19, %s6682_s1  }
0x10de   : > { %s8936_s23 = sld [smem:[#allocation45_spill]]  ;;  %s8742_s15 = scalar_lea.vmem [#allocation17], %s6976_s12 }
0x10df   : > { %s8937_s28 = sld [smem:[#allocation46_spill]]  ;;  %s5095_s12 = sshll.u32 %s8933_s18, 11 }
0x10e0   : > { %s4685_s3 = sshll.u32 %s8742_s15, 4  ;;  %s8938_s27 = sld [smem:[#allocation47_spill]]  ;;  %s8810_s3 = int_to_ptr.vmem [resolvable:$true] %s4685_s3 }
0x10e1   : > { %s4665_s8 = scalar_lea.sflag [#allocation5], %s6973_s6  ;;  %s6558_s4 = scalar_lea.vmem %s8810_s3, 2048 }
0x10e2   : > { %p6559_p10 = scmp.ne.s32.totalorder %s8810_s3, %s6558_s4  ;;  %s6683_s18 = smov [#allocation17]  }
0x10e3   : > { %s6562_s26 = sshll.u32 %s6683_s18, 4  ;;  %s6563_s26 = int_to_ptr.vmem [resolvable:$false] %s6562_s26 }
0x10e4   : > { %v8730_v17 = vld [vmem:[%s8936_s23] ss:$0 sm:$0xff]  ;;  %p6560_p13 = pnand %p6559_p10, %p6922_p11  ;;  %s6564_s23 = scalar_lea.vmem %s6563_s26, 4096 }
0x10e5   : > { %v8736_v22 = vld [vmem:[%s8937_s28] ss:$0 sm:$0xff]  ;;  %p6565_p9 = scmp.lt.s32.totalorder %s8810_s3, %s6563_s26  ;;  %p6566_p6 = scmp.lt.s32.totalorder %s6564_s23, %s6558_s4 }
0x10e6   : > { %s8808_s21 = scalar_lea.hbm %s8938_s27, %s5095_s12  ;;  %p6561_p2 = pneg %p6560_p13 }
0x10e7   : > { %p6567_p4 = por %p6566_p6, %p6565_p9 }
0x10e9   : > { %p6568_p5 = pnand %p6567_p4, %p6561_p2 }
0x10fb   : > { %v4509_v43 = vpop.xlane.xlu0 %4508 }
0x10fc   : > { %v4540_v8 = vmul.f32 0.0078125, %v4509_v43 }
0x10fe   : > { %v4556_v5 = vadd.f32 1e-05, %v4540_v8 }
0x10ff   : > { %v4511_v24 = vpop.xlane.xlu1 %4510 }
0x1100   : > { %6272 = vrsqrt.f32 %v4556_v5  ;;  %v4541_v19 = vmul.f32 0.0078125, %v4511_v24 }
0x1102   : > { %v4557_v45 = vadd.f32 1e-05, %v4541_v19 }
0x1103   : > { %v4513_v53 = vpop.xlane.xlu0 %4512 }
0x1104   : > { %6274 = vrsqrt.f32 %v4557_v45  ;;  %v4542_v7 = vmul.f32 0.0078125, %v4513_v53 }
0x1106   : > { %v4558_v16 = vadd.f32 1e-05, %v4542_v7 }
0x1107   : > { %v4515_v50 = vpop.xlane.xlu1 %4514 }
0x1108   : > { %6276 = vrsqrt.f32 %v4558_v16  ;;  %v4543_v54 = vmul.f32 0.0078125, %v4515_v50 }
0x110a   : > { %v4559_v36 = vadd.f32 1e-05, %v4543_v54 }
0x110b   : > { %v4517_v29 = vpop.xlane.xlu0 %4516 }
0x110c   : > { %6278 = vrsqrt.f32 %v4559_v36  ;;  %v4544_v23 = vmul.f32 0.0078125, %v4517_v29 }
0x110d   : > { %v6273_v2 = vpop.eup %6272 }
0x110e   : > { %v4588_v30 = vmul.f32 %v6273_v2, %v8613_v3  ;;  %v4560_v20 = vadd.f32 1e-05, %v4544_v23 }
0x110f   : > { %v4519_v14 = vpop.xlane.xlu1 %4518 }
0x1110   : > { %v4610_v15 = vmul.f32 %v8730_v17, %v4588_v30  ;;  %6280 = vrsqrt.f32 %v4560_v20  ;;  %v4545_v46 = vmul.f32 0.0078125, %v4519_v14 }
0x1111   : > { %v6275_v41 = vpop.eup %6274 }
0x1112   : > { %v4632_v59 = vadd.f32 %v8736_v22, %v4610_v15  ;;  %v4589_v13 = vmul.f32 %v6275_v41, %v8618_v48  ;;  %v4561_v55 = vadd.f32 1e-05, %v4545_v46 }
0x1113   : > { %v4521_v25 = vpop.xlane.xlu0 %4520 }
0x1114   : > { %4648 = vst [vmem:[%s8742_s15] sm:$0xff] %v4632_v59  ;;  %v4611_v3 = vmul.f32 %v8730_v17, %v4589_v13  ;;  %6282 = vrsqrt.f32 %v4561_v55  ;;  %v4546_v44 = vmul.f32 0.0078125, %v4521_v25 }
0x1115   : > { %v6277_v21 = vpop.eup %6276 }
0x1116   : > { %v4633_v26 = vadd.f32 %v8736_v22, %v4611_v3  ;;  %v4590_v51 = vmul.f32 %v6277_v21, %v8623_v10  ;;  %v4562_v6 = vadd.f32 1e-05, %v4546_v44 }
0x1117   : > { %v4523_v48 = vpop.xlane.xlu1 %4522 }
0x1118   : > { %4649 = vst [vmem:[%s8742_s15 + $0x8] sm:$0xff] %v4633_v26  ;;  %v4612_v1 = vmul.f32 %v8730_v17, %v4590_v51  ;;  %6284 = vrsqrt.f32 %v4562_v6  ;;  %v4547_v31 = vmul.f32 0.0078125, %v4523_v48 }
0x1119   : > { %v6279_v39 = vpop.eup %6278 }
0x111a   : > { %v4634_v57 = vadd.f32 %v8736_v22, %v4612_v1  ;;  %v4591_v9 = vmul.f32 %v6279_v39, %v8628_v37  ;;  %v4563_v12 = vadd.f32 1e-05, %v4547_v31 }
0x111c   : > { %4650 = vst [vmem:[%s8742_s15 + $0x10] sm:$0xff] %v4634_v57  ;;  %v4613_v27 = vmul.f32 %v8730_v17, %v4591_v9  ;;  %6286 = vrsqrt.f32 %v4563_v12 }
0x111d   : > { %v6281_v10 = vpop.eup %6280 }
0x111e   : > { %v4635_v62 = vadd.f32 %v8736_v22, %v4613_v27  ;;  %v4592_v0 = vmul.f32 %v6281_v10, %v8633_v47 }
0x1120   : > { %4651 = vst [vmem:[%s8742_s15 + $0x18] sm:$0xff] %v4635_v62  ;;  %v4614_v58 = vmul.f32 %v8730_v17, %v4592_v0 }
0x1121   : > { %v6283_v52 = vpop.eup %6282 }
0x1122   : > { %v4636_v33 = vadd.f32 %v8736_v22, %v4614_v58  ;;  %v4593_v37 = vmul.f32 %v6283_v52, %v8638_v42 }
0x1124   : > { %4652 = vst [vmem:[%s8742_s15 + $0x20] sm:$0xff] %v4636_v33  ;;  %v4615_v49 = vmul.f32 %v8730_v17, %v4593_v37 }
0x1125   : > { %v6285_v60 = vpop.eup %6284 }
0x1126   : > { %v4637_v40 = vadd.f32 %v8736_v22, %v4615_v49  ;;  %v4594_v35 = vmul.f32 %v6285_v60, %v8643_v11 }
0x1128   : > { %4653 = vst [vmem:[%s8742_s15 + $0x28] sm:$0xff] %v4637_v40  ;;  %v4616_v47 = vmul.f32 %v8730_v17, %v4594_v35 }
0x1129   : > { %v6287_v43 = vpop.eup %6286 }
0x112a   : > { %v4638_v8 = vadd.f32 %v8736_v22, %v4616_v47  ;;  %v4595_v5 = vmul.f32 %v6287_v43, %v8648_v61 }
0x112c   : > { %4654 = vst [vmem:[%s8742_s15 + $0x30] sm:$0xff] %v4638_v8  ;;  %v4617_v24 = vmul.f32 %v8730_v17, %v4595_v5 }
0x112e   : > { %v4639_v42 = vadd.f32 %v8736_v22, %v4617_v24 }
0x1130   : > { %4655 = vst [vmem:[%s8742_s15 + $0x38] sm:$0xff] %v4639_v42 }
0x113a   : > { %v4525_v19 = vpop.xlane.xlu0 %4524 }
0x113b   : > { %v4548_v45 = vmul.f32 0.0078125, %v4525_v19 }
0x113d   : > { %v4564_v53 = vadd.f32 1e-05, %v4548_v45 }
0x113e   : > { %v4527_v7 = vpop.xlane.xlu1 %4526 }
0x113f   : > { %6288 = vrsqrt.f32 %v4564_v53  ;;  %v4549_v11 = vmul.f32 0.0078125, %v4527_v7 }
0x1141   : > { %v4565_v16 = vadd.f32 1e-05, %v4549_v11 }
0x1142   : > { %v4529_v50 = vpop.xlane.xlu0 %4528 }
0x1143   : > { %6290 = vrsqrt.f32 %v4565_v16  ;;  %v4550_v54 = vmul.f32 0.0078125, %v4529_v50 }
0x1145   : > { %v4566_v36 = vadd.f32 1e-05, %v4550_v54 }
0x1146   : > { %v4531_v29 = vpop.xlane.xlu1 %4530 }
0x1147   : > { %6292 = vrsqrt.f32 %v4566_v36  ;;  %v4551_v61 = vmul.f32 0.0078125, %v4531_v29 }
0x1149   : > { %v4567_v23 = vadd.f32 1e-05, %v4551_v61 }
0x114b   : > { %6294 = vrsqrt.f32 %v4567_v23 }
0x114c   : > { %v6289_v2 = vpop.eup %6288 }
0x114d   : > { %v4596_v30 = vmul.f32 %v6289_v2, %v8653_v32  ;;  %v4533_v20 = vpop.xlane.xlu0 %4532 }
0x114e   : > { %v4552_v14 = vmul.f32 0.0078125, %v4533_v20 }
0x114f   : > { %v4618_v15 = vmul.f32 %v8730_v17, %v4596_v30 }
0x1150   : > { %v6291_v46 = vpop.eup %6290  ;;  %v4568_v41 = vadd.f32 1e-05, %v4552_v14 }
0x1151   : > { %v4640_v59 = vadd.f32 %v8736_v22, %v4618_v15  ;;  %v4597_v13 = vmul.f32 %v6291_v46, %v8658_v4  ;;  %v4535_v55 = vpop.xlane.xlu1 %4534 }
0x1152   : > { %6296 = vrsqrt.f32 %v4568_v41  ;;  %v4553_v25 = vmul.f32 0.0078125, %v4535_v55 }
0x1153   : > { %4656 = vst [vmem:[%s8742_s15 + $0x40] sm:$0xff] %v4640_v59  ;;  %v4619_v3 = vmul.f32 %v8730_v17, %v4597_v13 }
0x1154   : > { %v6293_v44 = vpop.eup %6292  ;;  %v4569_v32 = vadd.f32 1e-05, %v4553_v25 }
0x1155   : > { %v4641_v21 = vadd.f32 %v8736_v22, %v4619_v3  ;;  %v4598_v26 = vmul.f32 %v6293_v44, %v8663_v63  ;;  %v4537_v51 = vpop.xlane.xlu0 %4536 }
0x1156   : > { %6298 = vrsqrt.f32 %v4569_v32  ;;  %v4554_v6 = vmul.f32 0.0078125, %v4537_v51 }
0x1157   : > { %4657 = vst [vmem:[%s8742_s15 + $0x48] sm:$0xff] %v4641_v21  ;;  %v4620_v4 = vmul.f32 %v8730_v17, %v4598_v26 }
0x1158   : > { %v6295_v48 = vpop.eup %6294  ;;  %v4570_v1 = vadd.f32 1e-05, %v4554_v6 }
0x1159   : > { %v4642_v31 = vadd.f32 %v8736_v22, %v4620_v4  ;;  %v4599_v39 = vmul.f32 %v6295_v48, %v8668_v34  ;;  %v4539_v57 = vpop.xlane.xlu1 %4538 }
0x115a   : > { %6300 = vrsqrt.f32 %v4570_v1  ;;  %v4555_v9 = vmul.f32 0.0078125, %v4539_v57 }
0x115b   : > { %4658 = vst [vmem:[%s8742_s15 + $0x50] sm:$0xff] %v4642_v31  ;;  %v4621_v63 = vmul.f32 %v8730_v17, %v4599_v39 }
0x115c   : > { %v4571_v12 = vadd.f32 1e-05, %v4555_v9 }
0x115d   : > { %v4643_v27 = vadd.f32 %v8736_v22, %v4621_v63 }
0x115e   : > { %6302 = vrsqrt.f32 %v4571_v12 }
0x115f   : > { %v6297_v10 = vpop.eup %6296  ;;  %4659 = vst [vmem:[%s8742_s15 + $0x58] sm:$0xff] %v4643_v27 }
0x1160   : > { %v4600_v62 = vmul.f32 %v6297_v10, %v8673_v18 }
0x1162   : > { %v4622_v34 = vmul.f32 %v8730_v17, %v4600_v62 }
0x1163   : > { %v6299_v0 = vpop.eup %6298 }
0x1164   : > { %v4644_v58 = vadd.f32 %v8736_v22, %v4622_v34  ;;  %v4601_v52 = vmul.f32 %v6299_v0, %v8678_v56 }
0x1166   : > { %4660 = vst [vmem:[%s8742_s15 + $0x60] sm:$0xff] %v4644_v58  ;;  %v4623_v33 = vmul.f32 %v8730_v17, %v4601_v52 }
0x1167   : > { %v6301_v37 = vpop.eup %6300 }
0x1168   : > { %v4645_v49 = vadd.f32 %v8736_v22, %v4623_v33  ;;  %v4602_v60 = vmul.f32 %v6301_v37, %v8683_v28 }
0x116a   : > { %4661 = vst [vmem:[%s8742_s15 + $0x68] sm:$0xff] %v4645_v49  ;;  %v4624_v18 = vmul.f32 %v8730_v17, %v4602_v60 }
0x116b   : > { %v6303_v40 = vpop.eup %6302 }
0x116c   : > { %v4646_v35 = vadd.f32 %v8736_v22, %v4624_v18  ;;  %v4603_v47 = vmul.f32 %v6303_v40, %v8688_v38 }
0x116e   : > { %4662 = vst [vmem:[%s8742_s15 + $0x70] sm:$0xff] %v4646_v35  ;;  %v4625_v56 = vmul.f32 %v8730_v17, %v4603_v47 }
0x1170   : > { %v4647_v43 = vadd.f32 %v8736_v22, %v4625_v56 }
0x1172   : > { %4663 = vst [vmem:[%s8742_s15 + $0x78] sm:$0xff] %v4647_v43 }
0x1173   : > { %6571 = shalt.err (!%p6568_p5)
}
0x1174   : > { %s6572_s29 = scalar_lea.hbm %s8808_s21, 2048  ;;  %s6576_s28 = scalar_lea.hbm %s8938_s27, 4096 }
0x1175   : > { %p6573_p8 = scmp.ne.s32.totalorder %s8808_s21, %s6572_s29  ;;  %p6577_p1 = scmp.lt.s32.totalorder %s8808_s21, %s8938_s27 }
0x1176   : > { %p6578_p3 = scmp.lt.s32.totalorder %s6576_s28, %s6572_s29 }
0x1177   : > { %p6574_p12 = pnand %p6573_p8, %p6922_p11 }
0x1178   : > { %p6579_p10 = por %p6578_p3, %p6577_p1 }
0x1179   : > { %p6575_p7 = pneg %p6574_p12 }
0x117b   : > { %p6580_p13 = pnand %p6579_p10, %p6575_p7 }
0x117d   : > { %6583 = shalt.err (!%p6580_p13)
}
0x117e   : > { %5797 = dma.vmem_to_hbm [thread:$0]  (%p6922_p11), %s8810_s3, 2048, %s8808_s21, %s4665_s8, %s6681_s19, %s6681_s19, %s6682_s1  }
0x117f PF: > { %s4718_s25 = sand.u32 1, %s6642_s0   ;;  %p8939_p2 = scmp.ge.s32.totalorder %s6662_s22, 2 }
0x1180   : > { %s4719_s17 = scalar_lea.sflag [#allocation5], %s4718_s25 }
0x1181   : > { %p5828_p9 = pnand %p8939_p2, %p6929_p0 }
0x1183   : > { %p5829_p6 = pneg %p5828_p9 }
0x1185   : > { %6633 = dma.done.wait (%p5829_p6), %s4719_s17, 2048  }
0x1186   : > { %6635 = vsyncadd (%p5829_p6), %s4719_s17, 4294965248  ;;  %s4728_s4 = scalar_lea.sflag [#allocation19], %s4718_s25 }
0x1187   : > { %6637 = dma.done.wait (%p5829_p6), %s4728_s4, 8192  }
0x1188   : > { %6639 = vsyncadd (%p5829_p6), %s4728_s4, 4294959104  ;;  %s45_s22 = sadd.s32 1, %s6662_s22   ;;  %s8940_s24 = sld [smem:[#allocation31_spill]] }
0x1189   : > { %p42_p4 = scmp.ge.s32.totalorder %s45_s22, 4   ;;  %s8941_s21 = sld [smem:[#allocation29_spill]] }
0x118a   : > { %s8942_s1 = sld [smem:[#allocation30_spill]]  ;;  %s8943_s0 = smov %s6646_s30 }
0x118b   : > { %s8944_s30 = smov %s6650_s20  ;;  %44 = sbr.rel (!%p42_p4) target bundleno = 28 (0x1c), region = 194 }
0x118e   : > { %s8945_s20 = smov %s8940_s24 }
0x1190   :  { %4733 = vsyncpa [#allocation4], 1 }
0x1191   :  { %4735 = vsyncpa [#allocation4 + $0x1], 1 }
0x1192   :  { %4736 = vsyncpa [#allocation7], 1 }
0x1193   :  { %4738 = vsyncpa [#allocation7 + $0x1], 1 }
0x1194   :  { %4739 = vsyncpa [#allocation10], 1 }
0x1195   :  { %4740 = vsyncpa [#allocation13], 1 }
0x1196   :  { %4741 = vsyncpa [#allocation16], 1 }
0x1197   :  { %4742 = vsyncpa [#allocation5], 1 }
0x1198   :  { %4744 = vsyncpa [#allocation5 + $0x1], 1 }
0x1199   :  { %4745 = vsyncpa [#allocation19], 1 }
0x119a   :  { %4747 = vsyncpa [#allocation19 + $0x1], 1 }

</bundles_post_ra>
